<compile_context>
chip_gen: v6e
topology: v6e:2x2x1
jax: 0.10.0
libtpu: 0.0.40
codegen_flags: <defaults>
</compile_context>

<pallas_src>
import jax
import jax.numpy as jnp
from jax.experimental import pallas as pl
from jax.experimental.pallas import tpu as pltpu


INPUT_SIZE = 100
NUM_CLASSES = 50
_SIZES = [(100, 1000), (1000, 5000), (5000, 100), (100, 50)]

# Layer-2 output tile: 1280 = 10*128 (lane-dense, multiple of 256 for the MXU),
# 5120 / 1280 = 4 grid steps.  W2 tile = 1024x1280 bf16 = 2.5 MB (5 MB
# double-buffered); W3 tile = 1280x128 bf16 = 0.31 MB.
TN2 = 1280


def _round_up(x, m):
    return ((x + m - 1) // m) * m


# ---------------------------------------------------------------------------
# Fused kernel: fc1 + ReLU + fc2 + ReLU + fc3 (accumulated) + ReLU + fc4.
# Grid: reduction over the fc2 output / fc3 input dimension (4 steps).
# ---------------------------------------------------------------------------
def _fused_kernel(x_ref, w1_ref, b1_ref, w2_ref, b2_ref, w3_ref, b3_ref,
                  w4_ref, b4_ref, o_ref, acc_ref):
    j = pl.program_id(0)

    @pl.when(j == 0)
    def _init():
        acc_ref[...] = jnp.zeros_like(acc_ref)

    # Layer 1 (resident x/W1/b1; recomputed per step, ~free: 8x128x1024).
    x_bf = x_ref[...].astype(jnp.bfloat16)
    h1 = jnp.dot(x_bf, w1_ref[...], preferred_element_type=jnp.float32)
    h1 = jnp.maximum(h1 + b1_ref[...], 0.0)

    # Layer 2, one contiguous pre-tiled column block of W2.
    h2 = jnp.dot(h1.astype(jnp.bfloat16), w2_ref[0],
                 preferred_element_type=jnp.float32)
    h2 = jnp.maximum(h2 + b2_ref[0], 0.0)

    # Layer 3 partial reduction into the f32 VMEM accumulator.
    acc_ref[...] += jnp.dot(h2.astype(jnp.bfloat16), w3_ref[0],
                            preferred_element_type=jnp.float32)

    # Epilogue on the last step: bias/ReLU of layer 3, then layer 4.
    @pl.when(j == pl.num_programs(0) - 1)
    def _epilogue():
        h3 = jnp.maximum(acc_ref[...] + b3_ref[...], 0.0)
        y = jnp.dot(h3.astype(jnp.bfloat16), w4_ref[...],
                    preferred_element_type=jnp.float32) + b4_ref[...]
        o_ref[...] = y.astype(o_ref.dtype)


def _fused_call(x_p, w1, b1, w2t, b2t, w3t, b3, w4, b4):
    Mp, K1p = x_p.shape
    _, N1p = w1.shape
    n_steps, _, tn2 = w2t.shape
    _, _, N3p = w3t.shape
    _, N4p = w4.shape
    N2p = n_steps * tn2

    flops = 2 * (n_steps * Mp * K1p * N1p + Mp * N1p * N2p
                 + Mp * N2p * N3p + Mp * N3p * N4p)
    bytes_accessed = (4 * x_p.size + 2 * w1.size + 4 * b1.size
                      + 2 * w2t.size + 4 * b2t.size + 2 * w3t.size
                      + 4 * b3.size + 2 * w4.size + 4 * b4.size
                      + 4 * Mp * N4p)

    return pl.pallas_call(
        _fused_kernel,
        out_shape=jax.ShapeDtypeStruct((Mp, N4p), jnp.float32),
        grid_spec=pltpu.PrefetchScalarGridSpec(
            num_scalar_prefetch=0,
            grid=(n_steps,),
            in_specs=[
                pl.BlockSpec((Mp, K1p), lambda j: (0, 0)),         # x   (resident)
                pl.BlockSpec((K1p, N1p), lambda j: (0, 0)),        # W1  (resident)
                pl.BlockSpec((1, N1p), lambda j: (0, 0)),          # b1  (resident)
                pl.BlockSpec((1, N1p, tn2), lambda j: (j, 0, 0)),  # W2 tile (contig)
                pl.BlockSpec((1, 1, tn2), lambda j: (j, 0, 0)),    # b2 tile
                pl.BlockSpec((1, tn2, N3p), lambda j: (j, 0, 0)),  # W3 tile (contig)
                pl.BlockSpec((1, N3p), lambda j: (0, 0)),          # b3  (resident)
                pl.BlockSpec((N3p, N4p), lambda j: (0, 0)),        # W4  (resident)
                pl.BlockSpec((1, N4p), lambda j: (0, 0)),          # b4  (resident)
            ],
            out_specs=pl.BlockSpec((Mp, N4p), lambda j: (0, 0)),
            scratch_shapes=[pltpu.VMEM((Mp, N3p), jnp.float32)],
        ),
        compiler_params=pltpu.CompilerParams(
            dimension_semantics=("arbitrary",),   # reduction axis
        ),
        cost_estimate=pl.CostEstimate(
            flops=int(flops), transcendentals=0,
            bytes_accessed=int(bytes_accessed)),
    )(x_p, w1, b1, w2t, b2t, w3t, b3, w4, b4)


# ---------------------------------------------------------------------------
# Parameters
# ---------------------------------------------------------------------------
def init_params(key):
    """Deterministic init matching nn.Linear's U(-1/sqrt(fin), 1/sqrt(fin)).

    Weights stored as (in_features, out_features), f32 master copies."""
    params = []
    for i, (fin, fout) in enumerate(_SIZES):
        kw, kb = jax.random.split(jax.random.fold_in(key, i))
        bound = 1.0 / jnp.sqrt(jnp.float32(fin))
        w = jax.random.uniform(kw, (fin, fout), jnp.float32, -bound, bound)
        b = jax.random.uniform(kb, (fout,), jnp.float32, -bound, bound)
        params.append((w, b))
    return params


def pad_params(params, tn2=TN2):
    """One-time padding / pre-tiling / bf16 cast of weights (outside forward).

    * Zero padding to 128-multiples contributes exactly zero through every
      layer (ReLU(0)=0, zero rows/cols), so results are unchanged.
    * W2 is pre-tiled to (n_steps, K, TN2) and W3/b2 to matching slabs so each
      grid step's weight DMA is one contiguous block.
    * Weights are bf16 (halves HBM traffic); biases stay f32."""
    (w1, b1), (w2, b2), (w3, b3), (w4, b4) = params

    K1p = _round_up(w1.shape[0], 128)
    N1p = _round_up(w1.shape[1], 128)
    N2p = _round_up(_round_up(w2.shape[1], 128), tn2)
    N3p = _round_up(w3.shape[1], 128)
    N4p = _round_up(w4.shape[1], 128)
    n_steps = N2p // tn2

    def pad2(w, rp, cp):
        return jnp.pad(w, ((0, rp - w.shape[0]), (0, cp - w.shape[1])))

    w1p = pad2(w1, K1p, N1p).astype(jnp.bfloat16)
    b1p = jnp.pad(b1, (0, N1p - b1.shape[0])).reshape(1, N1p)

    w2p = pad2(w2, N1p, N2p)
    w2t = w2p.reshape(N1p, n_steps, tn2).transpose(1, 0, 2).astype(jnp.bfloat16)
    b2t = jnp.pad(b2, (0, N2p - b2.shape[0])).reshape(n_steps, 1, tn2)

    w3p = pad2(w3, N2p, N3p)
    w3t = w3p.reshape(n_steps, tn2, N3p).astype(jnp.bfloat16)
    b3p = jnp.pad(b3, (0, N3p - b3.shape[0])).reshape(1, N3p)

    w4p = pad2(w4, N3p, N4p).astype(jnp.bfloat16)
    b4p = jnp.pad(b4, (0, N4p - b4.shape[0])).reshape(1, N4p)

    return (w1p, b1p, w2t, b2t, w3t, b3p, w4p, b4p)


# ---------------------------------------------------------------------------
# Forward
# ---------------------------------------------------------------------------
@jax.jit
def net_rand_forward(padded_params, x):
    w1, b1, w2t, b2t, w3t, b3, w4, b4 = padded_params
    M, K = x.shape
    Mp = _round_up(M, 8)
    K1p = w1.shape[0]
    # Padding x is tiny; padded rows never mix with real rows (matmuls are
    # row-independent) and are sliced off at the end.
    x_p = jnp.pad(x, ((0, Mp - M), (0, K1p - K)))
    y_p = _fused_call(x_p, w1, b1, w2t, b2t, w3t, b3, w4, b4)
    return y_p[:M, :NUM_CLASSES]


# ---------------------------------------------------------------------------
# References
# ---------------------------------------------------------------------------
def net_rand_reference_f32(params, x):
    (w1, b1), (w2, b2), (w3, b3), (w4, b4) = params
    h = jnp.maximum(x @ w1 + b1, 0.0)
    h = jnp.maximum(h @ w2 + b2, 0.0)
    h = jnp.maximum(h @ w3 + b3, 0.0)
    return h @ w4 + b4


def net_rand_reference_bf16(params, x):
    """Same quantization scheme as the kernel (bf16 operands, f32 accumulate)."""
    h = x
    for i, (w, b) in enumerate(params):
        h = jnp.dot(h.astype(jnp.bfloat16), w.astype(jnp.bfloat16),
                    preferred_element_type=jnp.float32) + b
        if i < len(params) - 1:
            h = jnp.maximum(h, 0.0)
    return h


if __name__ == "__main__":
    key = jax.random.PRNGKey(0)
    pkey, xkey = jax.random.split(key)

    params = init_params(pkey)
    padded_params = pad_params(params)   # one-time padding / tiling / bf16

    batch = 2
    x = jax.random.normal(xkey, (batch, INPUT_SIZE), jnp.float32)

    y = jax.block_until_ready(net_rand_forward(padded_params, x))
    assert y.shape == (batch, NUM_CLASSES), y.shape

    # Tight check against a reference using the same bf16 quantization.
    y_q = net_rand_reference_bf16(params, x)
    assert jnp.allclose(y, y_q, atol=1e-2, rtol=1e-2), (
        float(jnp.max(jnp.abs(y - y_q))))

    # Loose check against the full-f32 reference (bf16 weight quantization
    # introduces ~0.1-1% deviations).
    y_f = net_rand_reference_f32(params, x)
    assert jnp.allclose(y, y_f, atol=5e-2, rtol=5e-2), (
        float(jnp.max(jnp.abs(y - y_f))))

    print("KERNEL_OK")
</pallas_src>

<mosaic_0001>
module attributes {stable_mosaic.version = 11 : i64} {
  func.func @_fused_kernel(%arg0: i32, %arg1: memref<8x128xf32, #tpu.memory_space<vmem>>, %arg2: memref<128x1024xbf16, #tpu.memory_space<vmem>>, %arg3: memref<1x1024xf32, #tpu.memory_space<vmem>>, %arg4: memref<1x1024x1280xbf16, #tpu.memory_space<vmem>>, %arg5: memref<1x1x1280xf32, #tpu.memory_space<vmem>>, %arg6: memref<1x1280x128xbf16, #tpu.memory_space<vmem>>, %arg7: memref<1x128xf32, #tpu.memory_space<vmem>>, %arg8: memref<128x128xbf16, #tpu.memory_space<vmem>>, %arg9: memref<1x128xf32, #tpu.memory_space<vmem>>, %arg10: memref<8x128xf32, #tpu.memory_space<vmem>>, %arg11: memref<8x128xf32, #tpu.memory_space<vmem>>) attributes {dimension_semantics = [#tpu.dimension_semantics<arbitrary>], iteration_bounds = array<i64: 4>, scalar_prefetch = 0 : i64, scratch_operands = 1 : i64, tpu.core_type = #tpu.core_type<tc>, window_params = [{pipeline_mode = #tpu.pipeline_mode<synchronous>, transform_indices = @transform_0, window_bounds = array<i64: 8, 128>}, {pipeline_mode = #tpu.pipeline_mode<synchronous>, transform_indices = @transform_1, window_bounds = array<i64: 128, 1024>}, {pipeline_mode = #tpu.pipeline_mode<synchronous>, transform_indices = @transform_2, window_bounds = array<i64: 1, 1024>}, {transform_indices = @transform_3, window_bounds = array<i64: 1, 1024, 1280>}, {transform_indices = @transform_4, window_bounds = array<i64: 1, 1, 1280>}, {transform_indices = @transform_5, window_bounds = array<i64: 1, 1280, 128>}, {pipeline_mode = #tpu.pipeline_mode<synchronous>, transform_indices = @transform_6, window_bounds = array<i64: 1, 128>}, {pipeline_mode = #tpu.pipeline_mode<synchronous>, transform_indices = @transform_7, window_bounds = array<i64: 128, 128>}, {pipeline_mode = #tpu.pipeline_mode<synchronous>, transform_indices = @transform_8, window_bounds = array<i64: 1, 128>}, {pipeline_mode = #tpu.pipeline_mode<synchronous>, transform_indices = @transform_9, window_bounds = array<i64: 8, 128>}]} {
    %c0_i32 = arith.constant 0 : i32
    %0 = arith.cmpi eq, %arg0, %c0_i32 : i32
    %1 = arith.extui %0 : i1 to i32
    %c0_i32_0 = arith.constant 0 : i32
    %2 = arith.cmpi ne, %1, %c0_i32_0 : i32
    scf.if %2 {
      %cst_24 = arith.constant 0.000000e+00 : f32
      %32 = vector.broadcast %cst_24 : f32 to vector<8x128xf32>
      %c0_25 = arith.constant 0 : index
      %c0_26 = arith.constant 0 : index
      %33 = vector.load %arg11[%c0_25, %c0_26] : memref<8x128xf32, #tpu.memory_space<vmem>>, vector<8x128xf32>
      tpu.vector_store %arg11[%c0_25, %c0_26], %32 {strides = array<i32>} : memref<8x128xf32, #tpu.memory_space<vmem>>, vector<8x128xf32>,
    } else {
    }
    %c0 = arith.constant 0 : index
    %c0_1 = arith.constant 0 : index
    %3 = vector.load %arg1[%c0, %c0_1] : memref<8x128xf32, #tpu.memory_space<vmem>>, vector<8x128xf32>
    %4 = arith.truncf %3 : vector<8x128xf32> to vector<8x128xbf16>
    %c0_2 = arith.constant 0 : index
    %c0_3 = arith.constant 0 : index
    %5 = vector.load %arg2[%c0_2, %c0_3] : memref<128x1024xbf16, #tpu.memory_space<vmem>>, vector<128x1024xbf16>
    %cst = arith.constant dense<0.000000e+00> : vector<8x1024xf32>
    %6 = tpu.matmul %4, %5, %cst {dimension_numbers = #tpu.dot_dimension_numbers<[1], [0], [0], [1], [0, 0, 1, 1], [], []>} : vector<8x128xbf16>, vector<128x1024xbf16>, vector<8x1024xf32> -> vector<8x1024xf32>
    %c0_4 = arith.constant 0 : index
    %c0_5 = arith.constant 0 : index
    %7 = vector.load %arg3[%c0_4, %c0_5] : memref<1x1024xf32, #tpu.memory_space<vmem>>, vector<1x1024xf32>
    %8 = vector.broadcast %7 : vector<1x1024xf32> to vector<8x1024xf32>
    %9 = arith.addf %6, %8 : vector<8x1024xf32>
    %cst_6 = arith.constant 0.000000e+00 : f32
    %10 = vector.broadcast %cst_6 : f32 to vector<8x1024xf32>
    %11 = arith.maximumf %9, %10 : vector<8x1024xf32>
    %12 = arith.truncf %11 : vector<8x1024xf32> to vector<8x1024xbf16>
    %c0_7 = arith.constant 0 : index
    %c0_8 = arith.constant 0 : index
    %c0_9 = arith.constant 0 : index
    %13 = vector.load %arg4[%c0_7, %c0_8, %c0_9] : memref<1x1024x1280xbf16, #tpu.memory_space<vmem>>, vector<1x1024x1280xbf16>
    %14 = vector.shape_cast %13 : vector<1x1024x1280xbf16> to vector<1024x1280xbf16>
    %cst_10 = arith.constant dense<0.000000e+00> : vector<8x1280xf32>
    %15 = tpu.matmul %12, %14, %cst_10 {dimension_numbers = #tpu.dot_dimension_numbers<[1], [0], [0], [1], [0, 0, 1, 1], [], []>} : vector<8x1024xbf16>, vector<1024x1280xbf16>, vector<8x1280xf32> -> vector<8x1280xf32>
    %c0_11 = arith.constant 0 : index
    %c0_12 = arith.constant 0 : index
    %c0_13 = arith.constant 0 : index
    %16 = vector.load %arg5[%c0_11, %c0_12, %c0_13] : memref<1x1x1280xf32, #tpu.memory_space<vmem>>, vector<1x1x1280xf32>
    %17 = vector.shape_cast %16 : vector<1x1x1280xf32> to vector<1x1280xf32>
    %18 = vector.broadcast %17 : vector<1x1280xf32> to vector<8x1280xf32>
    %19 = arith.addf %15, %18 : vector<8x1280xf32>
    %cst_14 = arith.constant 0.000000e+00 : f32
    %20 = vector.broadcast %cst_14 : f32 to vector<8x1280xf32>
    %21 = arith.maximumf %19, %20 : vector<8x1280xf32>
    %c0_15 = arith.constant 0 : index
    %c0_16 = arith.constant 0 : index
    %22 = vector.load %arg11[%c0_15, %c0_16] : memref<8x128xf32, #tpu.memory_space<vmem>>, vector<8x128xf32>
    %23 = arith.truncf %21 : vector<8x1280xf32> to vector<8x1280xbf16>
    %c0_17 = arith.constant 0 : index
    %c0_18 = arith.constant 0 : index
    %c0_19 = arith.constant 0 : index
    %24 = vector.load %arg6[%c0_17, %c0_18, %c0_19] : memref<1x1280x128xbf16, #tpu.memory_space<vmem>>, vector<1x1280x128xbf16>
    %25 = vector.shape_cast %24 : vector<1x1280x128xbf16> to vector<1280x128xbf16>
    %cst_20 = arith.constant dense<0.000000e+00> : vector<8x128xf32>
    %26 = tpu.matmul %23, %25, %cst_20 {dimension_numbers = #tpu.dot_dimension_numbers<[1], [0], [0], [1], [0, 0, 1, 1], [], []>} : vector<8x1280xbf16>, vector<1280x128xbf16>, vector<8x128xf32> -> vector<8x128xf32>
    %27 = arith.addf %22, %26 : vector<8x128xf32>
    %c0_21 = arith.constant 0 : index
    %c0_22 = arith.constant 0 : index
    %28 = vector.load %arg11[%c0_21, %c0_22] : memref<8x128xf32, #tpu.memory_space<vmem>>, vector<8x128xf32>
    tpu.vector_store %arg11[%c0_21, %c0_22], %27 {strides = array<i32>} : memref<8x128xf32, #tpu.memory_space<vmem>>, vector<8x128xf32>,
    %c3_i32 = arith.constant 3 : i32
    %29 = arith.cmpi eq, %arg0, %c3_i32 : i32
    %30 = arith.extui %29 : i1 to i32
    %c0_i32_23 = arith.constant 0 : i32
    %31 = arith.cmpi ne, %30, %c0_i32_23 : i32
    scf.if %31 {
      %c0_24 = arith.constant 0 : index
      %c0_25 = arith.constant 0 : index
      %32 = vector.load %arg11[%c0_24, %c0_25] : memref<8x128xf32, #tpu.memory_space<vmem>>, vector<8x128xf32>
      %c0_26 = arith.constant 0 : index
      %c0_27 = arith.constant 0 : index
      %33 = vector.load %arg7[%c0_26, %c0_27] : memref<1x128xf32, #tpu.memory_space<vmem>>, vector<1x128xf32>
      %34 = vector.broadcast %33 : vector<1x128xf32> to vector<8x128xf32>
      %35 = arith.addf %32, %34 : vector<8x128xf32>
      %cst_28 = arith.constant 0.000000e+00 : f32
      %36 = vector.broadcast %cst_28 : f32 to vector<8x128xf32>
      %37 = arith.maximumf %35, %36 : vector<8x128xf32>
      %38 = arith.truncf %37 : vector<8x128xf32> to vector<8x128xbf16>
      %c0_29 = arith.constant 0 : index
      %c0_30 = arith.constant 0 : index
      %39 = vector.load %arg8[%c0_29, %c0_30] : memref<128x128xbf16, #tpu.memory_space<vmem>>, vector<128x128xbf16>
      %cst_31 = arith.constant dense<0.000000e+00> : vector<8x128xf32>
      %40 = tpu.matmul %38, %39, %cst_31 {dimension_numbers = #tpu.dot_dimension_numbers<[1], [0], [0], [1], [0, 0, 1, 1], [], []>} : vector<8x128xbf16>, vector<128x128xbf16>, vector<8x128xf32> -> vector<8x128xf32>
      %c0_32 = arith.constant 0 : index
      %c0_33 = arith.constant 0 : index
      %41 = vector.load %arg9[%c0_32, %c0_33] : memref<1x128xf32, #tpu.memory_space<vmem>>, vector<1x128xf32>
      %42 = vector.broadcast %41 : vector<1x128xf32> to vector<8x128xf32>
      %43 = arith.addf %40, %42 : vector<8x128xf32>
      %c0_34 = arith.constant 0 : index
      %c0_35 = arith.constant 0 : index
      %44 = vector.load %arg10[%c0_34, %c0_35] : memref<8x128xf32, #tpu.memory_space<vmem>>, vector<8x128xf32>
      tpu.vector_store %arg10[%c0_34, %c0_35], %43 {strides = array<i32>} : memref<8x128xf32, #tpu.memory_space<vmem>>, vector<8x128xf32>,
    } else {
    }
    return
  }
  func.func @transform_0(%arg0: i32) -> (i32, i32) {
    %c0_i32 = arith.constant 0 : i32
    %c0_i32_0 = arith.constant 0 : i32
    %c0_i32_1 = arith.constant 0 : i32
    return %c0_i32, %c0_i32_0 : i32, i32
  }
  func.func @transform_1(%arg0: i32) -> (i32, i32) {
    %c0_i32 = arith.constant 0 : i32
    %c0_i32_0 = arith.constant 0 : i32
    %c0_i32_1 = arith.constant 0 : i32
    return %c0_i32, %c0_i32_0 : i32, i32
  }
  func.func @transform_2(%arg0: i32) -> (i32, i32) {
    %c0_i32 = arith.constant 0 : i32
    %c0_i32_0 = arith.constant 0 : i32
    %c0_i32_1 = arith.constant 0 : i32
    return %c0_i32, %c0_i32_0 : i32, i32
  }
  func.func @transform_3(%arg0: i32) -> (i32, i32, i32) {
    %c0_i32 = arith.constant 0 : i32
    %c0_i32_0 = arith.constant 0 : i32
    %c0_i32_1 = arith.constant 0 : i32
    return %arg0, %c0_i32, %c0_i32_0 : i32, i32, i32
  }
  func.func @transform_4(%arg0: i32) -> (i32, i32, i32) {
    %c0_i32 = arith.constant 0 : i32
    %c0_i32_0 = arith.constant 0 : i32
    %c0_i32_1 = arith.constant 0 : i32
    return %arg0, %c0_i32, %c0_i32_0 : i32, i32, i32
  }
  func.func @transform_5(%arg0: i32) -> (i32, i32, i32) {
    %c0_i32 = arith.constant 0 : i32
    %c0_i32_0 = arith.constant 0 : i32
    %c0_i32_1 = arith.constant 0 : i32
    return %arg0, %c0_i32, %c0_i32_0 : i32, i32, i32
  }
  func.func @transform_6(%arg0: i32) -> (i32, i32) {
    %c0_i32 = arith.constant 0 : i32
    %c0_i32_0 = arith.constant 0 : i32
    %c0_i32_1 = arith.constant 0 : i32
    return %c0_i32, %c0_i32_0 : i32, i32
  }
  func.func @transform_7(%arg0: i32) -> (i32, i32) {
    %c0_i32 = arith.constant 0 : i32
    %c0_i32_0 = arith.constant 0 : i32
    %c0_i32_1 = arith.constant 0 : i32
    return %c0_i32, %c0_i32_0 : i32, i32
  }
  func.func @transform_8(%arg0: i32) -> (i32, i32) {
    %c0_i32 = arith.constant 0 : i32
    %c0_i32_0 = arith.constant 0 : i32
    %c0_i32_1 = arith.constant 0 : i32
    return %c0_i32, %c0_i32_0 : i32, i32
  }
  func.func @transform_9(%arg0: i32) -> (i32, i32) {
    %c0_i32 = arith.constant 0 : i32
    %c0_i32_0 = arith.constant 0 : i32
    %c0_i32_1 = arith.constant 0 : i32
    return %c0_i32, %c0_i32_0 : i32, i32
  }
}

</mosaic_0001>

<bundles_post_ra>
// kernel: net_rand_forward.1
= control target key start
LH: loop header
LB: loop body
LE: loop exit
PB: predicated region body
PF: predicated region fallthrough
CT: control target
= control target key end

     0   :  { %s10535_s0 = inlined_call_operand.vmem [shape: f32[8,128], index: 0, kind: input, shape index: {}]   ;;  %s10536_s1 = inlined_call_operand.hbm [shape: bf16[128,1024], index: 1, kind: input, shape index: {}]   ;;  %s10537_s2 = inlined_call_operand.hbm [shape: f32[1,1024], index: 2, kind: input, shape index: {}]   ;;  %s10538_s3 = inlined_call_operand.hbm [shape: bf16[4,1024,1280], index: 3, kind: input, shape index: {}]   ;;  %s10539_s4 = inlined_call_operand.hbm [shape: f32[4,1,1280], index: 4, kind: input, shape index: {}]   ;;  %s10540_s5 = inlined_call_operand.hbm [shape: bf16[4,1280,128], index: 5, kind: input, shape index: {}]   ;;  %s10541_s6 = inlined_call_operand.hbm [shape: f32[1,128], index: 6, kind: input, shape index: {}]   ;;  %s10542_s7 = inlined_call_operand.hbm [shape: bf16[128,128], index: 7, kind: input, shape index: {}]   ;;  %s10543_s8 = inlined_call_operand.hbm [shape: f32[1,128], index: 8, kind: input, shape index: {}]   ;;  %s10544_s9 = inlined_call_operand.vmem [shape: f32[8,128], index: 9, kind: output, shape index: {}]  }
   0x1   :  { %10562 = sst [smem:[#allocation22_spill]] %s10535_s0 }
   0x2   :  { %10563 = sst [smem:[#allocation23_spill]] %s10536_s1 }
   0x3   :  { %10564 = sst [smem:[#allocation24_spill]] %s10537_s2 }
   0x4   :  { %10565 = sst [smem:[#allocation25_spill]] %s10538_s3 }
   0x5   :  { %10566 = sst [smem:[#allocation26_spill]] %s10544_s9 }
   0x6   :  { %14 = vsyncpa [#allocation4], 0 }
   0x7   :  { %15 = vsyncpa [#allocation6], 0 }
   0x8   :  { %16 = vsyncpa [#allocation12], 0  ;;  %s9374_s30 = smov 0   ;;  %s9376_s10 = smov 0  }
   0x9   :  { %s9378_s11 = smov 0   ;;  %s9380_s12 = smov 0  }
   0xa LB: > { %10567 = sst [smem:[#allocation19_spill]] %s9300_s11  ;;  %s9393_s13 = sadd.s32 4294967295, %s9304_s12   ;;  %s9304_s12 = sphi %s9380_s12, %s10599_s12   ;;  %s9300_s11 = sphi %s9378_s11, %s10601_s11   ;;  %s9296_s10 = sphi %s9376_s10, %s10603_s10   ;;  %s9292_s30 = sphi %s9374_s30, %s10602_s30  }
   0xb   : > { %p105_p0 = scmp.ne.s32.totalorder %s9296_s10, %s9292_s30  ;;  %p10547_p1 = scmp.eq.s32.totalorder %s9393_s13, 0 }
   0xc   : > { %p6919_p2 = scmp.ge.s32.totalorder %s9304_s12, 1  ;;  %p252_p3 = scmp.lt.s32.totalorder %s9304_s12, 5 }
   0xd   : > { %p9402_p5 = por %p10547_p1, %p105_p0  ;;  %s9306_s16 = smov [#allocation3]  }
   0xe   : > { %p9406_p6 = pnand %p6919_p2, %p252_p3  ;;  %s267_s17 = sshll.u32 %s9306_s16, 4  ;;  %s268_s17 = int_to_ptr.vmem [resolvable:$true] %s267_s17 }
   0xf   : > { %s10568_s14 = scalar_select %p9402_p5, 1, 0 }
  0x10   : > { %s10569_s15 = scalar_select %p9406_p6, 1, 0 }
  0x11   : > { %p7907_p7 = pneg %p9406_p6  ;;  %s9419_s19 = sadd.s32 1, %s9304_s12  }
  0x12   : > { %10571 = sst [smem:[#allocation20_spill]] %s9419_s19  ;;  %s92_s20 = sadd.s32 1, %s9300_s11 }
  0x13   : > { %p9414_p8 = pnand %p7907_p7, %p10547_p1  ;;  %s89_s21 = ssub.s32 %s9304_s12, %s9419_s19 }
  0x14   : > { %s9051_s23 = scalar_lea.vmem %s268_s17, 8192  ;;  %p9059_p13 = scmp.lt.s32.totalorder %s268_s17, %s268_s17 }
  0x15   : > { %s10570_s18 = scalar_select %p9414_p8, 1, 0 }
  0x16   : > { %p9426_p9 = pneg %p9414_p8  ;;  %p9052_p10 = scmp.ne.s32.totalorder %s268_s17, %s9051_s23 }
  0x17   : > { %p9060_p0 = scmp.lt.s32.totalorder %s9051_s23, %s9051_s23 }
  0x18   : > { %s10572_s22 = scalar_select %p9426_p9, 1, 0 }
  0x19   : > { %p9054_p11 = pnand %p9052_p10, %p9426_p9  ;;  %p9061_p2 = por %p9060_p0, %p9059_p13 }
  0x1b   : > { %p9055_p12 = pneg %p9054_p11 }
  0x1d   : > { %p9062_p3 = pnand %p9061_p2, %p9055_p12 }
  0x1f   : > { %9065 = shalt.err (!%p9062_p3)
}
  0x20   : > { %s9307_s24 = smov 512   ;;  %s9308_s25 = smov 32  }
  0x21   : > { %s10573_s1 = sld [smem:[#allocation23_spill]]  ;;  %p90_p7 = scmp.eq.s32.totalorder %s89_s21, 0 }
  0x22   : > { %p99_p10 = scmp.ne.s32.totalorder %s9300_s11, %s9296_s10  ;;  %p100_p11 = scmp.eq.s32.totalorder %s9304_s12, 0 }
  0x23   : > { %p7938_p12 = scmp.lt.s32.totalorder %s9304_s12, 4  ;;  %s327_s29 = sand.u32 1, %s9304_s12  }
  0x24   : > { %s9442_s28 = scalar_select %p90_p7, %s9300_s11, %s92_s20  }
  0x25   : > { %p101_p13 = por %p100_p11, %p99_p10  ;;  %s9446_s30 = sand.u32 1, %s9300_s11  }
  0x26   : > { %10574 = sst [smem:[#allocation21_spill]] %s9442_s28  ;;  %s7872_s16 = smul.u32 5120, %s9446_s30 }
  0x27   : > { %7910 = dma.hbm_to_vmem [thread:$0]  (!%p9414_p8), %s10573_s1, 8192, %s268_s17, [#allocation4], %s9307_s24, %s9307_s24, %s9308_s25  }
  0x28   : > { %p9449_p0 = pnand %p7938_p12, %p101_p13  ;;  %s7873_s19 = smul.u32 81920, %s9304_s12 }
  0x29   : > { %s10576_s3 = sld [smem:[#allocation25_spill]]  ;;  %s331_s20 = scalar_lea.vmem [#allocation7], %s7872_s16 }
  0x2a   : > { %s10575_s23 = scalar_select %p9449_p0, 1, 0 }
  0x2b   : > { %s338_s24 = sshll.u32 %s331_s20, 4  ;;  %s9461_s25 = scalar_lea.sflag [#allocation4], %s327_s29  ;;  %s9459_s24 = int_to_ptr.vmem [resolvable:$true] %s338_s24 }
  0x2c   : > { %p9467_p3 = pneg %p9449_p0 }
  0x2e   : > { %s10577_s1 = scalar_select %p9467_p3, 1, 0 }
  0x2f   : > { %s9457_s21 = scalar_lea.hbm %s10576_s3, %s7873_s19  ;;  %s9071_s16 = scalar_lea.hbm %s10576_s3, 327680 }
  0x30   : > { %s9066_s27 = scalar_lea.hbm %s9457_s21, 81920  ;;  %p9072_p11 = scmp.lt.s32.totalorder %s9457_s21, %s10576_s3 }
  0x31   : > { %p9067_p2 = scmp.ne.s32.totalorder %s9457_s21, %s9066_s27  ;;  %p9073_p12 = scmp.lt.s32.totalorder %s9071_s16, %s9066_s27 }
  0x33   : > { %p9069_p7 = pnand %p9467_p3, %p9067_p2  ;;  %p9074_p13 = por %p9073_p12, %p9072_p11 }
  0x35   : > { %p9070_p10 = pneg %p9069_p7 }
  0x37   : > { %p9075_p4 = pnand %p9074_p13, %p9070_p10 }
  0x39   : > { %9078 = shalt.err (!%p9075_p4)
}
  0x3a   : > { %s9079_s29 = scalar_lea.vmem %s9459_s24, 81920  ;;  %s9309_s28 = smov [#allocation7]  }
  0x3b   : > { %p9080_p1 = scmp.ne.s32.totalorder %s9459_s24, %s9079_s29  ;;  %s9084_s19 = sshll.u32 %s9309_s28, 4  ;;  %s9085_s19 = int_to_ptr.vmem [resolvable:$false] %s9084_s19 }
  0x3c   : > { %s9086_s26 = scalar_lea.vmem %s9085_s19, 163840  ;;  %p9087_p5 = scmp.lt.s32.totalorder %s9459_s24, %s9085_s19 }
  0x3d   : > { %p9082_p2 = pnand %p9080_p1, %p9467_p3  ;;  %p9088_p6 = scmp.lt.s32.totalorder %s9086_s26, %s9079_s29 }
  0x3f   : > { %p9083_p7 = pneg %p9082_p2  ;;  %p9089_p8 = por %p9088_p6, %p9087_p5 }
  0x41   : > { %p9090_p9 = pnand %p9089_p8, %p9083_p7 }
  0x43   : > { %9093 = shalt.err (!%p9090_p9)
}
  0x44   : > { %s9310_s27 = smov 640   ;;  %s9311_s16 = smov 40  }
  0x45   : > { %7926 = dma.hbm_to_vmem [thread:$0]  (!%p9449_p0), %s9457_s21, 81920, %s9459_s24, %s9461_s25, %s9310_s27, %s9310_s27, %s9311_s16  }
  0x46   : > { %s9312_s17 = smov [#allocation5]   ;;  %s9313_s3 = smov [#allocation11]  }
  0x47   : > { %s281_s20 = sshll.u32 %s9312_s17, 4  ;;  %s302_s28 = sshll.u32 %s9313_s3, 4  ;;  %s282_s20 = int_to_ptr.vmem [resolvable:$true] %s281_s20  ;;  %s303_s28 = int_to_ptr.vmem [resolvable:$true] %s302_s28 }
  0x48   : > { %s9105_s19 = scalar_lea.vmem %s282_s20, 128  ;;  %p10578_p4 = scmp.ne.s32.totalorder %s10572_s22, 0 }
  0x49   : > { %p9106_p1 = scmp.ne.s32.totalorder %s282_s20, %s9105_s19  ;;  %p9113_p8 = scmp.lt.s32.totalorder %s282_s20, %s282_s20 }
  0x4a   : > { %p9114_p9 = scmp.lt.s32.totalorder %s9105_s19, %s9105_s19 }
  0x4b   : > { %p9108_p5 = pnand %p9106_p1, %p10578_p4 }
  0x4c   : > { %p9115_p10 = por %p9114_p9, %p9113_p8 }
  0x4d   : > { %p9109_p6 = pneg %p9108_p5 }
  0x4f   : > { %p9116_p11 = pnand %p9115_p10, %p9109_p6 }
  0x51   : > { %9119 = shalt.err (!%p9116_p11)
}
  0x52   : > { %p10579_p12 = scmp.ne.s32.totalorder %s10570_s18, 0  ;;  %s10580_s2 = sld [smem:[#allocation24_spill]] }
  0x53   : > { %s9131_s3 = scalar_lea.vmem %s303_s28, 1024  ;;  %p9139_p0 = scmp.lt.s32.totalorder %s303_s28, %s303_s28 }
  0x54   : > { %p9132_p13 = scmp.ne.s32.totalorder %s303_s28, %s9131_s3  ;;  %p9140_p1 = scmp.lt.s32.totalorder %s9131_s3, %s9131_s3 }
  0x56   : > { %p9134_p2 = pnand %p9132_p13, %p10578_p4  ;;  %p9141_p5 = por %p9140_p1, %p9139_p0 }
  0x58   : > { %7913 = dma.hbm_to_vmem [thread:$0]  (!%p10579_p12), %s10580_s2, 128, %s282_s20, [#allocation6]  }
  0x59   : > { %p9135_p7 = pneg %p9134_p2 }
  0x5b   : > { %p9142_p3 = pnand %p9141_p5, %p9135_p7 }
  0x5d   : > { %9145 = shalt.err (!%p9142_p3)
}
  0x5e   : > { %s10559_s24 = smov 64   ;;  %s9315_s26 = smov 4  }
  0x5f   : > { %7919 = dma.hbm_to_vmem [thread:$0]  (!%p10579_p12), %s10542_s7, 1024, %s303_s28, [#allocation12], %s10559_s24, %s10559_s24, %s9315_s26  }
  0x60   : > { %s7874_s17 = smul.u32 10, %s9446_s30  ;;  %s9316_s19 = smov [#allocation10]  }
  0x61   : > { %s7875_s20 = smul.u32 160, %s9304_s12  ;;  %s292_s29 = sshll.u32 %s9316_s19, 4  ;;  %s9509_s29 = int_to_ptr.vmem [resolvable:$true] %s292_s29 }
  0x62   : > { %s352_s11 = scalar_lea.vmem [#allocation8], %s7874_s17  ;;  %p10581_p3 = scmp.ne.s32.totalorder %s10577_s1, 0 }
  0x63   : > { %s358_s2 = scalar_lea.hbm %s10539_s4, %s7875_s20  ;;  %s360_s9 = sshll.u32 %s352_s11, 4  ;;  %s361_s9 = int_to_ptr.vmem [resolvable:$true] %s360_s9 }
  0x64   : > { %s9146_s0 = scalar_lea.hbm %s358_s2, 160  ;;  %s9151_s16 = scalar_lea.hbm %s10539_s4, 640 }
  0x65   : > { %p9147_p0 = scmp.ne.s32.totalorder %s358_s2, %s9146_s0  ;;  %p9152_p9 = scmp.lt.s32.totalorder %s358_s2, %s10539_s4 }
  0x66   : > { %p9153_p10 = scmp.lt.s32.totalorder %s9151_s16, %s9146_s0 }
  0x67   : > { %p9149_p6 = pnand %p9147_p0, %p10581_p3 }
  0x68   : > { %p9154_p11 = por %p9153_p10, %p9152_p9 }
  0x69   : > { %p9150_p8 = pneg %p9149_p6 }
  0x6b   : > { %p9155_p13 = pnand %p9154_p11, %p9150_p8 }
  0x6d   : > { %9158 = shalt.err (!%p9155_p13)
}
  0x6e   : > { %s9159_s17 = scalar_lea.vmem %s361_s9, 160  ;;  %s9317_s11 = smov [#allocation8]  }
  0x6f   : > { %p9160_p2 = scmp.ne.s32.totalorder %s361_s9, %s9159_s17  ;;  %s9164_s20 = sshll.u32 %s9317_s11, 4  ;;  %s9165_s20 = int_to_ptr.vmem [resolvable:$false] %s9164_s20 }
  0x70   : > { %s9166_s21 = scalar_lea.vmem %s9165_s20, 320  ;;  %p9167_p5 = scmp.lt.s32.totalorder %s361_s9, %s9165_s20 }
  0x71   : > { %p9162_p7 = pnand %p9160_p2, %p10581_p3  ;;  %p9168_p0 = scmp.lt.s32.totalorder %s9166_s21, %s9159_s17 }
  0x73   : > { %p9163_p1 = pneg %p9162_p7  ;;  %p9169_p6 = por %p9168_p0, %p9167_p5 }
  0x75   : > { %p9170_p12 = pnand %p9169_p6, %p9163_p1 }
  0x77   : > { %9173 = shalt.err (!%p9170_p12)
}
  0x78   : > { %p10582_p4 = scmp.ne.s32.totalorder %s10575_s23, 0  ;;  %s9185_s0 = scalar_lea.vmem %s9509_s29, 16 }
  0x79   : > { %p9186_p8 = scmp.ne.s32.totalorder %s9509_s29, %s9185_s0  ;;  %p10583_p9 = scmp.ne.s32.totalorder %s10572_s22, 0 }
  0x7a   : > { %7929 = dma.hbm_to_vmem [thread:$0]  (!%p10582_p4), %s358_s2, 160, %s361_s9, %s9461_s25  }
  0x7b   : > { %p9188_p10 = pnand %p9186_p8, %p10583_p9  ;;  %s9192_s24 = scalar_lea.vmem %s9509_s29, 32 }
  0x7c   : > { %p9193_p13 = scmp.lt.s32.totalorder %s9509_s29, %s9509_s29  ;;  %p9194_p2 = scmp.lt.s32.totalorder %s9192_s24, %s9185_s0 }
  0x7d   : > { %p9189_p11 = pneg %p9188_p10 }
  0x7e   : > { %p9195_p7 = por %p9194_p2, %p9193_p13 }
  0x80   : > { %p9196_p12 = pnand %p9195_p7, %p9189_p11 }
  0x82   : > { %9199 = shalt.err (!%p9196_p12)
}
  0x83   : > { %p10584_p1 = scmp.ne.s32.totalorder %s10570_s18, 0  ;;  %s9318_s2 = smov [#allocation13]  }
  0x84   : > { %s316_s9 = sshll.u32 %s9318_s2, 4  ;;  %s7876_s28 = smul.u32 640, %s9446_s30  ;;  %s317_s9 = int_to_ptr.vmem [resolvable:$true] %s316_s9 }
  0x85   : > { %7916 = dma.hbm_to_vmem [thread:$0]  (!%p10584_p1), %s10541_s6, 16, %s9509_s29, [#allocation6]  }
  0x86   : > { %s7877_s16 = smul.u32 10240, %s9304_s12  ;;  %s9211_s19 = scalar_lea.vmem %s317_s9, 16 }
  0x87   : > { %p9212_p5 = scmp.ne.s32.totalorder %s317_s9, %s9211_s19  ;;  %s9218_s17 = scalar_lea.vmem %s317_s9, 32 }
  0x88   : > { %p9219_p8 = scmp.lt.s32.totalorder %s317_s9, %s317_s9  ;;  %p9220_p10 = scmp.lt.s32.totalorder %s9218_s17, %s9211_s19 }
  0x89   : > { %p9214_p0 = pnand %p9212_p5, %p10583_p9 }
  0x8a   : > { %p9221_p11 = por %p9220_p10, %p9219_p8 }
  0x8b   : > { %p9215_p6 = pneg %p9214_p0 }
  0x8d   : > { %p9222_p13 = pnand %p9221_p11, %p9215_p6 }
  0x8f   : > { %9225 = shalt.err (!%p9222_p13)
}
  0x90   : > { %7922 = dma.hbm_to_vmem [thread:$0]  (!%p10584_p1), %s10543_s8, 16, %s317_s9, [#allocation12]  }
  0x91   : > { %s9552_s20 = scalar_lea.hbm %s10540_s5, %s7877_s16  ;;  %s371_s22 = scalar_lea.vmem [#allocation9], %s7876_s28 }
  0x92   : > { %s378_s21 = sshll.u32 %s371_s22, 4  ;;  %s9226_s0 = scalar_lea.hbm %s9552_s20, 10240  ;;  %s379_s21 = int_to_ptr.vmem [resolvable:$true] %s378_s21 }
  0x93   : > { %p9227_p9 = scmp.ne.s32.totalorder %s9552_s20, %s9226_s0  ;;  %s9231_s3 = scalar_lea.hbm %s10540_s5, 40960 }
  0x94   : > { %p9232_p12 = scmp.lt.s32.totalorder %s9552_s20, %s10540_s5  ;;  %p9233_p1 = scmp.lt.s32.totalorder %s9231_s3, %s9226_s0 }
  0x95   : > { %p9229_p2 = pnand %p9227_p9, %p10581_p3 }
  0x96   : > { %p9234_p5 = por %p9233_p1, %p9232_p12 }
  0x97   : > { %p9230_p7 = pneg %p9229_p2 }
  0x99   : > { %p9235_p0 = pnand %p9234_p5, %p9230_p7 }
  0x9b   : > { %9238 = shalt.err (!%p9235_p0)
}
  0x9c   : > { %s9239_s9 = scalar_lea.vmem %s379_s21, 10240  ;;  %s9319_s28 = smov [#allocation9]  }
  0x9d   : > { %p9240_p6 = scmp.ne.s32.totalorder %s379_s21, %s9239_s9  ;;  %s9244_s16 = sshll.u32 %s9319_s28, 4  ;;  %s9245_s16 = int_to_ptr.vmem [resolvable:$false] %s9244_s16 }
  0x9e   : > { %s9246_s19 = scalar_lea.vmem %s9245_s16, 20480  ;;  %p9247_p11 = scmp.lt.s32.totalorder %s379_s21, %s9245_s16 }
  0x9f   : > { %p9242_p8 = pnand %p9240_p6, %p10581_p3  ;;  %p9248_p13 = scmp.lt.s32.totalorder %s9246_s19, %s9239_s9 }
  0xa1   : > { %p9243_p10 = pneg %p9242_p8  ;;  %p9249_p9 = por %p9248_p13, %p9247_p11 }
  0xa3   : > { %p9250_p2 = pnand %p9249_p9, %p9243_p10 }
  0xa5   : > { %9253 = shalt.err (!%p9250_p2)
}
  0xa6   : > { %s10585_s17 = smov 64   ;;  %p10586_p3 = scmp.ne.s32.totalorder %s10569_s15, 0 }
  0xa7   : > { %7932 = dma.hbm_to_vmem [thread:$0]  (!%p10582_p4), %s9552_s20, 10240, %s379_s21, %s9461_s25, %s10585_s17, %s10585_s17, %s9315_s26  }
  0xa8   : > { %390 = sbr.rel (%p10586_p3) target bundleno = 1651 (0x673), region = 56  ;;  %p10587_p7 = scmp.eq.s32.totalorder (!%p10586_p3), %s9393_s13, 0 }
  0xad   : > { %9271 = dma.done.wait (%p10587_p7), [#allocation4], 8192   ;;  %p10588_p12 = pmov %p10587_p7 }
  0xae   : > { %p10589_p1 = pmov %p10587_p7 }
  0xaf   : > { %9273 = vsyncadd (%p10588_p12), [#allocation4], 4294959104 }
  0xb0   : > { %9275 = dma.done.wait (%p10589_p1), [#allocation6], 128   ;;  %p10590_p5 = pmov %p10589_p1 }
  0xb1   : > { %s400_s1 = sand.u32 1, %s9393_s13   ;;  %s402_s23 = sand.u32 1, %s9296_s10  }
  0xb2   : > { %9277 = vsyncadd (%p10590_p5), [#allocation6], 4294967168  ;;  %s7878_s25 = smul.u32 5120, %s402_s23  ;;  %s401_s15 = scalar_lea.sflag [#allocation4], %s400_s1 }
  0xb3   : > { %p10591_p4 = scmp.ne.s32.totalorder %s10568_s14, 0 }
  0xb4   : > { %s9586_s26 = scalar_lea.vmem [#allocation7], %s7878_s25 }
  0xb5   : > { %9279 = dma.done.wait (%p10591_p4), %s401_s15, 92320  }
  0xb6   : > { %9281 = vsyncadd (%p10591_p4), %s401_s15, 4294874976  ;;  %s7879_s11 = smul.u32 10, %s402_s23  ;;  %p10592_p0 = pmov %p10589_p1 }
  0xb7   : > { %s7880_s29 = smul.u32 640, %s402_s23 }
  0xb8   : > { %s9592_s30 = scalar_lea.vmem [#allocation8], %s7879_s11 }
  0xb9   : > { %s9594_s12 = scalar_lea.vmem [#allocation9], %s7880_s29 }
  0xba   : > { %9283 = dma.done.wait (%p10592_p0), [#allocation6], 16   ;;  %p10593_p6 = pmov %p10592_p0 }
  0xbb   : > { %p10594_p8 = pmov %p10592_p0 }
  0xbc   : > { %9285 = vsyncadd (%p10593_p6), [#allocation6], 4294967280 }
  0xbd   : > { %9287 = dma.done.wait (%p10594_p8), [#allocation12], 1040   ;;  %p10595_p10 = pmov %p10592_p0 }
  0xbe   : > { %p10596_p11 = scmp.ne.s32.totalorder %s9393_s13, 0 }
  0xbf   : > { %9289 = vsyncadd (%p10595_p10), [#allocation12], 4294966256 }
  0xc0   : > { %478 = sbr.rel (%p10596_p11) target bundleno = 199 (0xc7), region = 92 }
  0xc5   : > { %v9320_v0 = vmov 0.0  }
  0xc6   : > { %479 = vst [vmem:[#allocation2] sm:$0xff] %v9320_v0 }
  0xc7 PF: > { %v538_v1 = vld [vmem:[#allocation3 + $0x1c0] sm:$0xff]  ;;  %v539_v3 = vld [vmem:[#allocation3 + $0x1c8] sm:$0xff]  ;;  %v9321_v9 = vmov 0   ;;  %v540_v63 = vld [vmem:[#allocation3 + $0x1d0] sm:$0xff]  ;;  %s10597_s22 = sld [smem:[#allocation22_spill]]  ;;  %p7720_p13 = scmp.ne.s32.totalorder %s9393_s13, 3 }
  0xc8   : > { %v542_v2 = vld [vmem:[#allocation3 + $0x1e0] sm:$0xff]  ;;  %v543_v5 = vld [vmem:[#allocation3 + $0x1e8] sm:$0xff]  ;;  %940 = vmatprep.mubr.bf16.mxu0 %v9321_v9  ;;  %981 = vmatprep.mubr.bf16.mxu1 %v9321_v9  ;;  %s10598_s0 = sld [smem:[#allocation26_spill]] (!%p7720_p13) }
  0xc9   : > { %v6993_v4 = vcombine.high %v538_v1, %v542_v2  ;;  %v6992_v6 = vcombine.low %v538_v1, %v542_v2  ;;  %v530_v7 = vld [vmem:[#allocation3 + $0x180] sm:$0xff]  ;;  %v6995_v10 = vcombine.high %v539_v3, %v543_v5  ;;  %v6994_v11 = vcombine.low %v539_v3, %v543_v5  ;;  %v531_v13 = vld [vmem:[#allocation3 + $0x188] sm:$0xff]  ;;  %v544_v1 = vld [vmem:[#allocation3 + $0x1f0] sm:$0xff] }
  0xca   : > { %v534_v8 = vld [vmem:[#allocation3 + $0x1a0] sm:$0xff]  ;;  %v535_v14 = vld [vmem:[#allocation3 + $0x1a8] sm:$0xff]  ;;  %v541_v2 = vld [vmem:[#allocation3 + $0x1d8] sm:$0xff] }
  0xcb   : > { %v6985_v12 = vcombine.high %v530_v7, %v534_v8  ;;  %v522_v15 = vld [vmem:[#allocation3 + $0x140] sm:$0xff]  ;;  %908 = vmatprep.subr.bf16.mxu0 %v6993_v4  ;;  %v6987_v16 = vcombine.high %v531_v13, %v535_v14  ;;  %v523_v18 = vld [vmem:[#allocation3 + $0x148] sm:$0xff]  ;;  %949 = vmatprep.subr.bf16.mxu1 %v6995_v10  ;;  %v6984_v20 = vcombine.low %v530_v7, %v534_v8  ;;  %v545_v3 = vld [vmem:[#allocation3 + $0x1f8] sm:$0xff] }
  0xcc   : > { %v526_v17 = vld [vmem:[#allocation3 + $0x160] sm:$0xff]  ;;  %v527_v19 = vld [vmem:[#allocation3 + $0x168] sm:$0xff]  ;;  %909 = vmatpush1.bf16.msra.mxu0 %v6992_v6  ;;  %950 = vmatpush1.bf16.msra.mxu1 %v6994_v11  ;;  %v6986_v21 = vcombine.low %v531_v13, %v535_v14  ;;  %v6997_v7 = vcombine.high %v540_v63, %v544_v1  ;;  %v532_v8 = vld [vmem:[#allocation3 + $0x190] sm:$0xff]  ;;  %v6999_v10 = vcombine.high %v541_v2, %v545_v3 }
  0xcd   : > { %910 = vmatprep.subr.bf16.mxu0 %v6985_v12  ;;  %v6977_v22 = vcombine.high %v522_v15, %v526_v17  ;;  %951 = vmatprep.subr.bf16.mxu1 %v6987_v16  ;;  %v6979_v23 = vcombine.high %v523_v18, %v527_v19  ;;  %v514_v24 = vld [vmem:[#allocation3 + $0x100] sm:$0xff]  ;;  %v515_v26 = vld [vmem:[#allocation3 + $0x108] sm:$0xff]  ;;  %v6976_v28 = vcombine.low %v522_v15, %v526_v17  ;;  %v480_v5 = vld [vmem:[%s10597_s22] sm:$0xff] }
  0xce   : > { %v518_v25 = vld [vmem:[#allocation3 + $0x120] sm:$0xff]  ;;  %v519_v27 = vld [vmem:[#allocation3 + $0x128] sm:$0xff]  ;;  %v6978_v29 = vcombine.low %v523_v18, %v527_v19  ;;  %v536_v11 = vld [vmem:[#allocation3 + $0x1b0] sm:$0xff]  ;;  %v9611_v13 = vpack.c.bf16 %v480_v5, %v480_v5  ;;  %v6996_v15 = vcombine.low %v540_v63, %v544_v1  ;;  %v6998_v16 = vcombine.low %v541_v2, %v545_v3 }
  0xcf   : > { %v6969_v30 = vcombine.high %v514_v24, %v518_v25  ;;  %v6971_v31 = vcombine.high %v515_v26, %v519_v27  ;;  %v506_v32 = vld [vmem:[#allocation3 + $0xc0] sm:$0xff]  ;;  %v507_v34 = vld [vmem:[#allocation3 + $0xc8] sm:$0xff]  ;;  %v6968_v36 = vcombine.low %v514_v24, %v518_v25  ;;  %v6970_v37 = vcombine.low %v515_v26, %v519_v27  ;;  %v533_v12 = vld [vmem:[#allocation3 + $0x198] sm:$0xff] }
  0xd0   : > { %911 = vmatpush1.bf16.msra.mxu0 %v6984_v20  ;;  %952 = vmatpush1.bf16.msra.mxu1 %v6986_v21  ;;  %v510_v33 = vld [vmem:[#allocation3 + $0xe0] sm:$0xff]  ;;  %v511_v35 = vld [vmem:[#allocation3 + $0xe8] sm:$0xff]  ;;  %v537_v14 = vld [vmem:[#allocation3 + $0x1b8] sm:$0xff]  ;;  %v6989_v17 = vcombine.high %v532_v8, %v536_v11 }
  0xd1   : > { %912 = vmatprep.subr.bf16.mxu0 %v6977_v22  ;;  %953 = vmatprep.subr.bf16.mxu1 %v6979_v23  ;;  %v6961_v38 = vcombine.high %v506_v32, %v510_v33  ;;  %v6963_v39 = vcombine.high %v507_v34, %v511_v35  ;;  %v498_v40 = vld [vmem:[#allocation3 + $0x80] sm:$0xff]  ;;  %v499_v42 = vld [vmem:[#allocation3 + $0x88] sm:$0xff]  ;;  %v6960_v44 = vcombine.low %v506_v32, %v510_v33  ;;  %v524_v18 = vld [vmem:[#allocation3 + $0x150] sm:$0xff] }
  0xd2   : > { %v502_v41 = vld [vmem:[#allocation3 + $0xa0] sm:$0xff]  ;;  %v503_v43 = vld [vmem:[#allocation3 + $0xa8] sm:$0xff]  ;;  %v6962_v45 = vcombine.low %v507_v34, %v511_v35  ;;  %v6991_v19 = vcombine.high %v533_v12, %v537_v14  ;;  %v528_v20 = vld [vmem:[#allocation3 + $0x170] sm:$0xff]  ;;  %v6988_v23 = vcombine.low %v532_v8, %v536_v11  ;;  %v6990_v24 = vcombine.low %v533_v12, %v537_v14 }
  0xd3   : > { %v6953_v46 = vcombine.high %v498_v40, %v502_v41  ;;  %v6955_v47 = vcombine.high %v499_v42, %v503_v43  ;;  %v490_v48 = vld [vmem:[#allocation3 + $0x40] sm:$0xff]  ;;  %v491_v50 = vld [vmem:[#allocation3 + $0x48] sm:$0xff]  ;;  %v6952_v52 = vcombine.low %v498_v40, %v502_v41  ;;  %v6954_v53 = vcombine.low %v499_v42, %v503_v43  ;;  %v525_v21 = vld [vmem:[#allocation3 + $0x158] sm:$0xff] }
  0xd4   : > { %913 = vmatpush1.bf16.msra.mxu0 %v6976_v28  ;;  %954 = vmatpush1.bf16.msra.mxu1 %v6978_v29  ;;  %v494_v49 = vld [vmem:[#allocation3 + $0x60] sm:$0xff]  ;;  %v495_v51 = vld [vmem:[#allocation3 + $0x68] sm:$0xff]  ;;  %v529_v22 = vld [vmem:[#allocation3 + $0x178] sm:$0xff]  ;;  %v6981_v25 = vcombine.high %v524_v18, %v528_v20 }
  0xd5   : > { %914 = vmatprep.subr.bf16.mxu0 %v6969_v30  ;;  %955 = vmatprep.subr.bf16.mxu1 %v6971_v31  ;;  %v6945_v54 = vcombine.high %v490_v48, %v494_v49  ;;  %v482_v55 = vld [vmem:[#allocation3] sm:$0xff]  ;;  %v6947_v56 = vcombine.high %v491_v50, %v495_v51  ;;  %v483_v58 = vld [vmem:[#allocation3 + $0x8] sm:$0xff]  ;;  %v6944_v60 = vcombine.low %v490_v48, %v494_v49  ;;  %v516_v26 = vld [vmem:[#allocation3 + $0x110] sm:$0xff] }
  0xd6   : > { %v486_v57 = vld [vmem:[#allocation3 + $0x20] sm:$0xff]  ;;  %v487_v59 = vld [vmem:[#allocation3 + $0x28] sm:$0xff]  ;;  %v6946_v61 = vcombine.low %v491_v50, %v495_v51  ;;  %v6983_v27 = vcombine.high %v525_v21, %v529_v22  ;;  %v520_v28 = vld [vmem:[#allocation3 + $0x130] sm:$0xff]  ;;  %v6980_v31 = vcombine.low %v524_v18, %v528_v20  ;;  %v6982_v32 = vcombine.low %v525_v21, %v529_v22 }
  0xd7   : > { %v6937_v62 = vcombine.high %v482_v55, %v486_v57  ;;  %v6939_v0 = vcombine.high %v483_v58, %v487_v59  ;;  %v6936_v4 = vcombine.low %v482_v55, %v486_v57  ;;  %v6938_v6 = vcombine.low %v483_v58, %v487_v59  ;;  %v517_v29 = vld [vmem:[#allocation3 + $0x118] sm:$0xff]  ;;  %v508_v34 = vld [vmem:[#allocation3 + $0xd0] sm:$0xff] }
  0xd8   : > { %915 = vmatpush1.bf16.msra.mxu0 %v6968_v36  ;;  %956 = vmatpush1.bf16.msra.mxu1 %v6970_v37  ;;  %v521_v30 = vld [vmem:[#allocation3 + $0x138] sm:$0xff]  ;;  %v6973_v33 = vcombine.high %v516_v26, %v520_v28  ;;  %v512_v36 = vld [vmem:[#allocation3 + $0xf0] sm:$0xff] }
  0xd9   : > { %916 = vmatprep.subr.bf16.mxu0 %v6961_v38  ;;  %957 = vmatprep.subr.bf16.mxu1 %v6963_v39  ;;  %v6975_v35 = vcombine.high %v517_v29, %v521_v30  ;;  %v509_v37 = vld [vmem:[#allocation3 + $0xd8] sm:$0xff]  ;;  %v6972_v39 = vcombine.low %v516_v26, %v520_v28  ;;  %v6974_v40 = vcombine.low %v517_v29, %v521_v30  ;;  %v500_v42 = vld [vmem:[#allocation3 + $0x90] sm:$0xff] }
  0xda   : > { %v513_v38 = vld [vmem:[#allocation3 + $0xf8] sm:$0xff]  ;;  %v6965_v41 = vcombine.high %v508_v34, %v512_v36  ;;  %v504_v43 = vld [vmem:[#allocation3 + $0xb0] sm:$0xff] }
  0xdb   : > { %v6957_v48 = vcombine.high %v500_v42, %v504_v43  ;;  %v492_v49 = vld [vmem:[#allocation3 + $0x50] sm:$0xff]  ;;  %v7993_v2 = vld [vmem:[%s9586_s26 + $0x234] ss:$40 sps:$4 sm:$0xff]  }
  0xdc   : > { %917 = vmatpush1.bf16.msra.mxu0 %v6960_v44  ;;  %958 = vmatpush1.bf16.msra.mxu1 %v6962_v45  ;;  %v501_v44 = vld [vmem:[#allocation3 + $0x98] sm:$0xff]  ;;  %v496_v51 = vld [vmem:[#allocation3 + $0x70] sm:$0xff] }
  0xdd   : > { %918 = vmatprep.subr.bf16.mxu0 %v6953_v46  ;;  %959 = vmatprep.subr.bf16.mxu1 %v6955_v47  ;;  %v505_v45 = vld [vmem:[#allocation3 + $0xb8] sm:$0xff]  ;;  %v6964_v46 = vcombine.low %v508_v34, %v512_v36  ;;  %v6966_v47 = vcombine.low %v509_v37, %v513_v38  ;;  %v484_v57 = vld [vmem:[#allocation3 + $0x10] sm:$0xff] }
  0xde   : > { %v6959_v50 = vcombine.high %v501_v44, %v505_v45  ;;  %v6958_v55 = vcombine.low %v501_v44, %v505_v45  ;;  %v488_v59 = vld [vmem:[#allocation3 + $0x30] sm:$0xff]  ;;  %v8005_v14 = vld [vmem:[%s9586_s26 + $0x194] ss:$40 sps:$4 sm:$0xff]  }
  0xdf   : > { %v6940_v3 = vcombine.low %v484_v57, %v488_v59  ;;  %v7999_v8 = vld [vmem:[%s9586_s26 + $0x1e4] ss:$40 sps:$4 sm:$0xff]   ;;  %v7997_v11 = vld [vmem:[%s9586_s26 + $0x1e0] ss:$40 sps:$4 sm:$0xff]   ;;  %v8017_v21 = vld [vmem:[%s9586_s26 + $0xf4] ss:$40 sps:$4 sm:$0xff]  }
  0xe0   : > { %919 = vmatpush1.bf16.msra.mxu0 %v6952_v52  ;;  %960 = vmatpush1.bf16.msra.mxu1 %v6954_v53  ;;  %v493_v52 = vld [vmem:[#allocation3 + $0x58] sm:$0xff]  ;;  %v8000_v12 = vld [vmem:[%s9586_s26 + $0x6e0] ss:$40 sps:$4 sm:$0xff]   ;;  %v8011_v18 = vld [vmem:[%s9586_s26 + $0x144] ss:$40 sps:$4 sm:$0xff]  }
  0xe1   : > { %920 = vmatprep.subr.bf16.mxu0 %v6945_v54  ;;  %961 = vmatprep.subr.bf16.mxu1 %v6947_v56  ;;  %v497_v53 = vld [vmem:[#allocation3 + $0x78] sm:$0xff]  ;;  %v6956_v54 = vcombine.low %v500_v42, %v504_v43  ;;  %v6949_v56 = vcombine.high %v492_v49, %v496_v51  ;;  %v8012_v20 = vld [vmem:[%s9586_s26 + $0x640] ss:$40 sps:$4 sm:$0xff]   ;;  %v8026_v26 = vld [vmem:[%s9586_s26 + $0x5a4] ss:$40 sps:$4 sm:$0xff]  }
  0xe2   : > { %v6951_v58 = vcombine.high %v493_v52, %v497_v53  ;;  %v6950_v63 = vcombine.low %v493_v52, %v497_v53  ;;  %v8020_v22 = vld [vmem:[%s9586_s26 + $0x5f4] ss:$40 sps:$4 sm:$0xff]   ;;  %v8024_v28 = vld [vmem:[%s9586_s26 + $0x5a0] ss:$40 sps:$4 sm:$0xff]   ;;  %v8038_v34 = vld [vmem:[%s9586_s26 + $0x504] ss:$40 sps:$4 sm:$0xff]  }
  0xe3   : > { %v8029_v29 = vld [vmem:[%s9586_s26 + $0x54] ss:$40 sps:$4 sm:$0xff]   ;;  %v8036_v36 = vld [vmem:[%s9586_s26 + $0x500] ss:$40 sps:$4 sm:$0xff]   ;;  %v8050_v42 = vld [vmem:[%s9586_s26 + $0x964] ss:$40 sps:$4 sm:$0xff]  }
  0xe4   : > { %921 = vmatpush1.bf16.msra.mxu0 %v6944_v60  ;;  %962 = vmatpush1.bf16.msra.mxu1 %v6946_v61  ;;  %v485_v60 = vld [vmem:[#allocation3 + $0x18] sm:$0xff]  ;;  %v8048_v43 = vld [vmem:[%s9586_s26 + $0x960] ss:$40 sps:$4 sm:$0xff]  }
  0xe5   : > { %922 = vmatprep.subr.bf16.mxu0 %v6937_v62  ;;  %963 = vmatprep.subr.bf16.mxu1 %v6939_v0  ;;  %v489_v61 = vld [vmem:[#allocation3 + $0x38] sm:$0xff]  ;;  %v6948_v62 = vcombine.low %v492_v49, %v496_v51  ;;  %v6941_v0 = vcombine.high %v484_v57, %v488_v59  ;;  %v8062_v49 = vld [vmem:[%s9586_s26 + $0x8c4] ss:$40 sps:$4 sm:$0xff]   ;;  %v8060_v51 = vld [vmem:[%s9586_s26 + $0x8c0] ss:$40 sps:$4 sm:$0xff]  }
  0xe6   : > { %v6943_v1 = vcombine.high %v485_v60, %v489_v61  ;;  %v6942_v5 = vcombine.low %v485_v60, %v489_v61  ;;  %v8032_v30 = vld [vmem:[%s9586_s26 + $0x554] ss:$40 sps:$4 sm:$0xff]   ;;  %v8074_v57 = vld [vmem:[%s9586_s26 + $0x824] ss:$40 sps:$4 sm:$0xff]   ;;  %v8072_v59 = vld [vmem:[%s9586_s26 + $0x820] ss:$40 sps:$4 sm:$0xff]  }
  0xe7   : > { %v8053_v44 = vld [vmem:[%s9586_s26 + $0x414] ss:$40 sps:$4 sm:$0xff]  }
  0xe8   : > { %923 = vmatpush1.bf16.msra.mxu0 %v6936_v4  ;;  %964 = vmatpush1.bf16.msra.mxu1 %v6938_v6  ;;  %v7996_v4 = vld [vmem:[%s9586_s26 + $0x734] ss:$40 sps:$4 sm:$0xff]   ;;  %v7991_v6 = vld [vmem:[%s9586_s26 + $0x230] ss:$40 sps:$4 sm:$0xff]  }
  0xe9   : > { %990 = vmatprep.subr.bf16.mxu0 %v6997_v7  ;;  %1031 = vmatprep.subr.bf16.mxu1 %v6999_v10  ;;  %v7994_v7 = vld [vmem:[%s9586_s26 + $0x730] ss:$40 sps:$4 sm:$0xff]   ;;  %v8002_v10 = vld [vmem:[%s9586_s26 + $0x6e4] ss:$40 sps:$4 sm:$0xff]   ;;  %v8056_v45 = vld [vmem:[%s9586_s26 + $0x914] ss:$40 sps:$4 sm:$0xff]  }
  0xea   : > { %v8065_v52 = vld [vmem:[%s9586_s26 + $0x374] ss:$40 sps:$4 sm:$0xff]  }
  0xeb   : > { %941 = vmatmul.mubr.bf16.vlgmr.msra.gmra.mxu0 %v9611_v13  ;;  %982 = vmatmul.mubr.bf16.vlgmr.msra.gmra.mxu1 %v9611_v13  ;;  %v8068_v53 = vld [vmem:[%s9586_s26 + $0x874] ss:$40 sps:$4 sm:$0xff]  }
  0xec   : > { %991 = vmatpush1.bf16.msra.mxu0 %v6996_v15  ;;  %1032 = vmatpush1.bf16.msra.mxu1 %v6998_v16  ;;  %v8008_v15 = vld [vmem:[%s9586_s26 + $0x694] ss:$40 sps:$4 sm:$0xff]   ;;  %v8003_v16 = vld [vmem:[%s9586_s26 + $0x190] ss:$40 sps:$4 sm:$0xff]  }
  0xed   : > { %992 = vmatprep.subr.bf16.mxu0 %v6989_v17  ;;  %1033 = vmatprep.subr.bf16.mxu1 %v6991_v19  ;;  %v8006_v17 = vld [vmem:[%s9586_s26 + $0x690] ss:$40 sps:$4 sm:$0xff]   ;;  %v8014_v19 = vld [vmem:[%s9586_s26 + $0x644] ss:$40 sps:$4 sm:$0xff]   ;;  %v8077_v60 = vld [vmem:[%s9586_s26 + $0x2d4] ss:$40 sps:$4 sm:$0xff]  }
  0xee   : > { %1022 = vmatprep.mubr.bf16.mxu0 %v9321_v9  ;;  %1063 = vmatprep.mubr.bf16.mxu1 %v9321_v9  ;;  %v6967_v9 = vcombine.high %v509_v37, %v513_v38  ;;  %v8041_v37 = vld [vmem:[%s9586_s26 + $0x4b4] ss:$40 sps:$4 sm:$0xff]  }
  0xef   : > { %v8044_v38 = vld [vmem:[%s9586_s26 + $0x9b4] ss:$40 sps:$4 sm:$0xff]  }
  0xf0   : > { %993 = vmatpush1.bf16.msra.mxu0 %v6988_v23  ;;  %1034 = vmatpush1.bf16.msra.mxu1 %v6990_v24  ;;  %v8015_v23 = vld [vmem:[%s9586_s26 + $0xf0] ss:$40 sps:$4 sm:$0xff]   ;;  %v8080_v61 = vld [vmem:[%s9586_s26 + $0x7d4] ss:$40 sps:$4 sm:$0xff]  }
  0xf1   : > { %994 = vmatprep.subr.bf16.mxu0 %v6981_v25  ;;  %1035 = vmatprep.subr.bf16.mxu1 %v6983_v27  ;;  %v8018_v24 = vld [vmem:[%s9586_s26 + $0x5f0] ss:$40 sps:$4 sm:$0xff]   ;;  %v8023_v25 = vld [vmem:[%s9586_s26 + $0xa4] ss:$40 sps:$4 sm:$0xff]   ;;  %v8021_v27 = vld [vmem:[%s9586_s26 + $0xa0] ss:$40 sps:$4 sm:$0xff]  }
  0xf4   : > { %995 = vmatpush1.bf16.msra.mxu0 %v6980_v31  ;;  %1036 = vmatpush1.bf16.msra.mxu1 %v6982_v32  ;;  %v8027_v31 = vld [vmem:[%s9586_s26 + $0x50] ss:$40 sps:$4 sm:$0xff]  }
  0xf5   : > { %996 = vmatprep.subr.bf16.mxu0 %v6973_v33  ;;  %1037 = vmatprep.subr.bf16.mxu1 %v6975_v35  ;;  %v8030_v32 = vld [vmem:[%s9586_s26 + $0x550] ss:$40 sps:$4 sm:$0xff]   ;;  %v8035_v33 = vld [vmem:[%s9586_s26 + $0x4] ss:$40 sps:$4 sm:$0xff]   ;;  %v8033_v35 = vld [vmem:[%s9586_s26] ss:$40 sps:$4 sm:$0xff]  }
  0xf8   : > { %997 = vmatpush1.bf16.msra.mxu0 %v6972_v39  ;;  %1038 = vmatpush1.bf16.msra.mxu1 %v6974_v40  ;;  %v8039_v39 = vld [vmem:[%s9586_s26 + $0x4b0] ss:$40 sps:$4 sm:$0xff]  }
  0xf9   : > { %998 = vmatprep.subr.bf16.mxu0 %v6965_v41  ;;  %1039 = vmatprep.subr.bf16.mxu1 %v6967_v9  ;;  %v8042_v40 = vld [vmem:[%s9586_s26 + $0x9b0] ss:$40 sps:$4 sm:$0xff]   ;;  %v8047_v41 = vld [vmem:[%s9586_s26 + $0x464] ss:$40 sps:$4 sm:$0xff]   ;;  %v8045_v9 = vld [vmem:[%s9586_s26 + $0x460] ss:$40 sps:$4 sm:$0xff]  }
  0xfc   : > { %999 = vmatpush1.bf16.msra.mxu0 %v6964_v46  ;;  %1040 = vmatpush1.bf16.msra.mxu1 %v6966_v47  ;;  %v8051_v46 = vld [vmem:[%s9586_s26 + $0x410] ss:$40 sps:$4 sm:$0xff]  }
  0xfd   : > { %1000 = vmatprep.subr.bf16.mxu0 %v6957_v48  ;;  %1041 = vmatprep.subr.bf16.mxu1 %v6959_v50  ;;  %v8054_v47 = vld [vmem:[%s9586_s26 + $0x910] ss:$40 sps:$4 sm:$0xff]   ;;  %v8059_v48 = vld [vmem:[%s9586_s26 + $0x3c4] ss:$40 sps:$4 sm:$0xff]   ;;  %v8057_v50 = vld [vmem:[%s9586_s26 + $0x3c0] ss:$40 sps:$4 sm:$0xff]  }
 0x100   : > { %1001 = vmatpush1.bf16.msra.mxu0 %v6956_v54  ;;  %1042 = vmatpush1.bf16.msra.mxu1 %v6958_v55  ;;  %v8063_v54 = vld [vmem:[%s9586_s26 + $0x370] ss:$40 sps:$4 sm:$0xff]  }
 0x101   : > { %1002 = vmatprep.subr.bf16.mxu0 %v6949_v56  ;;  %1043 = vmatprep.subr.bf16.mxu1 %v6951_v58  ;;  %v8066_v55 = vld [vmem:[%s9586_s26 + $0x870] ss:$40 sps:$4 sm:$0xff]   ;;  %v8071_v56 = vld [vmem:[%s9586_s26 + $0x324] ss:$40 sps:$4 sm:$0xff]   ;;  %v8069_v58 = vld [vmem:[%s9586_s26 + $0x320] ss:$40 sps:$4 sm:$0xff]  }
 0x104   : > { %1003 = vmatpush1.bf16.msra.mxu0 %v6948_v62  ;;  %1044 = vmatpush1.bf16.msra.mxu1 %v6950_v63  ;;  %v8075_v62 = vld [vmem:[%s9586_s26 + $0x2d0] ss:$40 sps:$4 sm:$0xff]  }
 0x105   : > { %1004 = vmatprep.subr.bf16.mxu0 %v6941_v0  ;;  %1045 = vmatprep.subr.bf16.mxu1 %v6943_v1  ;;  %v8078_v63 = vld [vmem:[%s9586_s26 + $0x7d0] ss:$40 sps:$4 sm:$0xff]   ;;  %v8083_v0 = vld [vmem:[%s9586_s26 + $0x284] ss:$40 sps:$4 sm:$0xff]  }
 0x106   : > { %v8086_v1 = vld [vmem:[%s9586_s26 + $0x784] ss:$40 sps:$4 sm:$0xff]  }
 0x108   : > { %1005 = vmatpush1.bf16.msra.mxu0 %v6940_v3  ;;  %1046 = vmatpush1.bf16.msra.mxu1 %v6942_v5  ;;  %v8084_v3 = vld [vmem:[%s9586_s26 + $0x780] ss:$40 sps:$4 sm:$0xff]   ;;  %v8092_v5 = vld [vmem:[%s9586_s26 + $0x1134] ss:$40 sps:$4 sm:$0xff]  }
 0x109   : > { %4982 = vmatprep.subr.bf16.mxu0 %v7993_v2  ;;  %5023 = vmatprep.subr.bf16.mxu1 %v7996_v4  ;;  %v8081_v2 = vld [vmem:[%s9586_s26 + $0x280] ss:$40 sps:$4 sm:$0xff]   ;;  %v8089_v4 = vld [vmem:[%s9586_s26 + $0xc34] ss:$40 sps:$4 sm:$0xff]  }
 0x10b   : > { %1023 = vmatmul.mubr.bf16.vlgmr.msra.gmra.mxu0 %v9611_v13  ;;  %1064 = vmatmul.mubr.bf16.vlgmr.msra.gmra.mxu1 %v9611_v13  ;;  %v8009_v13 = vld [vmem:[%s9586_s26 + $0x140] ss:$40 sps:$4 sm:$0xff]  }
 0x10c   : > { %4983 = vmatpush1.bf16.msra.mxu0 %v7991_v6  ;;  %5024 = vmatpush1.bf16.msra.mxu1 %v7994_v7  ;;  %v548_v6 = vlaneseq }
 0x10d   : > { %4984 = vmatprep.subr.bf16.mxu0 %v7999_v8  ;;  %5025 = vmatprep.subr.bf16.mxu1 %v8002_v10  ;;  %v9687_v8 = vld [vmem:[#allocation5] sm:$0xff] }
 0x10e   : > { %v9685_v7 = vshrl.u32 %v548_v6, 7  ;;  %v8134_v6 = vld [vmem:[%s9586_s26 + $0xf04] ss:$40 sps:$4 sm:$0xff]  }
 0x110   : > { %4985 = vmatpush1.bf16.msra.mxu0 %v7997_v11  ;;  %5026 = vmatpush1.bf16.msra.mxu1 %v8000_v12  ;;  %v9690_v10 = vsub.s32 0, %v9685_v7  ;;  %v558_v11 = vsub.s32 2, %v9685_v7  ;;  %v9694_v12 = vsub.s32 1, %v9685_v7 }
 0x111   : > { %4986 = vmatprep.subr.bf16.mxu0 %v8005_v14  ;;  %5027 = vmatprep.subr.bf16.mxu1 %v8008_v15  ;;  %v562_v14 = vsub.s32 3, %v9685_v7 }
 0x112   : > { %v551_v15 = vrot.slane %v9687_v8, %v9690_v10 }
 0x114   : > { %4987 = vmatpush1.bf16.msra.mxu0 %v8003_v16  ;;  %5028 = vmatpush1.bf16.msra.mxu1 %v8006_v17  ;;  %v559_v16 = vrot.slane %v9687_v8, %v558_v11  ;;  %v555_v17 = vrot.slane %v9687_v8, %v9694_v12 }
 0x115   : > { %4988 = vmatprep.subr.bf16.mxu0 %v8011_v18  ;;  %5029 = vmatprep.subr.bf16.mxu1 %v8014_v19  ;;  %v563_v19 = vrot.slane %v9687_v8, %v562_v14 }
 0x118   : > { %4989 = vmatpush1.bf16.msra.mxu0 %v8009_v13  ;;  %5030 = vmatpush1.bf16.msra.mxu1 %v8012_v20 }
 0x119   : > { %4990 = vmatprep.subr.bf16.mxu0 %v8017_v21  ;;  %5031 = vmatprep.subr.bf16.mxu1 %v8020_v22 }
 0x11c   : > { %4991 = vmatpush1.bf16.msra.mxu0 %v8015_v23  ;;  %5032 = vmatpush1.bf16.msra.mxu1 %v8018_v24 }
 0x11d   : > { %4992 = vmatprep.subr.bf16.mxu0 %v8023_v25  ;;  %5033 = vmatprep.subr.bf16.mxu1 %v8026_v26 }
 0x120   : > { %4993 = vmatpush1.bf16.msra.mxu0 %v8021_v27  ;;  %5034 = vmatpush1.bf16.msra.mxu1 %v8024_v28 }
 0x121   : > { %4994 = vmatprep.subr.bf16.mxu0 %v8029_v29  ;;  %5035 = vmatprep.subr.bf16.mxu1 %v8032_v30 }
 0x124   : > { %4995 = vmatpush1.bf16.msra.mxu0 %v8027_v31  ;;  %5036 = vmatpush1.bf16.msra.mxu1 %v8030_v32  ;;  %v8087_v31 = vld [vmem:[%s9586_s26 + $0xc30] ss:$40 sps:$4 sm:$0xff]  }
 0x125   : > { %4996 = vmatprep.subr.bf16.mxu0 %v8035_v33  ;;  %5037 = vmatprep.subr.bf16.mxu1 %v8038_v34  ;;  %v8090_v34 = vld [vmem:[%s9586_s26 + $0x1130] ss:$40 sps:$4 sm:$0xff]  }
 0x128   : > { %4997 = vmatpush1.bf16.msra.mxu0 %v8033_v35  ;;  %5038 = vmatpush1.bf16.msra.mxu1 %v8036_v36  ;;  %v8095_v35 = vld [vmem:[%s9586_s26 + $0xbe4] ss:$40 sps:$4 sm:$0xff]  }
 0x129   : > { %4998 = vmatprep.subr.bf16.mxu0 %v8041_v37  ;;  %5039 = vmatprep.subr.bf16.mxu1 %v8044_v38 }
 0x12c   : > { %4999 = vmatpush2.bf16.msra.mxu0 %v8039_v39  ;;  %5040 = vmatpush2.bf16.msra.mxu1 %v8042_v40  ;;  %v8098_v39 = vld [vmem:[%s9586_s26 + $0x10e4] ss:$40 sps:$4 sm:$0xff]  }
 0x12d   : > { %5000 = vmatprep.subr.bf16.mxu0 %v8047_v41  ;;  %5041 = vmatprep.subr.bf16.mxu1 %v8050_v42  ;;  %v8093_v42 = vld [vmem:[%s9586_s26 + $0xbe0] ss:$40 sps:$4 sm:$0xff]  }
 0x130   : > { %5001 = vmatpush2.bf16.msra.mxu0 %v8045_v9  ;;  %5042 = vmatpush2.bf16.msra.mxu1 %v8048_v43  ;;  %v8096_v9 = vld [vmem:[%s9586_s26 + $0x10e0] ss:$40 sps:$4 sm:$0xff]   ;;  %v8101_v43 = vld [vmem:[%s9586_s26 + $0xb94] ss:$40 sps:$4 sm:$0xff]  }
 0x131   : > { %5002 = vmatprep.subr.bf16.mxu0 %v8053_v44  ;;  %5043 = vmatprep.subr.bf16.mxu1 %v8056_v45  ;;  %v8104_v44 = vld [vmem:[%s9586_s26 + $0x1094] ss:$40 sps:$4 sm:$0xff]   ;;  %v8099_v45 = vld [vmem:[%s9586_s26 + $0xb90] ss:$40 sps:$4 sm:$0xff]  }
 0x134   : > { %5003 = vmatpush2.bf16.msra.mxu0 %v8051_v46  ;;  %5044 = vmatpush2.bf16.msra.mxu1 %v8054_v47  ;;  %v8102_v46 = vld [vmem:[%s9586_s26 + $0x1090] ss:$40 sps:$4 sm:$0xff]   ;;  %v8107_v47 = vld [vmem:[%s9586_s26 + $0xb44] ss:$40 sps:$4 sm:$0xff]  }
 0x135   : > { %5004 = vmatprep.subr.bf16.mxu0 %v8059_v48  ;;  %5045 = vmatprep.subr.bf16.mxu1 %v8062_v49  ;;  %v8105_v48 = vld [vmem:[%s9586_s26 + $0xb40] ss:$40 sps:$4 sm:$0xff]   ;;  %v8110_v49 = vld [vmem:[%s9586_s26 + $0x1044] ss:$40 sps:$4 sm:$0xff]  }
 0x138   : > { %5005 = vmatpush2.bf16.msra.mxu0 %v8057_v50  ;;  %5046 = vmatpush2.bf16.msra.mxu1 %v8060_v51  ;;  %v8108_v50 = vld [vmem:[%s9586_s26 + $0x1040] ss:$40 sps:$4 sm:$0xff]   ;;  %v8113_v51 = vld [vmem:[%s9586_s26 + $0xaf4] ss:$40 sps:$4 sm:$0xff]  }
 0x139   : > { %5006 = vmatprep.subr.bf16.mxu0 %v8065_v52  ;;  %5047 = vmatprep.subr.bf16.mxu1 %v8068_v53  ;;  %v8111_v52 = vld [vmem:[%s9586_s26 + $0xaf0] ss:$40 sps:$4 sm:$0xff]   ;;  %v8116_v53 = vld [vmem:[%s9586_s26 + $0xff4] ss:$40 sps:$4 sm:$0xff]  }
 0x13c   : > { %5007 = vmatpush2.bf16.msra.mxu0 %v8063_v54  ;;  %5048 = vmatpush2.bf16.msra.mxu1 %v8066_v55  ;;  %v8114_v54 = vld [vmem:[%s9586_s26 + $0xff0] ss:$40 sps:$4 sm:$0xff]   ;;  %v8119_v55 = vld [vmem:[%s9586_s26 + $0xaa4] ss:$40 sps:$4 sm:$0xff]  }
 0x13d   : > { %5008 = vmatprep.subr.bf16.mxu0 %v8071_v56  ;;  %5049 = vmatprep.subr.bf16.mxu1 %v8074_v57  ;;  %v8117_v56 = vld [vmem:[%s9586_s26 + $0xaa0] ss:$40 sps:$4 sm:$0xff]   ;;  %v8122_v57 = vld [vmem:[%s9586_s26 + $0xfa4] ss:$40 sps:$4 sm:$0xff]  }
 0x140   : > { %5009 = vmatpush2.bf16.msra.mxu0 %v8069_v58  ;;  %5050 = vmatpush2.bf16.msra.mxu1 %v8072_v59  ;;  %v570_v58 = vsub.s32 5, %v9685_v7  ;;  %v8120_v59 = vld [vmem:[%s9586_s26 + $0xfa0] ss:$40 sps:$4 sm:$0xff]  }
 0x141   : > { %5010 = vmatprep.subr.bf16.mxu0 %v8077_v60  ;;  %5051 = vmatprep.subr.bf16.mxu1 %v8080_v61  ;;  %v8125_v60 = vld [vmem:[%s9586_s26 + $0xa54] ss:$40 sps:$4 sm:$0xff]   ;;  %v578_v61 = vsub.s32 7, %v9685_v7 }
 0x144   : > { %5011 = vmatpush2.bf16.msra.mxu0 %v8075_v62  ;;  %5052 = vmatpush2.bf16.msra.mxu1 %v8078_v63  ;;  %v8123_v62 = vld [vmem:[%s9586_s26 + $0xa50] ss:$40 sps:$4 sm:$0xff]   ;;  %v8128_v63 = vld [vmem:[%s9586_s26 + $0xf54] ss:$40 sps:$4 sm:$0xff]  }
 0x145   : > { %5012 = vmatprep.subr.bf16.mxu0 %v8083_v0  ;;  %5053 = vmatprep.subr.bf16.mxu1 %v8086_v1  ;;  %v571_v0 = vrot.slane %v9687_v8, %v570_v58  ;;  %v8126_v1 = vld [vmem:[%s9586_s26 + $0xf50] ss:$40 sps:$4 sm:$0xff]  }
 0x148   : > { %5013 = vmatpush2.bf16.msra.mxu0 %v8081_v2  ;;  %5054 = vmatpush2.bf16.msra.mxu1 %v8084_v3  ;;  %v8131_v2 = vld [vmem:[%s9586_s26 + $0xa04] ss:$40 sps:$4 sm:$0xff]  }
 0x149   : > { %5064 = vmatprep.subr.bf16.mxu0 %v8089_v4  ;;  %5105 = vmatprep.subr.bf16.mxu1 %v8092_v5  ;;  %v579_v4 = vrot.slane %v9687_v8, %v578_v61  ;;  %v8129_v5 = vld [vmem:[%s9586_s26 + $0xa00] ss:$40 sps:$4 sm:$0xff]  }
 0x1ab   : > { %v942_v18 = vpop.f32.mrf.mxu0  ;;  %v983_v20 = vpop.f32.mrf.mxu1 }
 0x1ac   : > { %v943_v13 = vadd.f32 %v942_v18, %v551_v15  ;;  %v984_v21 = vadd.f32 %v983_v20, %v559_v16 }
 0x1ad   : > { %v944_v22 = vpop.f32.mrf.mxu0  ;;  %v985_v24 = vpop.f32.mrf.mxu1 }
 0x1ae   : > { %v945_v23 = vadd.f32 %v944_v22, %v555_v17  ;;  %v1072_v25 = vmax.f32 %v943_v13, 0.0  ;;  %v1074_v26 = vmax.f32 %v984_v21, 0.0  ;;  %v986_v27 = vadd.f32 %v985_v24, %v563_v19  ;;  %v8132_v19 = vld [vmem:[%s9586_s26 + $0xf00] ss:$40 sps:$4 sm:$0xff]   ;;  %v8137_v13 = vld [vmem:[%s9586_s26 + $0xeb4] ss:$40 sps:$4 sm:$0xff]  }
 0x1af   : > { %v946_v28 = vpop.f32.mrf.mxu0  ;;  %v987_v30 = vpop.f32.mrf.mxu1  ;;  %v8135_v22 = vld [vmem:[%s9586_s26 + $0xeb0] ss:$40 sps:$4 sm:$0xff]  }
 0x1b0   : > { %v1073_v29 = vmax.f32 %v945_v23, 0.0  ;;  %v1075_v32 = vmax.f32 %v986_v27, 0.0  ;;  %v9710_v36 = vpack.c.bf16 %v1074_v26, %v1074_v26  ;;  %v9715_v40 = vpack.c.bf16 %v1072_v25, %v1072_v25  ;;  %v8140_v23 = vld [vmem:[%s9586_s26 + $0x13b4] ss:$40 sps:$4 sm:$0xff]   ;;  %v8138_v30 = vld [vmem:[%s9586_s26 + $0x13b0] ss:$40 sps:$4 sm:$0xff]  }
 0x1b1   : > { %v947_v33 = vpop.f32.mrf.mxu0  ;;  %v988_v38 = vpop.f32.mrf.mxu1 }
 0x1b2   : > { %v9712_v37 = vpack.c.bf16 %v1073_v29, %v1073_v29  ;;  %v9717_v41 = vpack.c.bf16 %v1075_v32, %v1075_v32  ;;  %v8141_v33 = vld [vmem:[%s9586_s26 + $0xe60] ss:$40 sps:$4 sm:$0xff]   ;;  %v8149_v38 = vld [vmem:[%s9586_s26 + $0xe14] ss:$40 sps:$4 sm:$0xff]  }
 0x1b4   : > { %5014 = vmatprep.mubr.bf16.mxu0 %v9712_v37  ;;  %5055 = vmatprep.mubr.bf16.mxu1 %v9717_v41 }
 0x1b5   : > { %5015 = vmatmul.mubr.bf16.vlgmr.msra.gmra.mxu0 %v9715_v40  ;;  %5056 = vmatmul.mubr.bf16.vlgmr.msra.gmra.mxu1 %v9710_v36 }
 0x1b6   : > { %5065 = vmatpush1.bf16.msra.mxu0 %v8087_v31  ;;  %5106 = vmatpush1.bf16.msra.mxu1 %v8090_v34  ;;  %v8143_v31 = vld [vmem:[%s9586_s26 + $0xe64] ss:$40 sps:$4 sm:$0xff]  }
 0x1b7   : > { %5066 = vmatprep.subr.bf16.mxu0 %v8095_v35  ;;  %5107 = vmatprep.subr.bf16.mxu1 %v8098_v39  ;;  %v8146_v34 = vld [vmem:[%s9586_s26 + $0x1364] ss:$40 sps:$4 sm:$0xff]   ;;  %v8144_v35 = vld [vmem:[%s9586_s26 + $0x1360] ss:$40 sps:$4 sm:$0xff]   ;;  %v8147_v39 = vld [vmem:[%s9586_s26 + $0xe10] ss:$40 sps:$4 sm:$0xff]  }
 0x1ba   : > { %5067 = vmatpush1.bf16.msra.mxu0 %v8093_v42  ;;  %5108 = vmatpush1.bf16.msra.mxu1 %v8096_v9  ;;  %v8152_v42 = vld [vmem:[%s9586_s26 + $0x1314] ss:$40 sps:$4 sm:$0xff]   ;;  %v8150_v9 = vld [vmem:[%s9586_s26 + $0x1310] ss:$40 sps:$4 sm:$0xff]  }
 0x1bb   : > { %5068 = vmatprep.subr.bf16.mxu0 %v8101_v43  ;;  %5109 = vmatprep.subr.bf16.mxu1 %v8104_v44  ;;  %v8155_v43 = vld [vmem:[%s9586_s26 + $0xdc4] ss:$40 sps:$4 sm:$0xff]   ;;  %v8153_v44 = vld [vmem:[%s9586_s26 + $0xdc0] ss:$40 sps:$4 sm:$0xff]  }
 0x1be   : > { %5069 = vmatpush1.bf16.msra.mxu0 %v8099_v45  ;;  %5110 = vmatpush1.bf16.msra.mxu1 %v8102_v46  ;;  %v8158_v45 = vld [vmem:[%s9586_s26 + $0x12c4] ss:$40 sps:$4 sm:$0xff]   ;;  %v8156_v46 = vld [vmem:[%s9586_s26 + $0x12c0] ss:$40 sps:$4 sm:$0xff]  }
 0x1bf   : > { %5070 = vmatprep.subr.bf16.mxu0 %v8107_v47  ;;  %5111 = vmatprep.subr.bf16.mxu1 %v8110_v49  ;;  %v8161_v47 = vld [vmem:[%s9586_s26 + $0xd74] ss:$40 sps:$4 sm:$0xff]  }
 0x1c0   : > { %v8164_v49 = vld [vmem:[%s9586_s26 + $0x1274] ss:$40 sps:$4 sm:$0xff]  }
 0x1c2   : > { %5071 = vmatpush1.bf16.msra.mxu0 %v8105_v48  ;;  %5112 = vmatpush1.bf16.msra.mxu1 %v8108_v50  ;;  %v8159_v48 = vld [vmem:[%s9586_s26 + $0xd70] ss:$40 sps:$4 sm:$0xff]   ;;  %v574_v50 = vsub.s32 6, %v9685_v7 }
 0x1c3   : > { %5072 = vmatprep.subr.bf16.mxu0 %v8113_v51  ;;  %5113 = vmatprep.subr.bf16.mxu1 %v8116_v53  ;;  %v8162_v51 = vld [vmem:[%s9586_s26 + $0x1270] ss:$40 sps:$4 sm:$0xff]   ;;  %v8167_v53 = vld [vmem:[%s9586_s26 + $0xd24] ss:$40 sps:$4 sm:$0xff]  }
 0x1c6   : > { %5073 = vmatpush1.bf16.msra.mxu0 %v8111_v52  ;;  %5114 = vmatpush1.bf16.msra.mxu1 %v8114_v54  ;;  %v566_v52 = vsub.s32 4, %v9685_v7  ;;  %v8165_v54 = vld [vmem:[%s9586_s26 + $0xd20] ss:$40 sps:$4 sm:$0xff]   ;;  %v9016_v7 = vld [vmem:[%s9594_s12 + $0x238] sm:$0xff]  }
 0x1c7   : > { %5074 = vmatprep.subr.bf16.mxu0 %v8119_v55  ;;  %5115 = vmatprep.subr.bf16.mxu1 %v8122_v57  ;;  %v8170_v55 = vld [vmem:[%s9586_s26 + $0x1224] ss:$40 sps:$4 sm:$0xff]  }
 0x1c8   : > { %v567_v57 = vrot.slane %v9687_v8, %v566_v52 }
 0x1ca   : > { %5075 = vmatpush1.bf16.msra.mxu0 %v8117_v56  ;;  %5116 = vmatpush1.bf16.msra.mxu1 %v8120_v59  ;;  %v575_v56 = vrot.slane %v9687_v8, %v574_v50  ;;  %v8168_v59 = vld [vmem:[%s9586_s26 + $0x1220] ss:$40 sps:$4 sm:$0xff]   ;;  %v8174_v8 = vld [vmem:[%s9586_s26 + $0x11d0] ss:$40 sps:$4 sm:$0xff]  }
 0x1cb   : > { %5076 = vmatprep.subr.bf16.mxu0 %v8125_v60  ;;  %v9751_v3 = vpop.f32.mrf.mxu0  ;;  %5117 = vmatprep.subr.bf16.mxu1 %v8128_v63  ;;  %v9758_v15 = vpop.f32.mrf.mxu1  ;;  %v8173_v60 = vld [vmem:[%s9586_s26 + $0xcd4] ss:$40 sps:$4 sm:$0xff]  }
 0x1cc   : > { %v8176_v63 = vld [vmem:[%s9586_s26 + $0x11d4] ss:$40 sps:$4 sm:$0xff]  }
 0x1cd   : > { %v1026_v16 = vpop.f32.mrf.mxu0  ;;  %v1067_v18 = vpop.f32.mrf.mxu1 }
 0x1ce   : > { %5077 = vmatpush1.bf16.msra.mxu0 %v8123_v62  ;;  %v1027_v17 = vadd.f32 %v1026_v16, %v571_v0  ;;  %5118 = vmatpush1.bf16.msra.mxu1 %v8126_v1  ;;  %v1068_v21 = vadd.f32 %v1067_v18, %v579_v4  ;;  %v8171_v62 = vld [vmem:[%s9586_s26 + $0xcd0] ss:$40 sps:$4 sm:$0xff]   ;;  %v1066_v0 = vadd.f32 %v9758_v15, %v575_v56  ;;  %v8177_v4 = vld [vmem:[%s9586_s26 + $0xc80] ss:$40 sps:$4 sm:$0xff]   ;;  %v8185_v15 = vld [vmem:[%s9586_s26 + $0x23c] ss:$40 sps:$4 sm:$0xff]  }
 0x1cf   : > { %5078 = vmatprep.subr.bf16.mxu0 %v8131_v2  ;;  %v1028_v20 = vpop.f32.mrf.mxu0  ;;  %5119 = vmatprep.subr.bf16.mxu1 %v8134_v6  ;;  %v1069_v25 = vpop.f32.mrf.mxu1  ;;  %v1025_v1 = vadd.f32 %v9751_v3, %v567_v57  ;;  %v8179_v2 = vld [vmem:[%s9586_s26 + $0xc84] ss:$40 sps:$4 sm:$0xff]   ;;  %v8180_v6 = vld [vmem:[%s9586_s26 + $0x1180] ss:$40 sps:$4 sm:$0xff]  }
 0x1d0   : > { %v1077_v24 = vmax.f32 %v1027_v17, 0.0  ;;  %v1079_v26 = vmax.f32 %v1068_v21, 0.0  ;;  %v1078_v16 = vmax.f32 %v1066_v0, 0.0  ;;  %v8188_v3 = vld [vmem:[%s9586_s26 + $0x73c] ss:$40 sps:$4 sm:$0xff]  }
 0x1d1   : > { %v1029_v27 = vpop.f32.mrf.mxu0  ;;  %v1070_v29 = vpop.f32.mrf.mxu1  ;;  %v1076_v17 = vmax.f32 %v1025_v1, 0.0  ;;  %v8183_v18 = vld [vmem:[%s9586_s26 + $0x238] ss:$40 sps:$4 sm:$0xff]   ;;  %v8191_v20 = vld [vmem:[%s9586_s26 + $0x1ec] ss:$40 sps:$4 sm:$0xff]  }
 0x1d2   : > { %5079 = vmatpush1.bf16.msra.mxu0 %v8129_v5  ;;  %v9764_v28 = vpack.c.bf16 %v1077_v24, %v1077_v24  ;;  %5120 = vmatpush1.bf16.msra.mxu1 %v8132_v19  ;;  %v9768_v32 = vpack.c.bf16 %v1079_v26, %v1079_v26  ;;  %v8182_v5 = vld [vmem:[%s9586_s26 + $0x1184] ss:$40 sps:$4 sm:$0xff]   ;;  %v8186_v19 = vld [vmem:[%s9586_s26 + $0x738] ss:$40 sps:$4 sm:$0xff]   ;;  %v8192_v24 = vld [vmem:[%s9586_s26 + $0x6e8] ss:$40 sps:$4 sm:$0xff]  }
 0x1d3   : > { %5080 = vmatprep.subr.bf16.mxu0 %v8137_v13  ;;  %5121 = vmatprep.subr.bf16.mxu1 %v8140_v23  ;;  %v9813_v13 = vpack.c.bf16 %v1078_v16, %v1078_v16  ;;  %v9816_v21 = vpack.c.bf16 %v1076_v17, %v1076_v17  ;;  %v8194_v23 = vld [vmem:[%s9586_s26 + $0x6ec] ss:$40 sps:$4 sm:$0xff]   ;;  %v8197_v25 = vld [vmem:[%s9586_s26 + $0x19c] ss:$40 sps:$4 sm:$0xff]   ;;  %v8195_v27 = vld [vmem:[%s9586_s26 + $0x198] ss:$40 sps:$4 sm:$0xff]  }
 0x1d4   : > { %5096 = vmatprep.mubr.bf16.mxu0 %v9764_v28  ;;  %5137 = vmatprep.mubr.bf16.mxu1 %v9768_v32  ;;  %v8200_v26 = vld [vmem:[%s9586_s26 + $0x69c] ss:$40 sps:$4 sm:$0xff]   ;;  %v8198_v29 = vld [vmem:[%s9586_s26 + $0x698] ss:$40 sps:$4 sm:$0xff]   ;;  %v8242_v0 = vld [vmem:[%s9586_s26 + $0x96c] ss:$40 sps:$4 sm:$0xff]  }
 0x1d5   : > { %v8233_v56 = vld [vmem:[%s9586_s26 + $0x4bc] ss:$40 sps:$4 sm:$0xff]   ;;  %v8231_v57 = vld [vmem:[%s9586_s26 + $0x4b8] ss:$40 sps:$4 sm:$0xff]   ;;  %v8240_v1 = vld [vmem:[%s9586_s26 + $0x968] ss:$40 sps:$4 sm:$0xff]  }
 0x1d6   : > { %5081 = vmatpush2.bf16.msra.mxu0 %v8135_v22  ;;  %5122 = vmatpush2.bf16.msra.mxu1 %v8138_v30  ;;  %v8189_v22 = vld [vmem:[%s9586_s26 + $0x1e8] ss:$40 sps:$4 sm:$0xff]   ;;  %v8203_v30 = vld [vmem:[%s9586_s26 + $0x14c] ss:$40 sps:$4 sm:$0xff]  }
 0x1d7   : > { %5082 = vmatprep.subr.bf16.mxu0 %v8143_v31  ;;  %5123 = vmatprep.subr.bf16.mxu1 %v8146_v34  ;;  %v8206_v31 = vld [vmem:[%s9586_s26 + $0x64c] ss:$40 sps:$4 sm:$0xff]   ;;  %v8204_v34 = vld [vmem:[%s9586_s26 + $0x648] ss:$40 sps:$4 sm:$0xff]  }
 0x1d8   : > { %v8249_v16 = vld [vmem:[%s9586_s26 + $0x3c8] ss:$40 sps:$4 sm:$0xff]   ;;  %v8254_v17 = vld [vmem:[%s9586_s26 + $0x8cc] ss:$40 sps:$4 sm:$0xff]  }
 0x1da   : > { %5083 = vmatpush2.bf16.msra.mxu0 %v8141_v33  ;;  %5124 = vmatpush2.bf16.msra.mxu1 %v8144_v35  ;;  %v8201_v33 = vld [vmem:[%s9586_s26 + $0x148] ss:$40 sps:$4 sm:$0xff]   ;;  %v8209_v35 = vld [vmem:[%s9586_s26 + $0xfc] ss:$40 sps:$4 sm:$0xff]  }
 0x1db   : > { %5084 = vmatprep.subr.bf16.mxu0 %v8149_v38  ;;  %5125 = vmatprep.subr.bf16.mxu1 %v8152_v42  ;;  %v8207_v38 = vld [vmem:[%s9586_s26 + $0xf8] ss:$40 sps:$4 sm:$0xff]  }
 0x1dc   : > { %v8210_v42 = vld [vmem:[%s9586_s26 + $0x5f8] ss:$40 sps:$4 sm:$0xff]  }
 0x1de   : > { %5085 = vmatpush2.bf16.msra.mxu0 %v8147_v39  ;;  %5126 = vmatpush2.bf16.msra.mxu1 %v8150_v9  ;;  %v8212_v39 = vld [vmem:[%s9586_s26 + $0x5fc] ss:$40 sps:$4 sm:$0xff]   ;;  %v8215_v9 = vld [vmem:[%s9586_s26 + $0xac] ss:$40 sps:$4 sm:$0xff]  }
 0x1df   : > { %5086 = vmatprep.subr.bf16.mxu0 %v8155_v43  ;;  %5127 = vmatprep.subr.bf16.mxu1 %v8158_v45  ;;  %v8213_v43 = vld [vmem:[%s9586_s26 + $0xa8] ss:$40 sps:$4 sm:$0xff]  }
 0x1e0   : > { %v8216_v45 = vld [vmem:[%s9586_s26 + $0x5a8] ss:$40 sps:$4 sm:$0xff]  }
 0x1e2   : > { %5087 = vmatpush2.bf16.msra.mxu0 %v8153_v44  ;;  %5128 = vmatpush2.bf16.msra.mxu1 %v8156_v46  ;;  %v8218_v44 = vld [vmem:[%s9586_s26 + $0x5ac] ss:$40 sps:$4 sm:$0xff]   ;;  %v8221_v46 = vld [vmem:[%s9586_s26 + $0x5c] ss:$40 sps:$4 sm:$0xff]  }
 0x1e3   : > { %5088 = vmatprep.subr.bf16.mxu0 %v8161_v47  ;;  %5129 = vmatprep.subr.bf16.mxu1 %v8164_v49  ;;  %v8219_v47 = vld [vmem:[%s9586_s26 + $0x58] ss:$40 sps:$4 sm:$0xff]  }
 0x1e4   : > { %v8222_v49 = vld [vmem:[%s9586_s26 + $0x558] ss:$40 sps:$4 sm:$0xff]  }
 0x1e6   : > { %5089 = vmatpush2.bf16.msra.mxu0 %v8159_v48  ;;  %5130 = vmatpush2.bf16.msra.mxu1 %v8162_v51  ;;  %v8224_v48 = vld [vmem:[%s9586_s26 + $0x55c] ss:$40 sps:$4 sm:$0xff]   ;;  %v8227_v51 = vld [vmem:[%s9586_s26 + $0xc] ss:$40 sps:$4 sm:$0xff]  }
 0x1e7   : > { %5090 = vmatprep.subr.bf16.mxu0 %v8167_v53  ;;  %5131 = vmatprep.subr.bf16.mxu1 %v8170_v55  ;;  %v8225_v53 = vld [vmem:[%s9586_s26 + $0x8] ss:$40 sps:$4 sm:$0xff]  }
 0x1e8   : > { %v8228_v55 = vld [vmem:[%s9586_s26 + $0x508] ss:$40 sps:$4 sm:$0xff]  }
 0x1ea   : > { %5091 = vmatpush2.bf16.msra.mxu0 %v8165_v54  ;;  %5132 = vmatpush2.bf16.msra.mxu1 %v8168_v59  ;;  %v8230_v54 = vld [vmem:[%s9586_s26 + $0x50c] ss:$40 sps:$4 sm:$0xff]   ;;  %v8236_v59 = vld [vmem:[%s9586_s26 + $0x9bc] ss:$40 sps:$4 sm:$0xff]  }
 0x1eb   : > { %5092 = vmatprep.subr.bf16.mxu0 %v8173_v60  ;;  %5133 = vmatprep.subr.bf16.mxu1 %v8176_v63  ;;  %v8234_v60 = vld [vmem:[%s9586_s26 + $0x9b8] ss:$40 sps:$4 sm:$0xff]   ;;  %v8237_v63 = vld [vmem:[%s9586_s26 + $0x468] ss:$40 sps:$4 sm:$0xff]  }
 0x1ee   : > { %5093 = vmatpush2.bf16.msra.mxu0 %v8171_v62  ;;  %5134 = vmatpush2.bf16.msra.mxu1 %v8174_v8  ;;  %v8239_v62 = vld [vmem:[%s9586_s26 + $0x46c] ss:$40 sps:$4 sm:$0xff]   ;;  %v8245_v8 = vld [vmem:[%s9586_s26 + $0x41c] ss:$40 sps:$4 sm:$0xff]  }
 0x1ef   : > { %5094 = vmatprep.subr.bf16.mxu0 %v8179_v2  ;;  %5135 = vmatprep.subr.bf16.mxu1 %v8182_v5  ;;  %v8243_v2 = vld [vmem:[%s9586_s26 + $0x418] ss:$40 sps:$4 sm:$0xff]  }
 0x1f0   : > { %v8246_v5 = vld [vmem:[%s9586_s26 + $0x918] ss:$40 sps:$4 sm:$0xff]  }
 0x1f2   : > { %5095 = vmatpush2.bf16.msra.mxu0 %v8177_v4  ;;  %5136 = vmatpush2.bf16.msra.mxu1 %v8180_v6  ;;  %v8248_v4 = vld [vmem:[%s9586_s26 + $0x91c] ss:$40 sps:$4 sm:$0xff]   ;;  %v8251_v6 = vld [vmem:[%s9586_s26 + $0x3cc] ss:$40 sps:$4 sm:$0xff]  }
 0x1f3   : > { %5146 = vmatprep.subr.bf16.mxu0 %v8185_v15  ;;  %5187 = vmatprep.subr.bf16.mxu1 %v8188_v3  ;;  %v8252_v15 = vld [vmem:[%s9586_s26 + $0x8c8] ss:$40 sps:$4 sm:$0xff]   ;;  %v8257_v3 = vld [vmem:[%s9586_s26 + $0x37c] ss:$40 sps:$4 sm:$0xff]  }
 0x1f5   : > { %5097 = vmatmul.mubr.bf16.vlgmr.msra.gmra.mxu0 %v9816_v21  ;;  %5138 = vmatmul.mubr.bf16.vlgmr.msra.gmra.mxu1 %v9813_v13 }
 0x1f6   : > { %5147 = vmatpush1.bf16.msra.mxu0 %v8183_v18  ;;  %5178 = vmatprep.mubr.bf16.mxu0 %v9712_v37  ;;  %v8255_v18 = vld [vmem:[%s9586_s26 + $0x378] ss:$40 sps:$4 sm:$0xff]  }
 0x1f7   : > { %5188 = vmatpush1.bf16.msra.mxu1 %v8186_v19  ;;  %5219 = vmatprep.mubr.bf16.mxu1 %v9717_v41  ;;  %v8260_v19 = vld [vmem:[%s9586_s26 + $0x87c] ss:$40 sps:$4 sm:$0xff]  }
 0x1f8   : > { %5148 = vmatprep.subr.bf16.mxu0 %v8191_v20  ;;  %5189 = vmatprep.subr.bf16.mxu1 %v8194_v23  ;;  %v8258_v20 = vld [vmem:[%s9586_s26 + $0x878] ss:$40 sps:$4 sm:$0xff]   ;;  %v8261_v23 = vld [vmem:[%s9586_s26 + $0x328] ss:$40 sps:$4 sm:$0xff]  }
 0x1fa   : > { %5149 = vmatpush1.bf16.msra.mxu0 %v8189_v22  ;;  %v8263_v22 = vld [vmem:[%s9586_s26 + $0x32c] ss:$40 sps:$4 sm:$0xff]  }
 0x1fb   : > { %5190 = vmatpush1.bf16.msra.mxu1 %v8192_v24  ;;  %5150 = vmatprep.subr.bf16.mxu0 %v8197_v25  ;;  %v8266_v24 = vld [vmem:[%s9586_s26 + $0x82c] ss:$40 sps:$4 sm:$0xff]   ;;  %v8264_v25 = vld [vmem:[%s9586_s26 + $0x828] ss:$40 sps:$4 sm:$0xff]  }
 0x1fc   : > { %5191 = vmatprep.subr.bf16.mxu1 %v8200_v26  ;;  %v8269_v26 = vld [vmem:[%s9586_s26 + $0x2dc] ss:$40 sps:$4 sm:$0xff]  }
 0x1fe   : > { %5151 = vmatpush1.bf16.msra.mxu0 %v8195_v27  ;;  %v8267_v27 = vld [vmem:[%s9586_s26 + $0x2d8] ss:$40 sps:$4 sm:$0xff]  }
 0x1ff   : > { %5192 = vmatpush1.bf16.msra.mxu1 %v8198_v29  ;;  %5152 = vmatprep.subr.bf16.mxu0 %v8203_v30  ;;  %v8272_v29 = vld [vmem:[%s9586_s26 + $0x7dc] ss:$40 sps:$4 sm:$0xff]   ;;  %v8270_v30 = vld [vmem:[%s9586_s26 + $0x7d8] ss:$40 sps:$4 sm:$0xff]  }
 0x200   : > { %5193 = vmatprep.subr.bf16.mxu1 %v8206_v31  ;;  %v8275_v31 = vld [vmem:[%s9586_s26 + $0x28c] ss:$40 sps:$4 sm:$0xff]  }
 0x202   : > { %5153 = vmatpush1.bf16.msra.mxu0 %v8201_v33  ;;  %v8273_v33 = vld [vmem:[%s9586_s26 + $0x288] ss:$40 sps:$4 sm:$0xff]  }
 0x203   : > { %5194 = vmatpush1.bf16.msra.mxu1 %v8204_v34  ;;  %5154 = vmatprep.subr.bf16.mxu0 %v8209_v35  ;;  %v8278_v34 = vld [vmem:[%s9586_s26 + $0x78c] ss:$40 sps:$4 sm:$0xff]   ;;  %v8276_v35 = vld [vmem:[%s9586_s26 + $0x788] ss:$40 sps:$4 sm:$0xff]  }
 0x204   : > { %5195 = vmatprep.subr.bf16.mxu1 %v8212_v39  ;;  %v8284_v39 = vld [vmem:[%s9586_s26 + $0x113c] ss:$40 sps:$4 sm:$0xff]  }
 0x206   : > { %5155 = vmatpush1.bf16.msra.mxu0 %v8207_v38  ;;  %v8281_v38 = vld [vmem:[%s9586_s26 + $0xc3c] ss:$40 sps:$4 sm:$0xff]  }
 0x207   : > { %5196 = vmatpush1.bf16.msra.mxu1 %v8210_v42  ;;  %5156 = vmatprep.subr.bf16.mxu0 %v8215_v9  ;;  %v8279_v42 = vld [vmem:[%s9586_s26 + $0xc38] ss:$40 sps:$4 sm:$0xff]  }
 0x208   : > { %5197 = vmatprep.subr.bf16.mxu1 %v8218_v44  ;;  %v8282_v9 = vld [vmem:[%s9586_s26 + $0x1138] ss:$40 sps:$4 sm:$0xff]   ;;  %v8285_v44 = vld [vmem:[%s9586_s26 + $0xbe8] ss:$40 sps:$4 sm:$0xff]  }
 0x20a   : > { %5157 = vmatpush1.bf16.msra.mxu0 %v8213_v43  ;;  %v8287_v43 = vld [vmem:[%s9586_s26 + $0xbec] ss:$40 sps:$4 sm:$0xff]  }
 0x20b   : > { %5198 = vmatpush1.bf16.msra.mxu1 %v8216_v45  ;;  %5158 = vmatprep.subr.bf16.mxu0 %v8221_v46  ;;  %v8288_v45 = vld [vmem:[%s9586_s26 + $0x10e8] ss:$40 sps:$4 sm:$0xff]   ;;  %v8290_v46 = vld [vmem:[%s9586_s26 + $0x10ec] ss:$40 sps:$4 sm:$0xff]  }
 0x20c   : > { %5199 = vmatprep.subr.bf16.mxu1 %v8224_v48  ;;  %v8296_v48 = vld [vmem:[%s9586_s26 + $0x109c] ss:$40 sps:$4 sm:$0xff]  }
 0x20e   : > { %5159 = vmatpush1.bf16.msra.mxu0 %v8219_v47  ;;  %v8293_v47 = vld [vmem:[%s9586_s26 + $0xb9c] ss:$40 sps:$4 sm:$0xff]  }
 0x20f   : > { %5200 = vmatpush1.bf16.msra.mxu1 %v8222_v49  ;;  %5160 = vmatprep.subr.bf16.mxu0 %v8227_v51  ;;  %v8291_v49 = vld [vmem:[%s9586_s26 + $0xb98] ss:$40 sps:$4 sm:$0xff]  }
 0x210   : > { %5201 = vmatprep.subr.bf16.mxu1 %v8230_v54  ;;  %v8294_v51 = vld [vmem:[%s9586_s26 + $0x1098] ss:$40 sps:$4 sm:$0xff]   ;;  %v8302_v54 = vld [vmem:[%s9586_s26 + $0x104c] ss:$40 sps:$4 sm:$0xff]  }
 0x212   : > { %5161 = vmatpush1.bf16.msra.mxu0 %v8225_v53  ;;  %v8299_v53 = vld [vmem:[%s9586_s26 + $0xb4c] ss:$40 sps:$4 sm:$0xff]  }
 0x213   : > { %5202 = vmatpush1.bf16.msra.mxu1 %v8228_v55  ;;  %5162 = vmatprep.subr.bf16.mxu0 %v8233_v56  ;;  %v8297_v55 = vld [vmem:[%s9586_s26 + $0xb48] ss:$40 sps:$4 sm:$0xff]  }
 0x214   : > { %5203 = vmatprep.subr.bf16.mxu1 %v8236_v59  ;;  %v8300_v56 = vld [vmem:[%s9586_s26 + $0x1048] ss:$40 sps:$4 sm:$0xff]   ;;  %v8303_v59 = vld [vmem:[%s9586_s26 + $0xaf8] ss:$40 sps:$4 sm:$0xff]  }
 0x216   : > { %5163 = vmatpush2.bf16.msra.mxu0 %v8231_v57  ;;  %v8305_v57 = vld [vmem:[%s9586_s26 + $0xafc] ss:$40 sps:$4 sm:$0xff]  }
 0x217   : > { %5204 = vmatpush2.bf16.msra.mxu1 %v8234_v60  ;;  %5164 = vmatprep.subr.bf16.mxu0 %v8239_v62  ;;  %v8308_v60 = vld [vmem:[%s9586_s26 + $0xffc] ss:$40 sps:$4 sm:$0xff]   ;;  %v8306_v62 = vld [vmem:[%s9586_s26 + $0xff8] ss:$40 sps:$4 sm:$0xff]  }
 0x218   : > { %5205 = vmatprep.subr.bf16.mxu1 %v8242_v0  ;;  %v8309_v0 = vld [vmem:[%s9586_s26 + $0xaa8] ss:$40 sps:$4 sm:$0xff]  }
 0x21a   : > { %5165 = vmatpush2.bf16.msra.mxu0 %v8237_v63  ;;  %v8311_v63 = vld [vmem:[%s9586_s26 + $0xaac] ss:$40 sps:$4 sm:$0xff]  }
 0x21b   : > { %5206 = vmatpush2.bf16.msra.mxu1 %v8240_v1  ;;  %5166 = vmatprep.subr.bf16.mxu0 %v8245_v8  ;;  %v8314_v1 = vld [vmem:[%s9586_s26 + $0xfac] ss:$40 sps:$4 sm:$0xff]   ;;  %v8312_v8 = vld [vmem:[%s9586_s26 + $0xfa8] ss:$40 sps:$4 sm:$0xff]  }
 0x21c   : > { %5207 = vmatprep.subr.bf16.mxu1 %v8248_v4  ;;  %v8315_v4 = vld [vmem:[%s9586_s26 + $0xa58] ss:$40 sps:$4 sm:$0xff]  }
 0x21e   : > { %5167 = vmatpush2.bf16.msra.mxu0 %v8243_v2  ;;  %v8317_v2 = vld [vmem:[%s9586_s26 + $0xa5c] ss:$40 sps:$4 sm:$0xff]  }
 0x21f   : > { %5208 = vmatpush2.bf16.msra.mxu1 %v8246_v5  ;;  %5168 = vmatprep.subr.bf16.mxu0 %v8251_v6  ;;  %v8320_v5 = vld [vmem:[%s9586_s26 + $0xf5c] ss:$40 sps:$4 sm:$0xff]   ;;  %v8318_v6 = vld [vmem:[%s9586_s26 + $0xf58] ss:$40 sps:$4 sm:$0xff]  }
 0x220   : > { %5209 = vmatprep.subr.bf16.mxu1 %v8254_v17  ;;  %v8321_v17 = vld [vmem:[%s9586_s26 + $0xa08] ss:$40 sps:$4 sm:$0xff]  }
 0x222   : > { %5169 = vmatpush2.bf16.msra.mxu0 %v8249_v16  ;;  %v8323_v16 = vld [vmem:[%s9586_s26 + $0xa0c] ss:$40 sps:$4 sm:$0xff]  }
 0x223   : > { %5210 = vmatpush2.bf16.msra.mxu1 %v8252_v15  ;;  %5170 = vmatprep.subr.bf16.mxu0 %v8257_v3  ;;  %v8326_v15 = vld [vmem:[%s9586_s26 + $0xf0c] ss:$40 sps:$4 sm:$0xff]   ;;  %v8324_v3 = vld [vmem:[%s9586_s26 + $0xf08] ss:$40 sps:$4 sm:$0xff]  }
 0x224   : > { %5211 = vmatprep.subr.bf16.mxu1 %v8260_v19  ;;  %v8327_v19 = vld [vmem:[%s9586_s26 + $0xeb8] ss:$40 sps:$4 sm:$0xff]  }
 0x226   : > { %5171 = vmatpush2.bf16.msra.mxu0 %v8255_v18  ;;  %v8329_v18 = vld [vmem:[%s9586_s26 + $0xebc] ss:$40 sps:$4 sm:$0xff]  }
 0x227   : > { %5212 = vmatpush2.bf16.msra.mxu1 %v8258_v20  ;;  %5172 = vmatprep.subr.bf16.mxu0 %v8263_v22  ;;  %v8332_v20 = vld [vmem:[%s9586_s26 + $0x13bc] ss:$40 sps:$4 sm:$0xff]   ;;  %v8330_v22 = vld [vmem:[%s9586_s26 + $0x13b8] ss:$40 sps:$4 sm:$0xff]  }
 0x228   : > { %5213 = vmatprep.subr.bf16.mxu1 %v8266_v24  ;;  %v8333_v24 = vld [vmem:[%s9586_s26 + $0xe68] ss:$40 sps:$4 sm:$0xff]  }
 0x22a   : > { %5173 = vmatpush2.bf16.msra.mxu0 %v8261_v23  ;;  %v8335_v23 = vld [vmem:[%s9586_s26 + $0xe6c] ss:$40 sps:$4 sm:$0xff]  }
 0x22b   : > { %5214 = vmatpush2.bf16.msra.mxu1 %v8264_v25  ;;  %5174 = vmatprep.subr.bf16.mxu0 %v8269_v26  ;;  %v8338_v25 = vld [vmem:[%s9586_s26 + $0x136c] ss:$40 sps:$4 sm:$0xff]   ;;  %v8336_v26 = vld [vmem:[%s9586_s26 + $0x1368] ss:$40 sps:$4 sm:$0xff]  }
 0x22c   : > { %5215 = vmatprep.subr.bf16.mxu1 %v8272_v29  ;;  %v8339_v29 = vld [vmem:[%s9586_s26 + $0xe18] ss:$40 sps:$4 sm:$0xff]  }
 0x22e   : > { %5175 = vmatpush2.bf16.msra.mxu0 %v8267_v27  ;;  %v8341_v27 = vld [vmem:[%s9586_s26 + $0xe1c] ss:$40 sps:$4 sm:$0xff]  }
 0x22f   : > { %5216 = vmatpush2.bf16.msra.mxu1 %v8270_v30  ;;  %5176 = vmatprep.subr.bf16.mxu0 %v8275_v31  ;;  %v8344_v30 = vld [vmem:[%s9586_s26 + $0x131c] ss:$40 sps:$4 sm:$0xff]   ;;  %v8342_v31 = vld [vmem:[%s9586_s26 + $0x1318] ss:$40 sps:$4 sm:$0xff]  }
 0x230   : > { %5217 = vmatprep.subr.bf16.mxu1 %v8278_v34  ;;  %v8345_v34 = vld [vmem:[%s9586_s26 + $0xdc8] ss:$40 sps:$4 sm:$0xff]  }
 0x232   : > { %5177 = vmatpush2.bf16.msra.mxu0 %v8273_v33  ;;  %v8347_v33 = vld [vmem:[%s9586_s26 + $0xdcc] ss:$40 sps:$4 sm:$0xff]  }
 0x233   : > { %5218 = vmatpush2.bf16.msra.mxu1 %v8276_v35  ;;  %5228 = vmatprep.subr.bf16.mxu0 %v8281_v38  ;;  %v8350_v35 = vld [vmem:[%s9586_s26 + $0x12cc] ss:$40 sps:$4 sm:$0xff]   ;;  %v8348_v38 = vld [vmem:[%s9586_s26 + $0x12c8] ss:$40 sps:$4 sm:$0xff]  }
 0x234   : > { %5269 = vmatprep.subr.bf16.mxu1 %v8284_v39  ;;  %v8353_v39 = vld [vmem:[%s9586_s26 + $0xd7c] ss:$40 sps:$4 sm:$0xff]  }
 0x235   : > { %5179 = vmatmul.mubr.bf16.vlgmr.msra.gmra.mxu0 %v9715_v40 }
 0x236   : > { %5220 = vmatmul.mubr.bf16.vlgmr.msra.gmra.mxu1 %v9710_v36  ;;  %5229 = vmatpush1.bf16.msra.mxu0 %v8279_v42  ;;  %v8351_v42 = vld [vmem:[%s9586_s26 + $0xd78] ss:$40 sps:$4 sm:$0xff]  }
 0x237   : > { %5260 = vmatprep.mubr.bf16.mxu0 %v9764_v28  ;;  %5270 = vmatpush1.bf16.msra.mxu1 %v8282_v9  ;;  %v8356_v9 = vld [vmem:[%s9586_s26 + $0x127c] ss:$40 sps:$4 sm:$0xff]  }
 0x238   : > { %5301 = vmatprep.mubr.bf16.mxu1 %v9768_v32  ;;  %5230 = vmatprep.subr.bf16.mxu0 %v8287_v43  ;;  %v8354_v43 = vld [vmem:[%s9586_s26 + $0x1278] ss:$40 sps:$4 sm:$0xff]  }
 0x239   : > { %5271 = vmatprep.subr.bf16.mxu1 %v8290_v46  ;;  %v8357_v46 = vld [vmem:[%s9586_s26 + $0xd28] ss:$40 sps:$4 sm:$0xff]  }
 0x23a   : > { %5231 = vmatpush1.bf16.msra.mxu0 %v8285_v44  ;;  %v8359_v44 = vld [vmem:[%s9586_s26 + $0xd2c] ss:$40 sps:$4 sm:$0xff]  }
 0x23b   : > { %5272 = vmatpush1.bf16.msra.mxu1 %v8288_v45  ;;  %5232 = vmatprep.subr.bf16.mxu0 %v8293_v47  ;;  %v8362_v45 = vld [vmem:[%s9586_s26 + $0x122c] ss:$40 sps:$4 sm:$0xff]   ;;  %v8360_v47 = vld [vmem:[%s9586_s26 + $0x1228] ss:$40 sps:$4 sm:$0xff]  }
 0x23c   : > { %5273 = vmatprep.subr.bf16.mxu1 %v8296_v48  ;;  %v8365_v48 = vld [vmem:[%s9586_s26 + $0xcdc] ss:$40 sps:$4 sm:$0xff]  }
 0x23e   : > { %5233 = vmatpush1.bf16.msra.mxu0 %v8291_v49  ;;  %v8368_v49 = vld [vmem:[%s9586_s26 + $0x11dc] ss:$40 sps:$4 sm:$0xff]  }
 0x23f   : > { %5274 = vmatpush1.bf16.msra.mxu1 %v8294_v51  ;;  %5234 = vmatprep.subr.bf16.mxu0 %v8299_v53  ;;  %v8363_v51 = vld [vmem:[%s9586_s26 + $0xcd8] ss:$40 sps:$4 sm:$0xff]  }
 0x240   : > { %5275 = vmatprep.subr.bf16.mxu1 %v8302_v54  ;;  %v8366_v53 = vld [vmem:[%s9586_s26 + $0x11d8] ss:$40 sps:$4 sm:$0xff]   ;;  %v8371_v54 = vld [vmem:[%s9586_s26 + $0xc8c] ss:$40 sps:$4 sm:$0xff]  }
 0x242   : > { %5235 = vmatpush1.bf16.msra.mxu0 %v8297_v55  ;;  %v8374_v55 = vld [vmem:[%s9586_s26 + $0x118c] ss:$40 sps:$4 sm:$0xff]  }
 0x243   : > { %5276 = vmatpush1.bf16.msra.mxu1 %v8300_v56  ;;  %5236 = vmatprep.subr.bf16.mxu0 %v8305_v57  ;;  %v8369_v56 = vld [vmem:[%s9586_s26 + $0xc88] ss:$40 sps:$4 sm:$0xff]  }
 0x244   : > { %5277 = vmatprep.subr.bf16.mxu1 %v8308_v60  ;;  %v8372_v57 = vld [vmem:[%s9586_s26 + $0x1188] ss:$40 sps:$4 sm:$0xff]  }
 0x245   : > { %v9951_v60 = vld [vmem:[%s9592_s30] sm:$0xff] }
 0x246   : > { %5237 = vmatpush1.bf16.msra.mxu0 %v8303_v59  ;;  %v8377_v59 = vld [vmem:[%s9586_s26 + $0x244] ss:$40 sps:$4 sm:$0xff]  }
 0x247   : > { %5278 = vmatpush1.bf16.msra.mxu1 %v8306_v62  ;;  %5238 = vmatprep.subr.bf16.mxu0 %v8311_v63  ;;  %v8380_v62 = vld [vmem:[%s9586_s26 + $0x744] ss:$40 sps:$4 sm:$0xff]   ;;  %v8375_v63 = vld [vmem:[%s9586_s26 + $0x240] ss:$40 sps:$4 sm:$0xff]  }
 0x248   : > { %5279 = vmatprep.subr.bf16.mxu1 %v8314_v1  ;;  %v8378_v1 = vld [vmem:[%s9586_s26 + $0x740] ss:$40 sps:$4 sm:$0xff]  }
 0x24a   : > { %5239 = vmatpush1.bf16.msra.mxu0 %v8309_v0  ;;  %v1735_v0 = vrot.slane %v9951_v60, %v9690_v10 }
 0x24b   : > { %5280 = vmatpush1.bf16.msra.mxu1 %v8312_v8  ;;  %5240 = vmatprep.subr.bf16.mxu0 %v8317_v2  ;;  %v1739_v8 = vrot.slane %v9951_v60, %v9694_v12  ;;  %v8383_v2 = vld [vmem:[%s9586_s26 + $0x1f4] ss:$40 sps:$4 sm:$0xff]  }
 0x24c   : > { %5281 = vmatprep.subr.bf16.mxu1 %v8320_v5  ;;  %v8386_v5 = vld [vmem:[%s9586_s26 + $0x6f4] ss:$40 sps:$4 sm:$0xff]  }
 0x24e   : > { %5241 = vmatpush1.bf16.msra.mxu0 %v8315_v4 }
 0x24f   : > { %5282 = vmatpush1.bf16.msra.mxu1 %v8318_v6  ;;  %5242 = vmatprep.subr.bf16.mxu0 %v8323_v16 }
 0x250   : > { %5283 = vmatprep.subr.bf16.mxu1 %v8326_v15 }
 0x252   : > { %5243 = vmatpush1.bf16.msra.mxu0 %v8321_v17  ;;  %v8381_v17 = vld [vmem:[%s9586_s26 + $0x1f0] ss:$40 sps:$4 sm:$0xff]  }
 0x253   : > { %5284 = vmatpush1.bf16.msra.mxu1 %v8324_v3  ;;  %5244 = vmatprep.subr.bf16.mxu0 %v8329_v18  ;;  %v8384_v3 = vld [vmem:[%s9586_s26 + $0x6f0] ss:$40 sps:$4 sm:$0xff]   ;;  %v8389_v18 = vld [vmem:[%s9586_s26 + $0x1a4] ss:$40 sps:$4 sm:$0xff]  }
 0x254   : > { %5285 = vmatprep.subr.bf16.mxu1 %v8332_v20 }
 0x256   : > { %5245 = vmatpush2.bf16.msra.mxu0 %v8327_v19 }
 0x257   : > { %5286 = vmatpush2.bf16.msra.mxu1 %v8330_v22  ;;  %5246 = vmatprep.subr.bf16.mxu0 %v8335_v23  ;;  %v8392_v23 = vld [vmem:[%s9586_s26 + $0x6a4] ss:$40 sps:$4 sm:$0xff]  }
 0x258   : > { %5287 = vmatprep.subr.bf16.mxu1 %v8338_v25 }
 0x25a   : > { %5247 = vmatpush2.bf16.msra.mxu0 %v8333_v24 }
 0x25b   : > { %5288 = vmatpush2.bf16.msra.mxu1 %v8336_v26  ;;  %5248 = vmatprep.subr.bf16.mxu0 %v8341_v27  ;;  %v8387_v27 = vld [vmem:[%s9586_s26 + $0x1a0] ss:$40 sps:$4 sm:$0xff]  }
 0x25c   : > { %5289 = vmatprep.subr.bf16.mxu1 %v8344_v30  ;;  %v8390_v30 = vld [vmem:[%s9586_s26 + $0x6a0] ss:$40 sps:$4 sm:$0xff]  }
 0x25e   : > { %5249 = vmatpush2.bf16.msra.mxu0 %v8339_v29 }
 0x25f   : > { %5290 = vmatpush2.bf16.msra.mxu1 %v8342_v31  ;;  %5250 = vmatprep.subr.bf16.mxu0 %v8347_v33  ;;  %v8395_v31 = vld [vmem:[%s9586_s26 + $0x154] ss:$40 sps:$4 sm:$0xff]  }
 0x260   : > { %5291 = vmatprep.subr.bf16.mxu1 %v8350_v35  ;;  %v8393_v35 = vld [vmem:[%s9586_s26 + $0x150] ss:$40 sps:$4 sm:$0xff]  }
 0x262   : > { %5251 = vmatpush2.bf16.msra.mxu0 %v8345_v34  ;;  %v8398_v34 = vld [vmem:[%s9586_s26 + $0x654] ss:$40 sps:$4 sm:$0xff]  }
 0x263   : > { %5292 = vmatpush2.bf16.msra.mxu1 %v8348_v38  ;;  %5252 = vmatprep.subr.bf16.mxu0 %v8353_v39  ;;  %v8396_v38 = vld [vmem:[%s9586_s26 + $0x650] ss:$40 sps:$4 sm:$0xff]   ;;  %v8401_v39 = vld [vmem:[%s9586_s26 + $0x104] ss:$40 sps:$4 sm:$0xff]  }
 0x264   : > { %5293 = vmatprep.subr.bf16.mxu1 %v8356_v9  ;;  %v8399_v9 = vld [vmem:[%s9586_s26 + $0x100] ss:$40 sps:$4 sm:$0xff]  }
 0x266   : > { %5253 = vmatpush2.bf16.msra.mxu0 %v8351_v42  ;;  %v8404_v42 = vld [vmem:[%s9586_s26 + $0x604] ss:$40 sps:$4 sm:$0xff]  }
 0x267   : > { %5294 = vmatpush2.bf16.msra.mxu1 %v8354_v43  ;;  %5254 = vmatprep.subr.bf16.mxu0 %v8359_v44  ;;  %v8402_v43 = vld [vmem:[%s9586_s26 + $0x600] ss:$40 sps:$4 sm:$0xff]   ;;  %v8407_v44 = vld [vmem:[%s9586_s26 + $0xb4] ss:$40 sps:$4 sm:$0xff]  }
 0x268   : > { %5295 = vmatprep.subr.bf16.mxu1 %v8362_v45  ;;  %v8410_v45 = vld [vmem:[%s9586_s26 + $0x5b4] ss:$40 sps:$4 sm:$0xff]  }
 0x26a   : > { %5255 = vmatpush2.bf16.msra.mxu0 %v8357_v46  ;;  %v8405_v46 = vld [vmem:[%s9586_s26 + $0xb0] ss:$40 sps:$4 sm:$0xff]  }
 0x26b   : > { %5296 = vmatpush2.bf16.msra.mxu1 %v8360_v47  ;;  %5256 = vmatprep.subr.bf16.mxu0 %v8365_v48  ;;  %v8408_v47 = vld [vmem:[%s9586_s26 + $0x5b0] ss:$40 sps:$4 sm:$0xff]   ;;  %v8413_v48 = vld [vmem:[%s9586_s26 + $0x64] ss:$40 sps:$4 sm:$0xff]  }
 0x26c   : > { %5297 = vmatprep.subr.bf16.mxu1 %v8368_v49  ;;  %v8416_v49 = vld [vmem:[%s9586_s26 + $0x564] ss:$40 sps:$4 sm:$0xff]  }
 0x26e   : > { %5257 = vmatpush2.bf16.msra.mxu0 %v8363_v51  ;;  %v8411_v51 = vld [vmem:[%s9586_s26 + $0x60] ss:$40 sps:$4 sm:$0xff]  }
 0x26f   : > { %5298 = vmatpush2.bf16.msra.mxu1 %v8366_v53  ;;  %5258 = vmatprep.subr.bf16.mxu0 %v8371_v54  ;;  %v8414_v53 = vld [vmem:[%s9586_s26 + $0x560] ss:$40 sps:$4 sm:$0xff]   ;;  %v8419_v54 = vld [vmem:[%s9586_s26 + $0x14] ss:$40 sps:$4 sm:$0xff]  }
 0x270   : > { %5299 = vmatprep.subr.bf16.mxu1 %v8374_v55  ;;  %v8422_v55 = vld [vmem:[%s9586_s26 + $0x514] ss:$40 sps:$4 sm:$0xff]  }
 0x272   : > { %5259 = vmatpush2.bf16.msra.mxu0 %v8369_v56  ;;  %v8417_v56 = vld [vmem:[%s9586_s26 + $0x10] ss:$40 sps:$4 sm:$0xff]  }
 0x273   : > { %5300 = vmatpush2.bf16.msra.mxu1 %v8372_v57  ;;  %5310 = vmatprep.subr.bf16.mxu0 %v8377_v59  ;;  %v8420_v57 = vld [vmem:[%s9586_s26 + $0x510] ss:$40 sps:$4 sm:$0xff]   ;;  %v8425_v59 = vld [vmem:[%s9586_s26 + $0x4c4] ss:$40 sps:$4 sm:$0xff]  }
 0x274   : > { %5351 = vmatprep.subr.bf16.mxu1 %v8380_v62  ;;  %v8428_v62 = vld [vmem:[%s9586_s26 + $0x9c4] ss:$40 sps:$4 sm:$0xff]  }
 0x275   : > { %5261 = vmatmul.mubr.bf16.vlgmr.msra.gmra.mxu0 %v9816_v21  ;;  %v5016_v4 = vpop.f32.mrf.mxu0  ;;  %v5057_v16 = vpop.f32.mrf.mxu1 }
 0x276   : > { %5302 = vmatmul.mubr.bf16.vlgmr.msra.gmra.mxu1 %v9813_v13  ;;  %v5017_v6 = vadd.f32 %v5016_v4, %v1735_v0  ;;  %5311 = vmatpush1.bf16.msra.mxu0 %v8375_v63  ;;  %v8423_v63 = vld [vmem:[%s9586_s26 + $0x4c0] ss:$40 sps:$4 sm:$0xff]   ;;  %v8432_v4 = vld [vmem:[%s9586_s26 + $0x970] ss:$40 sps:$4 sm:$0xff]  }
 0x277   : > { %5342 = vmatprep.mubr.bf16.mxu0 %v9712_v37  ;;  %5352 = vmatpush1.bf16.msra.mxu1 %v8378_v1  ;;  %v5018_v15 = vpop.f32.mrf.mxu0  ;;  %v5059_v22 = vpop.f32.mrf.mxu1  ;;  %v8426_v0 = vld [vmem:[%s9586_s26 + $0x9c0] ss:$40 sps:$4 sm:$0xff]   ;;  %v8431_v1 = vld [vmem:[%s9586_s26 + $0x474] ss:$40 sps:$4 sm:$0xff]  }
 0x278   : > { %v9968_v19 = vadd.f32 %v5057_v16, %v5017_v6  ;;  %5383 = vmatprep.mubr.bf16.mxu1 %v9717_v41  ;;  %v5019_v20 = vadd.f32 %v5018_v15, %v1739_v8  ;;  %5312 = vmatprep.subr.bf16.mxu0 %v8383_v2  ;;  %v8434_v8 = vld [vmem:[%s9586_s26 + $0x974] ss:$40 sps:$4 sm:$0xff]   ;;  %v8429_v2 = vld [vmem:[%s9586_s26 + $0x470] ss:$40 sps:$4 sm:$0xff]   ;;  %v8440_v6 = vld [vmem:[%s9586_s26 + $0x924] ss:$40 sps:$4 sm:$0xff]  }
 0x279   : > { %5353 = vmatprep.subr.bf16.mxu1 %v8386_v5  ;;  %v5020_v24 = vpop.f32.mrf.mxu0  ;;  %v5061_v26 = vpop.f32.mrf.mxu1  ;;  %v8437_v5 = vld [vmem:[%s9586_s26 + $0x424] ss:$40 sps:$4 sm:$0xff]   ;;  %v8435_v16 = vld [vmem:[%s9586_s26 + $0x420] ss:$40 sps:$4 sm:$0xff]   ;;  %v8443_v15 = vld [vmem:[%s9586_s26 + $0x3d4] ss:$40 sps:$4 sm:$0xff]  }
 0x27a   : > { %v9972_v25 = vadd.f32 %v5059_v22, %v5019_v20  ;;  %5313 = vmatpush1.bf16.msra.mxu0 %v8381_v17  ;;  %v8438_v17 = vld [vmem:[%s9586_s26 + $0x920] ss:$40 sps:$4 sm:$0xff]   ;;  %v8444_v20 = vld [vmem:[%s9586_s26 + $0x8d0] ss:$40 sps:$4 sm:$0xff]   ;;  %v8449_v22 = vld [vmem:[%s9586_s26 + $0x384] ss:$40 sps:$4 sm:$0xff]  }
 0x27b   : > { %5354 = vmatpush1.bf16.msra.mxu1 %v8384_v3  ;;  %v5021_v29 = vpop.f32.mrf.mxu0  ;;  %5314 = vmatprep.subr.bf16.mxu0 %v8389_v18  ;;  %v5062_v33 = vpop.f32.mrf.mxu1  ;;  %v8446_v3 = vld [vmem:[%s9586_s26 + $0x8d4] ss:$40 sps:$4 sm:$0xff]   ;;  %v8441_v18 = vld [vmem:[%s9586_s26 + $0x3d0] ss:$40 sps:$4 sm:$0xff]   ;;  %v8447_v24 = vld [vmem:[%s9586_s26 + $0x380] ss:$40 sps:$4 sm:$0xff]  }
 0x27c   : > { %5355 = vmatprep.subr.bf16.mxu1 %v8392_v23  ;;  %v8452_v23 = vld [vmem:[%s9586_s26 + $0x884] ss:$40 sps:$4 sm:$0xff]   ;;  %v8450_v26 = vld [vmem:[%s9586_s26 + $0x880] ss:$40 sps:$4 sm:$0xff]   ;;  %v8458_v29 = vld [vmem:[%s9586_s26 + $0x834] ss:$40 sps:$4 sm:$0xff]  }
 0x27d   : > { %v8461_v33 = vld [vmem:[%s9586_s26 + $0x2e4] ss:$40 sps:$4 sm:$0xff]  }
 0x27e   : > { %5315 = vmatpush1.bf16.msra.mxu0 %v8387_v27  ;;  %v8455_v27 = vld [vmem:[%s9586_s26 + $0x334] ss:$40 sps:$4 sm:$0xff]  }
 0x27f   : > { %5356 = vmatpush1.bf16.msra.mxu1 %v8390_v30  ;;  %5316 = vmatprep.subr.bf16.mxu0 %v8395_v31  ;;  %v8453_v30 = vld [vmem:[%s9586_s26 + $0x330] ss:$40 sps:$4 sm:$0xff]  }
 0x280   : > { %5357 = vmatprep.subr.bf16.mxu1 %v8398_v34  ;;  %v8456_v31 = vld [vmem:[%s9586_s26 + $0x830] ss:$40 sps:$4 sm:$0xff]   ;;  %v8464_v34 = vld [vmem:[%s9586_s26 + $0x7e4] ss:$40 sps:$4 sm:$0xff]  }
 0x282   : > { %5317 = vmatpush1.bf16.msra.mxu0 %v8393_v35  ;;  %v8459_v35 = vld [vmem:[%s9586_s26 + $0x2e0] ss:$40 sps:$4 sm:$0xff]  }
 0x283   : > { %5358 = vmatpush1.bf16.msra.mxu1 %v8396_v38  ;;  %5318 = vmatprep.subr.bf16.mxu0 %v8401_v39  ;;  %v8462_v38 = vld [vmem:[%s9586_s26 + $0x7e0] ss:$40 sps:$4 sm:$0xff]   ;;  %v8467_v39 = vld [vmem:[%s9586_s26 + $0x294] ss:$40 sps:$4 sm:$0xff]  }
 0x284   : > { %5359 = vmatprep.subr.bf16.mxu1 %v8404_v42  ;;  %v8470_v42 = vld [vmem:[%s9586_s26 + $0x794] ss:$40 sps:$4 sm:$0xff]  }
 0x286   : > { %5319 = vmatpush1.bf16.msra.mxu0 %v8399_v9  ;;  %v8465_v9 = vld [vmem:[%s9586_s26 + $0x290] ss:$40 sps:$4 sm:$0xff]  }
 0x287   : > { %5360 = vmatpush1.bf16.msra.mxu1 %v8402_v43  ;;  %5320 = vmatprep.subr.bf16.mxu0 %v8407_v44  ;;  %v8468_v43 = vld [vmem:[%s9586_s26 + $0x790] ss:$40 sps:$4 sm:$0xff]   ;;  %v8473_v44 = vld [vmem:[%s9586_s26 + $0xc44] ss:$40 sps:$4 sm:$0xff]  }
 0x288   : > { %5361 = vmatprep.subr.bf16.mxu1 %v8410_v45  ;;  %v8476_v45 = vld [vmem:[%s9586_s26 + $0x1144] ss:$40 sps:$4 sm:$0xff]  }
 0x28a   : > { %5321 = vmatpush1.bf16.msra.mxu0 %v8405_v46  ;;  %v8471_v46 = vld [vmem:[%s9586_s26 + $0xc40] ss:$40 sps:$4 sm:$0xff]  }
 0x28b   : > { %5362 = vmatpush1.bf16.msra.mxu1 %v8408_v47  ;;  %5322 = vmatprep.subr.bf16.mxu0 %v8413_v48  ;;  %v8474_v47 = vld [vmem:[%s9586_s26 + $0x1140] ss:$40 sps:$4 sm:$0xff]   ;;  %v8479_v48 = vld [vmem:[%s9586_s26 + $0xbf4] ss:$40 sps:$4 sm:$0xff]  }
 0x28c   : > { %5363 = vmatprep.subr.bf16.mxu1 %v8416_v49 }
 0x28e   : > { %5323 = vmatpush1.bf16.msra.mxu0 %v8411_v51  ;;  %v8482_v51 = vld [vmem:[%s9586_s26 + $0x10f4] ss:$40 sps:$4 sm:$0xff]  }
 0x28f   : > { %5364 = vmatpush1.bf16.msra.mxu1 %v8414_v53  ;;  %5324 = vmatprep.subr.bf16.mxu0 %v8419_v54 }
 0x290   : > { %5365 = vmatprep.subr.bf16.mxu1 %v8422_v55  ;;  %v8477_v55 = vld [vmem:[%s9586_s26 + $0xbf0] ss:$40 sps:$4 sm:$0xff]  }
 0x292   : > { %5325 = vmatpush1.bf16.msra.mxu0 %v8417_v56 }
 0x293   : > { %5366 = vmatpush1.bf16.msra.mxu1 %v8420_v57  ;;  %5326 = vmatprep.subr.bf16.mxu0 %v8425_v59  ;;  %v8480_v57 = vld [vmem:[%s9586_s26 + $0x10f0] ss:$40 sps:$4 sm:$0xff]   ;;  %v8485_v59 = vld [vmem:[%s9586_s26 + $0xba4] ss:$40 sps:$4 sm:$0xff]  }
 0x294   : > { %5367 = vmatprep.subr.bf16.mxu1 %v8428_v62 }
 0x296   : > { %5327 = vmatpush2.bf16.msra.mxu0 %v8423_v63 }
 0x297   : > { %5368 = vmatpush2.bf16.msra.mxu1 %v8426_v0  ;;  %5328 = vmatprep.subr.bf16.mxu0 %v8431_v1  ;;  %v8488_v0 = vld [vmem:[%s9586_s26 + $0x10a4] ss:$40 sps:$4 sm:$0xff]  }
 0x298   : > { %5369 = vmatprep.subr.bf16.mxu1 %v8434_v8 }
 0x29a   : > { %5329 = vmatpush2.bf16.msra.mxu0 %v8429_v2 }
 0x29b   : > { %5370 = vmatpush2.bf16.msra.mxu1 %v8432_v4  ;;  %5330 = vmatprep.subr.bf16.mxu0 %v8437_v5  ;;  %v8483_v4 = vld [vmem:[%s9586_s26 + $0xba0] ss:$40 sps:$4 sm:$0xff]  }
 0x29c   : > { %5371 = vmatprep.subr.bf16.mxu1 %v8440_v6  ;;  %v8491_v6 = vld [vmem:[%s9586_s26 + $0xb54] ss:$40 sps:$4 sm:$0xff]  }
 0x29e   : > { %5331 = vmatpush2.bf16.msra.mxu0 %v8435_v16 }
 0x29f   : > { %5372 = vmatpush2.bf16.msra.mxu1 %v8438_v17  ;;  %5332 = vmatprep.subr.bf16.mxu0 %v8443_v15  ;;  %v8494_v17 = vld [vmem:[%s9586_s26 + $0x1054] ss:$40 sps:$4 sm:$0xff]   ;;  %v8489_v15 = vld [vmem:[%s9586_s26 + $0xb50] ss:$40 sps:$4 sm:$0xff]  }
 0x2a0   : > { %5373 = vmatprep.subr.bf16.mxu1 %v8446_v3  ;;  %v8492_v3 = vld [vmem:[%s9586_s26 + $0x1050] ss:$40 sps:$4 sm:$0xff]  }
 0x2a2   : > { %5333 = vmatpush2.bf16.msra.mxu0 %v8441_v18  ;;  %v8497_v18 = vld [vmem:[%s9586_s26 + $0xb04] ss:$40 sps:$4 sm:$0xff]  }
 0x2a3   : > { %5374 = vmatpush2.bf16.msra.mxu1 %v8444_v20  ;;  %5334 = vmatprep.subr.bf16.mxu0 %v8449_v22  ;;  %v8500_v20 = vld [vmem:[%s9586_s26 + $0x1004] ss:$40 sps:$4 sm:$0xff]   ;;  %v8495_v22 = vld [vmem:[%s9586_s26 + $0xb00] ss:$40 sps:$4 sm:$0xff]  }
 0x2a4   : > { %5375 = vmatprep.subr.bf16.mxu1 %v8452_v23  ;;  %v8498_v23 = vld [vmem:[%s9586_s26 + $0x1000] ss:$40 sps:$4 sm:$0xff]  }
 0x2a6   : > { %5335 = vmatpush2.bf16.msra.mxu0 %v8447_v24  ;;  %v8503_v24 = vld [vmem:[%s9586_s26 + $0xab4] ss:$40 sps:$4 sm:$0xff]  }
 0x2a7   : > { %5376 = vmatpush2.bf16.msra.mxu1 %v8450_v26  ;;  %5336 = vmatprep.subr.bf16.mxu0 %v8455_v27  ;;  %v8506_v26 = vld [vmem:[%s9586_s26 + $0xfb4] ss:$40 sps:$4 sm:$0xff]   ;;  %v8501_v27 = vld [vmem:[%s9586_s26 + $0xab0] ss:$40 sps:$4 sm:$0xff]  }
 0x2a8   : > { %5377 = vmatprep.subr.bf16.mxu1 %v8458_v29  ;;  %v8504_v29 = vld [vmem:[%s9586_s26 + $0xfb0] ss:$40 sps:$4 sm:$0xff]  }
 0x2aa   : > { %5337 = vmatpush2.bf16.msra.mxu0 %v8453_v30  ;;  %v8509_v30 = vld [vmem:[%s9586_s26 + $0xa64] ss:$40 sps:$4 sm:$0xff]  }
 0x2ab   : > { %5378 = vmatpush2.bf16.msra.mxu1 %v8456_v31  ;;  %5338 = vmatprep.subr.bf16.mxu0 %v8461_v33  ;;  %v8512_v31 = vld [vmem:[%s9586_s26 + $0xf64] ss:$40 sps:$4 sm:$0xff]   ;;  %v8507_v33 = vld [vmem:[%s9586_s26 + $0xa60] ss:$40 sps:$4 sm:$0xff]  }
 0x2ac   : > { %5379 = vmatprep.subr.bf16.mxu1 %v8464_v34  ;;  %v8510_v34 = vld [vmem:[%s9586_s26 + $0xf60] ss:$40 sps:$4 sm:$0xff]  }
 0x2ae   : > { %5339 = vmatpush2.bf16.msra.mxu0 %v8459_v35  ;;  %v8515_v35 = vld [vmem:[%s9586_s26 + $0xa14] ss:$40 sps:$4 sm:$0xff]  }
 0x2af   : > { %5380 = vmatpush2.bf16.msra.mxu1 %v8462_v38  ;;  %5340 = vmatprep.subr.bf16.mxu0 %v8467_v39  ;;  %v8518_v38 = vld [vmem:[%s9586_s26 + $0xf14] ss:$40 sps:$4 sm:$0xff]   ;;  %v8513_v39 = vld [vmem:[%s9586_s26 + $0xa10] ss:$40 sps:$4 sm:$0xff]  }
 0x2b0   : > { %5381 = vmatprep.subr.bf16.mxu1 %v8470_v42  ;;  %v8516_v42 = vld [vmem:[%s9586_s26 + $0xf10] ss:$40 sps:$4 sm:$0xff]  }
 0x2b2   : > { %5341 = vmatpush2.bf16.msra.mxu0 %v8465_v9  ;;  %v8521_v9 = vld [vmem:[%s9586_s26 + $0xec4] ss:$40 sps:$4 sm:$0xff]  }
 0x2b3   : > { %5382 = vmatpush2.bf16.msra.mxu1 %v8468_v43  ;;  %5392 = vmatprep.subr.bf16.mxu0 %v8473_v44  ;;  %v8524_v43 = vld [vmem:[%s9586_s26 + $0x13c4] ss:$40 sps:$4 sm:$0xff]   ;;  %v8519_v44 = vld [vmem:[%s9586_s26 + $0xec0] ss:$40 sps:$4 sm:$0xff]  }
 0x2b4   : > { %5433 = vmatprep.subr.bf16.mxu1 %v8476_v45  ;;  %v8522_v45 = vld [vmem:[%s9586_s26 + $0x13c0] ss:$40 sps:$4 sm:$0xff]  }
 0x2b5   : > { %v5098_v49 = vpop.f32.mrf.mxu0  ;;  %5343 = vmatmul.mubr.bf16.vlgmr.msra.gmra.mxu0 %v9715_v40  ;;  %v5139_v54 = vpop.f32.mrf.mxu1 }
 0x2b6   : > { %v5099_v53 = vadd.f32 %v5098_v49, %v9968_v19  ;;  %5384 = vmatmul.mubr.bf16.vlgmr.msra.gmra.mxu1 %v9710_v36  ;;  %5393 = vmatpush1.bf16.msra.mxu0 %v8471_v46  ;;  %v8527_v46 = vld [vmem:[%s9586_s26 + $0xe74] ss:$40 sps:$4 sm:$0xff]   ;;  %v8528_v49 = vld [vmem:[%s9586_s26 + $0x1370] ss:$40 sps:$4 sm:$0xff]  }
 0x2b7   : > { %5424 = vmatprep.mubr.bf16.mxu0 %v9764_v28  ;;  %5434 = vmatpush1.bf16.msra.mxu1 %v8474_v47  ;;  %v5100_v56 = vpop.f32.mrf.mxu0  ;;  %v5141_v63 = vpop.f32.mrf.mxu1  ;;  %v8530_v47 = vld [vmem:[%s9586_s26 + $0x1374] ss:$40 sps:$4 sm:$0xff]  }
 0x2b8   : > { %v10041_v62 = vadd.f32 %v5139_v54, %v5099_v53  ;;  %5465 = vmatprep.mubr.bf16.mxu1 %v9768_v32  ;;  %v5101_v19 = vadd.f32 %v5100_v56, %v9972_v25  ;;  %5394 = vmatprep.subr.bf16.mxu0 %v8479_v48  ;;  %v8486_v25 = vld [vmem:[%s9586_s26 + $0x10a0] ss:$40 sps:$4 sm:$0xff]   ;;  %v8525_v48 = vld [vmem:[%s9586_s26 + $0xe70] ss:$40 sps:$4 sm:$0xff]   ;;  %v8536_v53 = vld [vmem:[%s9586_s26 + $0x1324] ss:$40 sps:$4 sm:$0xff]  }
 0x2b9   : > { %v5102_v1 = vpop.f32.mrf.mxu0  ;;  %5435 = vmatprep.subr.bf16.mxu1 %v8482_v51  ;;  %v5143_v2 = vpop.f32.mrf.mxu1  ;;  %v8533_v51 = vld [vmem:[%s9586_s26 + $0xe24] ss:$40 sps:$4 sm:$0xff]   ;;  %v8531_v54 = vld [vmem:[%s9586_s26 + $0xe20] ss:$40 sps:$4 sm:$0xff]   ;;  %v8539_v56 = vld [vmem:[%s9586_s26 + $0xdd4] ss:$40 sps:$4 sm:$0xff]  }
 0x2ba   : > { %v10046_v8 = vadd.f32 %v5141_v63, %v5101_v19  ;;  %5395 = vmatpush1.bf16.msra.mxu0 %v8477_v55  ;;  %v8534_v55 = vld [vmem:[%s9586_s26 + $0x1320] ss:$40 sps:$4 sm:$0xff]   ;;  %v8540_v19 = vld [vmem:[%s9586_s26 + $0x12d0] ss:$40 sps:$4 sm:$0xff]   ;;  %v8545_v63 = vld [vmem:[%s9586_s26 + $0xd84] ss:$40 sps:$4 sm:$0xff]  }
 0x2bb   : > { %5436 = vmatpush1.bf16.msra.mxu1 %v8480_v57  ;;  %v5103_v5 = vpop.f32.mrf.mxu0  ;;  %5396 = vmatprep.subr.bf16.mxu0 %v8485_v59  ;;  %v5144_v16 = vpop.f32.mrf.mxu1  ;;  %v8542_v57 = vld [vmem:[%s9586_s26 + $0x12d4] ss:$40 sps:$4 sm:$0xff]   ;;  %v8537_v59 = vld [vmem:[%s9586_s26 + $0xdd0] ss:$40 sps:$4 sm:$0xff]   ;;  %v8543_v1 = vld [vmem:[%s9586_s26 + $0xd80] ss:$40 sps:$4 sm:$0xff]  }
 0x2bc   : > { %5437 = vmatprep.subr.bf16.mxu1 %v8488_v0  ;;  %v8548_v0 = vld [vmem:[%s9586_s26 + $0x1284] ss:$40 sps:$4 sm:$0xff]   ;;  %v8546_v2 = vld [vmem:[%s9586_s26 + $0x1280] ss:$40 sps:$4 sm:$0xff]   ;;  %v8554_v5 = vld [vmem:[%s9586_s26 + $0x1234] ss:$40 sps:$4 sm:$0xff]  }
 0x2bd   : > { %v8557_v16 = vld [vmem:[%s9586_s26 + $0xce4] ss:$40 sps:$4 sm:$0xff]  }
 0x2be   : > { %5397 = vmatpush1.bf16.msra.mxu0 %v8483_v4  ;;  %v8551_v4 = vld [vmem:[%s9586_s26 + $0xd34] ss:$40 sps:$4 sm:$0xff]  }
 0x2bf   : > { %5438 = vmatpush1.bf16.msra.mxu1 %v8486_v25  ;;  %5398 = vmatprep.subr.bf16.mxu0 %v8491_v6  ;;  %v8549_v25 = vld [vmem:[%s9586_s26 + $0xd30] ss:$40 sps:$4 sm:$0xff]  }
 0x2c0   : > { %5439 = vmatprep.subr.bf16.mxu1 %v8494_v17  ;;  %v8552_v6 = vld [vmem:[%s9586_s26 + $0x1230] ss:$40 sps:$4 sm:$0xff]   ;;  %v8560_v17 = vld [vmem:[%s9586_s26 + $0x11e4] ss:$40 sps:$4 sm:$0xff]  }
 0x2c2   : > { %5399 = vmatpush1.bf16.msra.mxu0 %v8489_v15  ;;  %v8555_v15 = vld [vmem:[%s9586_s26 + $0xce0] ss:$40 sps:$4 sm:$0xff]  }
 0x2c3   : > { %5440 = vmatpush1.bf16.msra.mxu1 %v8492_v3  ;;  %5400 = vmatprep.subr.bf16.mxu0 %v8497_v18  ;;  %v8558_v3 = vld [vmem:[%s9586_s26 + $0x11e0] ss:$40 sps:$4 sm:$0xff]   ;;  %v8563_v18 = vld [vmem:[%s9586_s26 + $0xc94] ss:$40 sps:$4 sm:$0xff]  }
 0x2c4   : > { %5441 = vmatprep.subr.bf16.mxu1 %v8500_v20  ;;  %v8566_v20 = vld [vmem:[%s9586_s26 + $0x1194] ss:$40 sps:$4 sm:$0xff]  }
 0x2c6   : > { %5401 = vmatpush1.bf16.msra.mxu0 %v8495_v22  ;;  %v8561_v22 = vld [vmem:[%s9586_s26 + $0xc90] ss:$40 sps:$4 sm:$0xff]  }
 0x2c7   : > { %5442 = vmatpush1.bf16.msra.mxu1 %v8498_v23  ;;  %5402 = vmatprep.subr.bf16.mxu0 %v8503_v24  ;;  %v8564_v23 = vld [vmem:[%s9586_s26 + $0x1190] ss:$40 sps:$4 sm:$0xff]   ;;  %v8569_v24 = vld [vmem:[%s9586_s26 + $0x24c] ss:$40 sps:$4 sm:$0xff]  }
 0x2c8   : > { %5443 = vmatprep.subr.bf16.mxu1 %v8506_v26  ;;  %v8572_v26 = vld [vmem:[%s9586_s26 + $0x74c] ss:$40 sps:$4 sm:$0xff]  }
 0x2ca   : > { %5403 = vmatpush1.bf16.msra.mxu0 %v8501_v27  ;;  %v1743_v27 = vrot.slane %v9951_v60, %v558_v11  ;;  %v8573_v11 = vld [vmem:[%s9586_s26 + $0x1f8] ss:$40 sps:$4 sm:$0xff]  }
 0x2cb   : > { %5444 = vmatpush1.bf16.msra.mxu1 %v8504_v29  ;;  %5404 = vmatprep.subr.bf16.mxu0 %v8509_v30  ;;  %v8567_v29 = vld [vmem:[%s9586_s26 + $0x248] ss:$40 sps:$4 sm:$0xff]  }
 0x2cc   : > { %5445 = vmatprep.subr.bf16.mxu1 %v8512_v31  ;;  %v8570_v30 = vld [vmem:[%s9586_s26 + $0x748] ss:$40 sps:$4 sm:$0xff]   ;;  %v1747_v31 = vrot.slane %v9951_v60, %v562_v14 }
 0x2ce   : > { %5405 = vmatpush1.bf16.msra.mxu0 %v8507_v33  ;;  %v8575_v33 = vld [vmem:[%s9586_s26 + $0x1fc] ss:$40 sps:$4 sm:$0xff]  }
 0x2cf   : > { %5446 = vmatpush1.bf16.msra.mxu1 %v8510_v34  ;;  %5406 = vmatprep.subr.bf16.mxu0 %v8515_v35  ;;  %v8578_v35 = vld [vmem:[%s9586_s26 + $0x6fc] ss:$40 sps:$4 sm:$0xff]  }
 0x2d0   : > { %5447 = vmatprep.subr.bf16.mxu1 %v8518_v38 }
 0x2d2   : > { %5407 = vmatpush1.bf16.msra.mxu0 %v8513_v39 }
 0x2d3   : > { %5448 = vmatpush1.bf16.msra.mxu1 %v8516_v42  ;;  %5408 = vmatprep.subr.bf16.mxu0 %v8521_v9  ;;  %v8576_v9 = vld [vmem:[%s9586_s26 + $0x6f8] ss:$40 sps:$4 sm:$0xff]  }
 0x2d4   : > { %5449 = vmatprep.subr.bf16.mxu1 %v8524_v43  ;;  %v8581_v43 = vld [vmem:[%s9586_s26 + $0x1ac] ss:$40 sps:$4 sm:$0xff]  }
 0x2d6   : > { %5409 = vmatpush2.bf16.msra.mxu0 %v8519_v44 }
 0x2d7   : > { %5450 = vmatpush2.bf16.msra.mxu1 %v8522_v45  ;;  %5410 = vmatprep.subr.bf16.mxu0 %v8527_v46  ;;  %v8584_v45 = vld [vmem:[%s9586_s26 + $0x6ac] ss:$40 sps:$4 sm:$0xff]  }
 0x2d8   : > { %5451 = vmatprep.subr.bf16.mxu1 %v8530_v47 }
 0x2da   : > { %5411 = vmatpush2.bf16.msra.mxu0 %v8525_v48 }
 0x2db   : > { %5452 = vmatpush2.bf16.msra.mxu1 %v8528_v49  ;;  %5412 = vmatprep.subr.bf16.mxu0 %v8533_v51  ;;  %v8579_v49 = vld [vmem:[%s9586_s26 + $0x1a8] ss:$40 sps:$4 sm:$0xff]  }
 0x2dc   : > { %5453 = vmatprep.subr.bf16.mxu1 %v8536_v53  ;;  %v8582_v53 = vld [vmem:[%s9586_s26 + $0x6a8] ss:$40 sps:$4 sm:$0xff]  }
 0x2de   : > { %5413 = vmatpush2.bf16.msra.mxu0 %v8531_v54  ;;  %v8587_v54 = vld [vmem:[%s9586_s26 + $0x15c] ss:$40 sps:$4 sm:$0xff]  }
 0x2df   : > { %5454 = vmatpush2.bf16.msra.mxu1 %v8534_v55  ;;  %5414 = vmatprep.subr.bf16.mxu0 %v8539_v56  ;;  %v8590_v56 = vld [vmem:[%s9586_s26 + $0x65c] ss:$40 sps:$4 sm:$0xff]  }
 0x2e0   : > { %5455 = vmatprep.subr.bf16.mxu1 %v8542_v57  ;;  %v8585_v57 = vld [vmem:[%s9586_s26 + $0x158] ss:$40 sps:$4 sm:$0xff]  }
 0x2e2   : > { %5415 = vmatpush2.bf16.msra.mxu0 %v8537_v59  ;;  %v8588_v59 = vld [vmem:[%s9586_s26 + $0x658] ss:$40 sps:$4 sm:$0xff]  }
 0x2e3   : > { %5456 = vmatpush2.bf16.msra.mxu1 %v8540_v19  ;;  %5416 = vmatprep.subr.bf16.mxu0 %v8545_v63  ;;  %v8593_v19 = vld [vmem:[%s9586_s26 + $0x10c] ss:$40 sps:$4 sm:$0xff]  }
 0x2e4   : > { %5457 = vmatprep.subr.bf16.mxu1 %v8548_v0  ;;  %v8596_v63 = vld [vmem:[%s9586_s26 + $0x60c] ss:$40 sps:$4 sm:$0xff]   ;;  %v8591_v0 = vld [vmem:[%s9586_s26 + $0x108] ss:$40 sps:$4 sm:$0xff]  }
 0x2e6   : > { %5417 = vmatpush2.bf16.msra.mxu0 %v8543_v1  ;;  %v8594_v1 = vld [vmem:[%s9586_s26 + $0x608] ss:$40 sps:$4 sm:$0xff]  }
 0x2e7   : > { %5458 = vmatpush2.bf16.msra.mxu1 %v8546_v2  ;;  %5418 = vmatprep.subr.bf16.mxu0 %v8551_v4  ;;  %v8599_v2 = vld [vmem:[%s9586_s26 + $0xbc] ss:$40 sps:$4 sm:$0xff]  }
 0x2e8   : > { %5459 = vmatprep.subr.bf16.mxu1 %v8554_v5  ;;  %v8602_v4 = vld [vmem:[%s9586_s26 + $0x5bc] ss:$40 sps:$4 sm:$0xff]   ;;  %v8597_v5 = vld [vmem:[%s9586_s26 + $0xb8] ss:$40 sps:$4 sm:$0xff]  }
 0x2ea   : > { %5419 = vmatpush2.bf16.msra.mxu0 %v8549_v25  ;;  %v8600_v25 = vld [vmem:[%s9586_s26 + $0x5b8] ss:$40 sps:$4 sm:$0xff]  }
 0x2eb   : > { %5460 = vmatpush2.bf16.msra.mxu1 %v8552_v6  ;;  %5420 = vmatprep.subr.bf16.mxu0 %v8557_v16  ;;  %v8605_v6 = vld [vmem:[%s9586_s26 + $0x6c] ss:$40 sps:$4 sm:$0xff]  }
 0x2ec   : > { %5461 = vmatprep.subr.bf16.mxu1 %v8560_v17  ;;  %v8608_v16 = vld [vmem:[%s9586_s26 + $0x56c] ss:$40 sps:$4 sm:$0xff]   ;;  %v8603_v17 = vld [vmem:[%s9586_s26 + $0x68] ss:$40 sps:$4 sm:$0xff]  }
 0x2ee   : > { %5421 = vmatpush2.bf16.msra.mxu0 %v8555_v15  ;;  %v8606_v15 = vld [vmem:[%s9586_s26 + $0x568] ss:$40 sps:$4 sm:$0xff]  }
 0x2ef   : > { %5462 = vmatpush2.bf16.msra.mxu1 %v8558_v3  ;;  %5422 = vmatprep.subr.bf16.mxu0 %v8563_v18  ;;  %v8611_v3 = vld [vmem:[%s9586_s26 + $0x1c] ss:$40 sps:$4 sm:$0xff]  }
 0x2f0   : > { %5463 = vmatprep.subr.bf16.mxu1 %v8566_v20  ;;  %v8614_v18 = vld [vmem:[%s9586_s26 + $0x51c] ss:$40 sps:$4 sm:$0xff]   ;;  %v8609_v20 = vld [vmem:[%s9586_s26 + $0x18] ss:$40 sps:$4 sm:$0xff]  }
 0x2f2   : > { %5423 = vmatpush2.bf16.msra.mxu0 %v8561_v22  ;;  %v8612_v22 = vld [vmem:[%s9586_s26 + $0x518] ss:$40 sps:$4 sm:$0xff]  }
 0x2f3   : > { %5464 = vmatpush2.bf16.msra.mxu1 %v8564_v23  ;;  %5474 = vmatprep.subr.bf16.mxu0 %v8569_v24  ;;  %v8617_v23 = vld [vmem:[%s9586_s26 + $0x4cc] ss:$40 sps:$4 sm:$0xff]  }
 0x2f4   : > { %5515 = vmatprep.subr.bf16.mxu1 %v8572_v26  ;;  %v8620_v24 = vld [vmem:[%s9586_s26 + $0x9cc] ss:$40 sps:$4 sm:$0xff]   ;;  %v8615_v26 = vld [vmem:[%s9586_s26 + $0x4c8] ss:$40 sps:$4 sm:$0xff]  }
 0x2f5   : > { %v5180_v34 = vpop.f32.mrf.mxu0  ;;  %5425 = vmatmul.mubr.bf16.vlgmr.msra.gmra.mxu0 %v9816_v21 }
 0x2f6   : > { %v5181_v38 = vadd.f32 %v5180_v34, %v1743_v27  ;;  %v5221_v39 = vpop.f32.mrf.mxu1  ;;  %5466 = vmatmul.mubr.bf16.vlgmr.msra.gmra.mxu1 %v9813_v13  ;;  %5475 = vmatpush1.bf16.msra.mxu0 %v8567_v29  ;;  %v8618_v27 = vld [vmem:[%s9586_s26 + $0x9c8] ss:$40 sps:$4 sm:$0xff]   ;;  %v8623_v29 = vld [vmem:[%s9586_s26 + $0x47c] ss:$40 sps:$4 sm:$0xff]   ;;  %v8629_v34 = vld [vmem:[%s9586_s26 + $0x42c] ss:$40 sps:$4 sm:$0xff]  }
 0x2f7   : > { %5506 = vmatprep.mubr.bf16.mxu0 %v9712_v37  ;;  %5516 = vmatpush1.bf16.msra.mxu1 %v8570_v30  ;;  %v5182_v42 = vpop.f32.mrf.mxu0  ;;  %v8626_v30 = vld [vmem:[%s9586_s26 + $0x97c] ss:$40 sps:$4 sm:$0xff]  }
 0x2f8   : > { %v10120_v14 = vadd.f32 %v5221_v39, %v5181_v38  ;;  %5547 = vmatprep.mubr.bf16.mxu1 %v9717_v41  ;;  %v5183_v60 = vadd.f32 %v5182_v42, %v1747_v31  ;;  %v5223_v44 = vpop.f32.mrf.mxu1  ;;  %5476 = vmatprep.subr.bf16.mxu0 %v8575_v33  ;;  %v8621_v31 = vld [vmem:[%s9586_s26 + $0x478] ss:$40 sps:$4 sm:$0xff]   ;;  %v8627_v38 = vld [vmem:[%s9586_s26 + $0x428] ss:$40 sps:$4 sm:$0xff]   ;;  %v8638_v42 = vld [vmem:[%s9586_s26 + $0x8dc] ss:$40 sps:$4 sm:$0xff]  }
 0x2f9   : > { %v5184_v46 = vpop.f32.mrf.mxu0  ;;  %5517 = vmatprep.subr.bf16.mxu1 %v8578_v35  ;;  %v8624_v33 = vld [vmem:[%s9586_s26 + $0x978] ss:$40 sps:$4 sm:$0xff]   ;;  %v8632_v35 = vld [vmem:[%s9586_s26 + $0x92c] ss:$40 sps:$4 sm:$0xff]   ;;  %v8630_v39 = vld [vmem:[%s9586_s26 + $0x928] ss:$40 sps:$4 sm:$0xff]  }
 0x2fa   : > { %v10124_v47 = vadd.f32 %v5223_v44, %v5183_v60  ;;  %v5225_v48 = vpop.f32.mrf.mxu1  ;;  %5477 = vmatpush1.bf16.msra.mxu0 %v8573_v11  ;;  %v8635_v11 = vld [vmem:[%s9586_s26 + $0x3dc] ss:$40 sps:$4 sm:$0xff]   ;;  %v8641_v60 = vld [vmem:[%s9586_s26 + $0x38c] ss:$40 sps:$4 sm:$0xff]   ;;  %v8642_v46 = vld [vmem:[%s9586_s26 + $0x888] ss:$40 sps:$4 sm:$0xff]  }
 0x2fb   : > { %5518 = vmatpush1.bf16.msra.mxu1 %v8576_v9  ;;  %v5185_v51 = vpop.f32.mrf.mxu0  ;;  %5478 = vmatprep.subr.bf16.mxu0 %v8581_v43  ;;  %v8633_v9 = vld [vmem:[%s9586_s26 + $0x3d8] ss:$40 sps:$4 sm:$0xff]   ;;  %v8644_v44 = vld [vmem:[%s9586_s26 + $0x88c] ss:$40 sps:$4 sm:$0xff]   ;;  %v8647_v48 = vld [vmem:[%s9586_s26 + $0x33c] ss:$40 sps:$4 sm:$0xff]  }
 0x2fc   : > { %v5226_v55 = vpop.f32.mrf.mxu1  ;;  %5519 = vmatprep.subr.bf16.mxu1 %v8584_v45  ;;  %v8636_v43 = vld [vmem:[%s9586_s26 + $0x8d8] ss:$40 sps:$4 sm:$0xff]   ;;  %v8639_v45 = vld [vmem:[%s9586_s26 + $0x388] ss:$40 sps:$4 sm:$0xff]  }
 0x2fd   : > { %v8645_v51 = vld [vmem:[%s9586_s26 + $0x338] ss:$40 sps:$4 sm:$0xff]   ;;  %v8656_v55 = vld [vmem:[%s9586_s26 + $0x7ec] ss:$40 sps:$4 sm:$0xff]  }
 0x2fe   : > { %5479 = vmatpush1.bf16.msra.mxu0 %v8579_v49  ;;  %v8650_v49 = vld [vmem:[%s9586_s26 + $0x83c] ss:$40 sps:$4 sm:$0xff]  }
 0x2ff   : > { %5520 = vmatpush1.bf16.msra.mxu1 %v8582_v53  ;;  %5480 = vmatprep.subr.bf16.mxu0 %v8587_v54  ;;  %v8648_v53 = vld [vmem:[%s9586_s26 + $0x838] ss:$40 sps:$4 sm:$0xff]   ;;  %v8653_v54 = vld [vmem:[%s9586_s26 + $0x2ec] ss:$40 sps:$4 sm:$0xff]  }
 0x300   : > { %5521 = vmatprep.subr.bf16.mxu1 %v8590_v56  ;;  %v8651_v56 = vld [vmem:[%s9586_s26 + $0x2e8] ss:$40 sps:$4 sm:$0xff]  }
 0x302   : > { %5481 = vmatpush1.bf16.msra.mxu0 %v8585_v57  ;;  %v8654_v57 = vld [vmem:[%s9586_s26 + $0x7e8] ss:$40 sps:$4 sm:$0xff]  }
 0x303   : > { %5522 = vmatpush1.bf16.msra.mxu1 %v8588_v59  ;;  %5482 = vmatprep.subr.bf16.mxu0 %v8593_v19  ;;  %v8659_v59 = vld [vmem:[%s9586_s26 + $0x29c] ss:$40 sps:$4 sm:$0xff]  }
 0x304   : > { %5523 = vmatprep.subr.bf16.mxu1 %v8596_v63  ;;  %v8662_v19 = vld [vmem:[%s9586_s26 + $0x79c] ss:$40 sps:$4 sm:$0xff]   ;;  %v8657_v63 = vld [vmem:[%s9586_s26 + $0x298] ss:$40 sps:$4 sm:$0xff]  }
 0x306   : > { %5483 = vmatpush1.bf16.msra.mxu0 %v8591_v0  ;;  %v8660_v0 = vld [vmem:[%s9586_s26 + $0x798] ss:$40 sps:$4 sm:$0xff]  }
 0x307   : > { %5524 = vmatpush1.bf16.msra.mxu1 %v8594_v1  ;;  %5484 = vmatprep.subr.bf16.mxu0 %v8599_v2  ;;  %v8665_v1 = vld [vmem:[%s9586_s26 + $0xc4c] ss:$40 sps:$4 sm:$0xff]  }
 0x308   : > { %5525 = vmatprep.subr.bf16.mxu1 %v8602_v4  ;;  %v8668_v2 = vld [vmem:[%s9586_s26 + $0x114c] ss:$40 sps:$4 sm:$0xff]   ;;  %v8663_v4 = vld [vmem:[%s9586_s26 + $0xc48] ss:$40 sps:$4 sm:$0xff]  }
 0x30a   : > { %5485 = vmatpush1.bf16.msra.mxu0 %v8597_v5  ;;  %v8666_v5 = vld [vmem:[%s9586_s26 + $0x1148] ss:$40 sps:$4 sm:$0xff]  }
 0x30b   : > { %5526 = vmatpush1.bf16.msra.mxu1 %v8600_v25  ;;  %5486 = vmatprep.subr.bf16.mxu0 %v8605_v6  ;;  %v8671_v25 = vld [vmem:[%s9586_s26 + $0xbfc] ss:$40 sps:$4 sm:$0xff]  }
 0x30c   : > { %5527 = vmatprep.subr.bf16.mxu1 %v8608_v16  ;;  %v8674_v16 = vld [vmem:[%s9586_s26 + $0x10fc] ss:$40 sps:$4 sm:$0xff]  }
 0x30e   : > { %5487 = vmatpush1.bf16.msra.mxu0 %v8603_v17 }
 0x30f   : > { %5528 = vmatpush1.bf16.msra.mxu1 %v8606_v15  ;;  %5488 = vmatprep.subr.bf16.mxu0 %v8611_v3  ;;  %v8669_v3 = vld [vmem:[%s9586_s26 + $0xbf8] ss:$40 sps:$4 sm:$0xff]  }
 0x310   : > { %5529 = vmatprep.subr.bf16.mxu1 %v8614_v18 }
 0x312   : > { %5489 = vmatpush1.bf16.msra.mxu0 %v8609_v20  ;;  %v8672_v20 = vld [vmem:[%s9586_s26 + $0x10f8] ss:$40 sps:$4 sm:$0xff]  }
 0x313   : > { %5530 = vmatpush1.bf16.msra.mxu1 %v8612_v22  ;;  %5490 = vmatprep.subr.bf16.mxu0 %v8617_v23  ;;  %v8677_v22 = vld [vmem:[%s9586_s26 + $0xbac] ss:$40 sps:$4 sm:$0xff]  }
 0x314   : > { %5531 = vmatprep.subr.bf16.mxu1 %v8620_v24 }
 0x316   : > { %5491 = vmatpush2.bf16.msra.mxu0 %v8615_v26  ;;  %v8680_v26 = vld [vmem:[%s9586_s26 + $0x10ac] ss:$40 sps:$4 sm:$0xff]  }
 0x317   : > { %5532 = vmatpush2.bf16.msra.mxu1 %v8618_v27  ;;  %5492 = vmatprep.subr.bf16.mxu0 %v8623_v29 }
 0x318   : > { %5533 = vmatprep.subr.bf16.mxu1 %v8626_v30 }
 0x31a   : > { %5493 = vmatpush2.bf16.msra.mxu0 %v8621_v31  ;;  %v8675_v31 = vld [vmem:[%s9586_s26 + $0xba8] ss:$40 sps:$4 sm:$0xff]  }
 0x31b   : > { %5534 = vmatpush2.bf16.msra.mxu1 %v8624_v33  ;;  %5494 = vmatprep.subr.bf16.mxu0 %v8629_v34  ;;  %v8683_v34 = vld [vmem:[%s9586_s26 + $0xb5c] ss:$40 sps:$4 sm:$0xff]  }
 0x31c   : > { %5535 = vmatprep.subr.bf16.mxu1 %v8632_v35 }
 0x31e   : > { %5495 = vmatpush2.bf16.msra.mxu0 %v8627_v38  ;;  %v8686_v38 = vld [vmem:[%s9586_s26 + $0x105c] ss:$40 sps:$4 sm:$0xff]  }
 0x31f   : > { %5536 = vmatpush2.bf16.msra.mxu1 %v8630_v39  ;;  %5496 = vmatprep.subr.bf16.mxu0 %v8635_v11  ;;  %v8681_v39 = vld [vmem:[%s9586_s26 + $0xb58] ss:$40 sps:$4 sm:$0xff]  }
 0x320   : > { %5537 = vmatprep.subr.bf16.mxu1 %v8638_v42  ;;  %v8684_v11 = vld [vmem:[%s9586_s26 + $0x1058] ss:$40 sps:$4 sm:$0xff]   ;;  %v8689_v42 = vld [vmem:[%s9586_s26 + $0xb0c] ss:$40 sps:$4 sm:$0xff]  }
 0x322   : > { %5497 = vmatpush2.bf16.msra.mxu0 %v8633_v9  ;;  %v8692_v9 = vld [vmem:[%s9586_s26 + $0x100c] ss:$40 sps:$4 sm:$0xff]  }
 0x323   : > { %5538 = vmatpush2.bf16.msra.mxu1 %v8636_v43  ;;  %5498 = vmatprep.subr.bf16.mxu0 %v8641_v60  ;;  %v8687_v43 = vld [vmem:[%s9586_s26 + $0xb08] ss:$40 sps:$4 sm:$0xff]  }
 0x324   : > { %5539 = vmatprep.subr.bf16.mxu1 %v8644_v44  ;;  %v8690_v60 = vld [vmem:[%s9586_s26 + $0x1008] ss:$40 sps:$4 sm:$0xff]   ;;  %v8695_v44 = vld [vmem:[%s9586_s26 + $0xabc] ss:$40 sps:$4 sm:$0xff]  }
 0x326   : > { %5499 = vmatpush2.bf16.msra.mxu0 %v8639_v45  ;;  %v8698_v45 = vld [vmem:[%s9586_s26 + $0xfbc] ss:$40 sps:$4 sm:$0xff]  }
 0x327   : > { %5540 = vmatpush2.bf16.msra.mxu1 %v8642_v46  ;;  %5500 = vmatprep.subr.bf16.mxu0 %v8647_v48  ;;  %v8693_v46 = vld [vmem:[%s9586_s26 + $0xab8] ss:$40 sps:$4 sm:$0xff]  }
 0x328   : > { %5541 = vmatprep.subr.bf16.mxu1 %v8650_v49  ;;  %v8696_v48 = vld [vmem:[%s9586_s26 + $0xfb8] ss:$40 sps:$4 sm:$0xff]   ;;  %v8701_v49 = vld [vmem:[%s9586_s26 + $0xa6c] ss:$40 sps:$4 sm:$0xff]  }
 0x32a   : > { %5501 = vmatpush2.bf16.msra.mxu0 %v8645_v51  ;;  %v8704_v51 = vld [vmem:[%s9586_s26 + $0xf6c] ss:$40 sps:$4 sm:$0xff]  }
 0x32b   : > { %5542 = vmatpush2.bf16.msra.mxu1 %v8648_v53  ;;  %5502 = vmatprep.subr.bf16.mxu0 %v8653_v54  ;;  %v8699_v53 = vld [vmem:[%s9586_s26 + $0xa68] ss:$40 sps:$4 sm:$0xff]  }
 0x32c   : > { %5543 = vmatprep.subr.bf16.mxu1 %v8656_v55  ;;  %v8702_v54 = vld [vmem:[%s9586_s26 + $0xf68] ss:$40 sps:$4 sm:$0xff]   ;;  %v8707_v55 = vld [vmem:[%s9586_s26 + $0xa1c] ss:$40 sps:$4 sm:$0xff]  }
 0x32e   : > { %5503 = vmatpush2.bf16.msra.mxu0 %v8651_v56  ;;  %v8710_v56 = vld [vmem:[%s9586_s26 + $0xf1c] ss:$40 sps:$4 sm:$0xff]  }
 0x32f   : > { %5544 = vmatpush2.bf16.msra.mxu1 %v8654_v57  ;;  %5504 = vmatprep.subr.bf16.mxu0 %v8659_v59  ;;  %v8705_v57 = vld [vmem:[%s9586_s26 + $0xa18] ss:$40 sps:$4 sm:$0xff]  }
 0x330   : > { %5545 = vmatprep.subr.bf16.mxu1 %v8662_v19  ;;  %v8708_v59 = vld [vmem:[%s9586_s26 + $0xf18] ss:$40 sps:$4 sm:$0xff]   ;;  %v8713_v19 = vld [vmem:[%s9586_s26 + $0xecc] ss:$40 sps:$4 sm:$0xff]  }
 0x332   : > { %5505 = vmatpush2.bf16.msra.mxu0 %v8657_v63  ;;  %v8716_v63 = vld [vmem:[%s9586_s26 + $0x13cc] ss:$40 sps:$4 sm:$0xff]  }
 0x333   : > { %5546 = vmatpush2.bf16.msra.mxu1 %v8660_v0  ;;  %5556 = vmatprep.subr.bf16.mxu0 %v8665_v1  ;;  %v8711_v0 = vld [vmem:[%s9586_s26 + $0xec8] ss:$40 sps:$4 sm:$0xff]  }
 0x334   : > { %5597 = vmatprep.subr.bf16.mxu1 %v8668_v2  ;;  %v8714_v1 = vld [vmem:[%s9586_s26 + $0x13c8] ss:$40 sps:$4 sm:$0xff]   ;;  %v8719_v2 = vld [vmem:[%s9586_s26 + $0xe7c] ss:$40 sps:$4 sm:$0xff]  }
 0x335   : > { %v5262_v6 = vpop.f32.mrf.mxu0  ;;  %5507 = vmatmul.mubr.bf16.vlgmr.msra.gmra.mxu0 %v9715_v40 }
 0x336   : > { %v5263_v17 = vadd.f32 %v5262_v6, %v10120_v14  ;;  %v5303_v15 = vpop.f32.mrf.mxu1  ;;  %5548 = vmatmul.mubr.bf16.vlgmr.msra.gmra.mxu1 %v9710_v36  ;;  %5557 = vmatpush1.bf16.msra.mxu0 %v8663_v4  ;;  %v8722_v4 = vld [vmem:[%s9586_s26 + $0x137c] ss:$40 sps:$4 sm:$0xff]   ;;  %v8725_v6 = vld [vmem:[%s9586_s26 + $0xe2c] ss:$40 sps:$4 sm:$0xff]  }
 0x337   : > { %5588 = vmatprep.mubr.bf16.mxu0 %v9764_v28  ;;  %5598 = vmatpush1.bf16.msra.mxu1 %v8666_v5  ;;  %v5264_v18 = vpop.f32.mrf.mxu0  ;;  %v8717_v5 = vld [vmem:[%s9586_s26 + $0xe78] ss:$40 sps:$4 sm:$0xff]  }
 0x338   : > { %v10193_v23 = vadd.f32 %v5303_v15, %v5263_v17  ;;  %5629 = vmatprep.mubr.bf16.mxu1 %v9768_v32  ;;  %v5265_v14 = vadd.f32 %v5264_v18, %v10124_v47  ;;  %v5305_v24 = vpop.f32.mrf.mxu1  ;;  %5558 = vmatprep.subr.bf16.mxu0 %v8671_v25  ;;  %v8678_v47 = vld [vmem:[%s9586_s26 + $0x10a8] ss:$40 sps:$4 sm:$0xff]   ;;  %v8720_v25 = vld [vmem:[%s9586_s26 + $0x1378] ss:$40 sps:$4 sm:$0xff]   ;;  %v8734_v18 = vld [vmem:[%s9586_s26 + $0x12dc] ss:$40 sps:$4 sm:$0xff]  }
 0x339   : > { %v5266_v27 = vpop.f32.mrf.mxu0  ;;  %5599 = vmatprep.subr.bf16.mxu1 %v8674_v16  ;;  %v8728_v16 = vld [vmem:[%s9586_s26 + $0x132c] ss:$40 sps:$4 sm:$0xff]   ;;  %v8723_v17 = vld [vmem:[%s9586_s26 + $0xe28] ss:$40 sps:$4 sm:$0xff]  }
 0x33a   : > { %v10198_v29 = vadd.f32 %v5305_v24, %v5265_v14  ;;  %v5307_v30 = vpop.f32.mrf.mxu1  ;;  %5559 = vmatpush1.bf16.msra.mxu0 %v8669_v3  ;;  %v8726_v15 = vld [vmem:[%s9586_s26 + $0x1328] ss:$40 sps:$4 sm:$0xff]   ;;  %v8731_v3 = vld [vmem:[%s9586_s26 + $0xddc] ss:$40 sps:$4 sm:$0xff]   ;;  %v8737_v14 = vld [vmem:[%s9586_s26 + $0xd8c] ss:$40 sps:$4 sm:$0xff]  }
 0x33b   : > { %5600 = vmatpush1.bf16.msra.mxu1 %v8672_v20  ;;  %v5267_v33 = vpop.f32.mrf.mxu0  ;;  %5560 = vmatprep.subr.bf16.mxu0 %v8677_v22  ;;  %v8729_v20 = vld [vmem:[%s9586_s26 + $0xdd8] ss:$40 sps:$4 sm:$0xff]   ;;  %v8740_v24 = vld [vmem:[%s9586_s26 + $0x128c] ss:$40 sps:$4 sm:$0xff]   ;;  %v8738_v27 = vld [vmem:[%s9586_s26 + $0x1288] ss:$40 sps:$4 sm:$0xff]  }
 0x33c   : > { %v5308_v35 = vpop.f32.mrf.mxu1  ;;  %5601 = vmatprep.subr.bf16.mxu1 %v8680_v26  ;;  %v8732_v22 = vld [vmem:[%s9586_s26 + $0x12d8] ss:$40 sps:$4 sm:$0xff]   ;;  %v8735_v26 = vld [vmem:[%s9586_s26 + $0xd88] ss:$40 sps:$4 sm:$0xff]   ;;  %v8743_v30 = vld [vmem:[%s9586_s26 + $0xd3c] ss:$40 sps:$4 sm:$0xff]  }
 0x33d   : > { %v8741_v33 = vld [vmem:[%s9586_s26 + $0xd38] ss:$40 sps:$4 sm:$0xff]   ;;  %v8752_v35 = vld [vmem:[%s9586_s26 + $0x11ec] ss:$40 sps:$4 sm:$0xff]  }
 0x33e   : > { %5561 = vmatpush1.bf16.msra.mxu0 %v8675_v31  ;;  %v8746_v31 = vld [vmem:[%s9586_s26 + $0x123c] ss:$40 sps:$4 sm:$0xff]  }
 0x33f   : > { %5602 = vmatpush1.bf16.msra.mxu1 %v8678_v47  ;;  %5562 = vmatprep.subr.bf16.mxu0 %v8683_v34  ;;  %v8744_v47 = vld [vmem:[%s9586_s26 + $0x1238] ss:$40 sps:$4 sm:$0xff]   ;;  %v8749_v34 = vld [vmem:[%s9586_s26 + $0xcec] ss:$40 sps:$4 sm:$0xff]  }
 0x340   : > { %5603 = vmatprep.subr.bf16.mxu1 %v8686_v38  ;;  %v8747_v38 = vld [vmem:[%s9586_s26 + $0xce8] ss:$40 sps:$4 sm:$0xff]  }
 0x342   : > { %5563 = vmatpush1.bf16.msra.mxu0 %v8681_v39  ;;  %v8750_v39 = vld [vmem:[%s9586_s26 + $0x11e8] ss:$40 sps:$4 sm:$0xff]  }
 0x343   : > { %5604 = vmatpush1.bf16.msra.mxu1 %v8684_v11  ;;  %5564 = vmatprep.subr.bf16.mxu0 %v8689_v42  ;;  %v8755_v11 = vld [vmem:[%s9586_s26 + $0xc9c] ss:$40 sps:$4 sm:$0xff]  }
 0x344   : > { %5605 = vmatprep.subr.bf16.mxu1 %v8692_v9  ;;  %v8758_v42 = vld [vmem:[%s9586_s26 + $0x119c] ss:$40 sps:$4 sm:$0xff]   ;;  %v8753_v9 = vld [vmem:[%s9586_s26 + $0xc98] ss:$40 sps:$4 sm:$0xff]  }
 0x346   : > { %5565 = vmatpush1.bf16.msra.mxu0 %v8687_v43  ;;  %v8756_v43 = vld [vmem:[%s9586_s26 + $0x1198] ss:$40 sps:$4 sm:$0xff]  }
 0x347   : > { %5606 = vmatpush1.bf16.msra.mxu1 %v8690_v60  ;;  %5566 = vmatprep.subr.bf16.mxu0 %v8695_v44  ;;  %v8761_v60 = vld [vmem:[%s9586_s26 + $0x254] ss:$40 sps:$4 sm:$0xff]  }
 0x348   : > { %5607 = vmatprep.subr.bf16.mxu1 %v8698_v45  ;;  %v8764_v44 = vld [vmem:[%s9586_s26 + $0x754] ss:$40 sps:$4 sm:$0xff]   ;;  %v10257_v45 = vld [vmem:[%s9592_s30] sm:$0xff] }
 0x34a   : > { %5567 = vmatpush1.bf16.msra.mxu0 %v8693_v46  ;;  %v1751_v46 = vrot.slane %v10257_v45, %v566_v52  ;;  %v8765_v52 = vld [vmem:[%s9586_s26 + $0x200] ss:$40 sps:$4 sm:$0xff]  }
 0x34b   : > { %5608 = vmatpush1.bf16.msra.mxu1 %v8696_v48  ;;  %5568 = vmatprep.subr.bf16.mxu0 %v8701_v49  ;;  %v8759_v48 = vld [vmem:[%s9586_s26 + $0x250] ss:$40 sps:$4 sm:$0xff]  }
 0x34c   : > { %5609 = vmatprep.subr.bf16.mxu1 %v8704_v51  ;;  %v8762_v49 = vld [vmem:[%s9586_s26 + $0x750] ss:$40 sps:$4 sm:$0xff]   ;;  %v1755_v51 = vrot.slane %v10257_v45, %v570_v58 }
 0x34e   : > { %5569 = vmatpush1.bf16.msra.mxu0 %v8699_v53  ;;  %v8767_v53 = vld [vmem:[%s9586_s26 + $0x204] ss:$40 sps:$4 sm:$0xff]  }
 0x34f   : > { %5610 = vmatpush1.bf16.msra.mxu1 %v8702_v54  ;;  %5570 = vmatprep.subr.bf16.mxu0 %v8707_v55  ;;  %v8770_v55 = vld [vmem:[%s9586_s26 + $0x704] ss:$40 sps:$4 sm:$0xff]  }
 0x350   : > { %5611 = vmatprep.subr.bf16.mxu1 %v8710_v56 }
 0x352   : > { %5571 = vmatpush1.bf16.msra.mxu0 %v8705_v57 }
 0x353   : > { %5612 = vmatpush1.bf16.msra.mxu1 %v8708_v59  ;;  %5572 = vmatprep.subr.bf16.mxu0 %v8713_v19  ;;  %v8768_v19 = vld [vmem:[%s9586_s26 + $0x700] ss:$40 sps:$4 sm:$0xff]  }
 0x354   : > { %5613 = vmatprep.subr.bf16.mxu1 %v8716_v63  ;;  %v8773_v63 = vld [vmem:[%s9586_s26 + $0x1b4] ss:$40 sps:$4 sm:$0xff]  }
 0x356   : > { %5573 = vmatpush2.bf16.msra.mxu0 %v8711_v0 }
 0x357   : > { %5614 = vmatpush2.bf16.msra.mxu1 %v8714_v1  ;;  %5574 = vmatprep.subr.bf16.mxu0 %v8719_v2  ;;  %v8776_v2 = vld [vmem:[%s9586_s26 + $0x6b4] ss:$40 sps:$4 sm:$0xff]  }
 0x358   : > { %5615 = vmatprep.subr.bf16.mxu1 %v8722_v4 }
 0x35a   : > { %5575 = vmatpush2.bf16.msra.mxu0 %v8717_v5 }
 0x35b   : > { %5616 = vmatpush2.bf16.msra.mxu1 %v8720_v25  ;;  %5576 = vmatprep.subr.bf16.mxu0 %v8725_v6  ;;  %v8771_v25 = vld [vmem:[%s9586_s26 + $0x1b0] ss:$40 sps:$4 sm:$0xff]  }
 0x35c   : > { %5617 = vmatprep.subr.bf16.mxu1 %v8728_v16  ;;  %v8779_v16 = vld [vmem:[%s9586_s26 + $0x164] ss:$40 sps:$4 sm:$0xff]  }
 0x35e   : > { %5577 = vmatpush2.bf16.msra.mxu0 %v8723_v17 }
 0x35f   : > { %5618 = vmatpush2.bf16.msra.mxu1 %v8726_v15  ;;  %5578 = vmatprep.subr.bf16.mxu0 %v8731_v3  ;;  %v8782_v15 = vld [vmem:[%s9586_s26 + $0x664] ss:$40 sps:$4 sm:$0xff]   ;;  %v8777_v3 = vld [vmem:[%s9586_s26 + $0x160] ss:$40 sps:$4 sm:$0xff]  }
 0x360   : > { %5619 = vmatprep.subr.bf16.mxu1 %v8734_v18  ;;  %v8780_v18 = vld [vmem:[%s9586_s26 + $0x660] ss:$40 sps:$4 sm:$0xff]  }
 0x362   : > { %5579 = vmatpush2.bf16.msra.mxu0 %v8729_v20  ;;  %v8785_v20 = vld [vmem:[%s9586_s26 + $0x114] ss:$40 sps:$4 sm:$0xff]  }
 0x363   : > { %5620 = vmatpush2.bf16.msra.mxu1 %v8732_v22  ;;  %5580 = vmatprep.subr.bf16.mxu0 %v8737_v14  ;;  %v8788_v22 = vld [vmem:[%s9586_s26 + $0x614] ss:$40 sps:$4 sm:$0xff]   ;;  %v8783_v14 = vld [vmem:[%s9586_s26 + $0x110] ss:$40 sps:$4 sm:$0xff]  }
 0x364   : > { %5621 = vmatprep.subr.bf16.mxu1 %v8740_v24  ;;  %v8786_v24 = vld [vmem:[%s9586_s26 + $0x610] ss:$40 sps:$4 sm:$0xff]  }
 0x366   : > { %5581 = vmatpush2.bf16.msra.mxu0 %v8735_v26  ;;  %v8791_v26 = vld [vmem:[%s9586_s26 + $0xc4] ss:$40 sps:$4 sm:$0xff]  }
 0x367   : > { %5622 = vmatpush2.bf16.msra.mxu1 %v8738_v27  ;;  %5582 = vmatprep.subr.bf16.mxu0 %v8743_v30  ;;  %v8794_v27 = vld [vmem:[%s9586_s26 + $0x5c4] ss:$40 sps:$4 sm:$0xff]   ;;  %v8789_v30 = vld [vmem:[%s9586_s26 + $0xc0] ss:$40 sps:$4 sm:$0xff]  }
 0x368   : > { %5623 = vmatprep.subr.bf16.mxu1 %v8746_v31  ;;  %v8792_v31 = vld [vmem:[%s9586_s26 + $0x5c0] ss:$40 sps:$4 sm:$0xff]  }
 0x36a   : > { %5583 = vmatpush2.bf16.msra.mxu0 %v8741_v33  ;;  %v8797_v33 = vld [vmem:[%s9586_s26 + $0x74] ss:$40 sps:$4 sm:$0xff]  }
 0x36b   : > { %5624 = vmatpush2.bf16.msra.mxu1 %v8744_v47  ;;  %5584 = vmatprep.subr.bf16.mxu0 %v8749_v34  ;;  %v8800_v47 = vld [vmem:[%s9586_s26 + $0x574] ss:$40 sps:$4 sm:$0xff]   ;;  %v8795_v34 = vld [vmem:[%s9586_s26 + $0x70] ss:$40 sps:$4 sm:$0xff]  }
 0x36c   : > { %5625 = vmatprep.subr.bf16.mxu1 %v8752_v35  ;;  %v8798_v35 = vld [vmem:[%s9586_s26 + $0x570] ss:$40 sps:$4 sm:$0xff]  }
 0x36e   : > { %5585 = vmatpush2.bf16.msra.mxu0 %v8747_v38  ;;  %v8803_v38 = vld [vmem:[%s9586_s26 + $0x24] ss:$40 sps:$4 sm:$0xff]  }
 0x36f   : > { %5626 = vmatpush2.bf16.msra.mxu1 %v8750_v39  ;;  %5586 = vmatprep.subr.bf16.mxu0 %v8755_v11  ;;  %v8806_v39 = vld [vmem:[%s9586_s26 + $0x524] ss:$40 sps:$4 sm:$0xff]   ;;  %v8801_v11 = vld [vmem:[%s9586_s26 + $0x20] ss:$40 sps:$4 sm:$0xff]  }
 0x370   : > { %5627 = vmatprep.subr.bf16.mxu1 %v8758_v42  ;;  %v8804_v42 = vld [vmem:[%s9586_s26 + $0x520] ss:$40 sps:$4 sm:$0xff]  }
 0x372   : > { %5587 = vmatpush2.bf16.msra.mxu0 %v8753_v9  ;;  %v8809_v9 = vld [vmem:[%s9586_s26 + $0x4d4] ss:$40 sps:$4 sm:$0xff]  }
 0x373   : > { %5628 = vmatpush2.bf16.msra.mxu1 %v8756_v43  ;;  %5638 = vmatprep.subr.bf16.mxu0 %v8761_v60  ;;  %v8812_v43 = vld [vmem:[%s9586_s26 + $0x9d4] ss:$40 sps:$4 sm:$0xff]   ;;  %v8807_v60 = vld [vmem:[%s9586_s26 + $0x4d0] ss:$40 sps:$4 sm:$0xff]  }
 0x374   : > { %5679 = vmatprep.subr.bf16.mxu1 %v8764_v44  ;;  %v8810_v44 = vld [vmem:[%s9586_s26 + $0x9d0] ss:$40 sps:$4 sm:$0xff]  }
 0x375   : > { %v5344_v54 = vpop.f32.mrf.mxu0  ;;  %5589 = vmatmul.mubr.bf16.vlgmr.msra.gmra.mxu0 %v9816_v21 }
 0x376   : > { %v5345_v56 = vadd.f32 %v5344_v54, %v1751_v46  ;;  %v5385_v57 = vpop.f32.mrf.mxu1  ;;  %5630 = vmatmul.mubr.bf16.vlgmr.msra.gmra.mxu1 %v9813_v13  ;;  %5639 = vmatpush1.bf16.msra.mxu0 %v8759_v48  ;;  %v8815_v46 = vld [vmem:[%s9586_s26 + $0x484] ss:$40 sps:$4 sm:$0xff]   ;;  %v8824_v54 = vld [vmem:[%s9586_s26 + $0x934] ss:$40 sps:$4 sm:$0xff]  }
 0x377   : > { %5670 = vmatprep.mubr.bf16.mxu0 %v9712_v37  ;;  %5680 = vmatpush1.bf16.msra.mxu1 %v8762_v49  ;;  %v5346_v59 = vpop.f32.mrf.mxu0  ;;  %v8818_v48 = vld [vmem:[%s9586_s26 + $0x984] ss:$40 sps:$4 sm:$0xff]   ;;  %v8813_v49 = vld [vmem:[%s9586_s26 + $0x480] ss:$40 sps:$4 sm:$0xff]  }
 0x378   : > { %v10275_v58 = vadd.f32 %v5385_v57, %v5345_v56  ;;  %5711 = vmatprep.mubr.bf16.mxu1 %v9717_v41  ;;  %v5347_v0 = vadd.f32 %v5346_v59, %v1755_v51  ;;  %v5387_v1 = vpop.f32.mrf.mxu1  ;;  %5640 = vmatprep.subr.bf16.mxu0 %v8767_v53  ;;  %v8774_v41 = vld [vmem:[%s9586_s26 + $0x6b0] ss:$40 sps:$4 sm:$0xff]   ;;  %v8816_v51 = vld [vmem:[%s9586_s26 + $0x980] ss:$40 sps:$4 sm:$0xff]   ;;  %v8821_v53 = vld [vmem:[%s9586_s26 + $0x434] ss:$40 sps:$4 sm:$0xff]  }
 0x379   : > { %v5348_v4 = vpop.f32.mrf.mxu0  ;;  %5681 = vmatprep.subr.bf16.mxu1 %v8770_v55  ;;  %v8819_v55 = vld [vmem:[%s9586_s26 + $0x430] ss:$40 sps:$4 sm:$0xff]   ;;  %v8827_v57 = vld [vmem:[%s9586_s26 + $0x3e4] ss:$40 sps:$4 sm:$0xff]   ;;  %v8825_v59 = vld [vmem:[%s9586_s26 + $0x3e0] ss:$40 sps:$4 sm:$0xff]  }
 0x37a   : > { %v10279_v37 = vadd.f32 %v5387_v1, %v5347_v0  ;;  %v5389_v5 = vpop.f32.mrf.mxu1  ;;  %5641 = vmatpush1.bf16.msra.mxu0 %v8765_v52  ;;  %v8822_v56 = vld [vmem:[%s9586_s26 + $0x930] ss:$40 sps:$4 sm:$0xff]   ;;  %v8830_v52 = vld [vmem:[%s9586_s26 + $0x8e4] ss:$40 sps:$4 sm:$0xff]   ;;  %v8836_v0 = vld [vmem:[%s9586_s26 + $0x894] ss:$40 sps:$4 sm:$0xff]  }
 0x37b   : > { %5682 = vmatpush1.bf16.msra.mxu1 %v8768_v19  ;;  %v5349_v6 = vpop.f32.mrf.mxu0  ;;  %5642 = vmatprep.subr.bf16.mxu0 %v8773_v63  ;;  %v8828_v19 = vld [vmem:[%s9586_s26 + $0x8e0] ss:$40 sps:$4 sm:$0xff]   ;;  %v8833_v63 = vld [vmem:[%s9586_s26 + $0x394] ss:$40 sps:$4 sm:$0xff]   ;;  %v8831_v1 = vld [vmem:[%s9586_s26 + $0x390] ss:$40 sps:$4 sm:$0xff]  }
 0x37c   : > { %v5390_v17 = vpop.f32.mrf.mxu1  ;;  %5683 = vmatprep.subr.bf16.mxu1 %v8776_v2  ;;  %v8834_v2 = vld [vmem:[%s9586_s26 + $0x890] ss:$40 sps:$4 sm:$0xff]   ;;  %v8839_v4 = vld [vmem:[%s9586_s26 + $0x344] ss:$40 sps:$4 sm:$0xff]   ;;  %v8840_v6 = vld [vmem:[%s9586_s26 + $0x840] ss:$40 sps:$4 sm:$0xff]  }
 0x37d   : > { %v8842_v5 = vld [vmem:[%s9586_s26 + $0x844] ss:$40 sps:$4 sm:$0xff]   ;;  %v8843_v17 = vld [vmem:[%s9586_s26 + $0x2f0] ss:$40 sps:$4 sm:$0xff]  }
 0x37e   : > { %5643 = vmatpush1.bf16.msra.mxu0 %v8771_v25  ;;  %v8837_v25 = vld [vmem:[%s9586_s26 + $0x340] ss:$40 sps:$4 sm:$0xff]  }
 0x37f   : > { %5684 = vmatpush1.bf16.msra.mxu1 %v8774_v41  ;;  %5644 = vmatprep.subr.bf16.mxu0 %v8779_v16  ;;  %v8845_v41 = vld [vmem:[%s9586_s26 + $0x2f4] ss:$40 sps:$4 sm:$0xff]  }
 0x380   : > { %5685 = vmatprep.subr.bf16.mxu1 %v8782_v15  ;;  %v8848_v16 = vld [vmem:[%s9586_s26 + $0x7f4] ss:$40 sps:$4 sm:$0xff]   ;;  %v8846_v15 = vld [vmem:[%s9586_s26 + $0x7f0] ss:$40 sps:$4 sm:$0xff]  }
 0x382   : > { %5645 = vmatpush1.bf16.msra.mxu0 %v8777_v3  ;;  %v8851_v3 = vld [vmem:[%s9586_s26 + $0x2a4] ss:$40 sps:$4 sm:$0xff]  }
 0x383   : > { %5686 = vmatpush1.bf16.msra.mxu1 %v8780_v18  ;;  %5646 = vmatprep.subr.bf16.mxu0 %v8785_v20  ;;  %v8854_v18 = vld [vmem:[%s9586_s26 + $0x7a4] ss:$40 sps:$4 sm:$0xff]   ;;  %v8849_v20 = vld [vmem:[%s9586_s26 + $0x2a0] ss:$40 sps:$4 sm:$0xff]  }
 0x384   : > { %5687 = vmatprep.subr.bf16.mxu1 %v8788_v22  ;;  %v8852_v22 = vld [vmem:[%s9586_s26 + $0x7a0] ss:$40 sps:$4 sm:$0xff]  }
 0x386   : > { %5647 = vmatpush1.bf16.msra.mxu0 %v8783_v14  ;;  %v8857_v14 = vld [vmem:[%s9586_s26 + $0xc54] ss:$40 sps:$4 sm:$0xff]  }
 0x387   : > { %5688 = vmatpush1.bf16.msra.mxu1 %v8786_v24  ;;  %5648 = vmatprep.subr.bf16.mxu0 %v8791_v26  ;;  %v8860_v24 = vld [vmem:[%s9586_s26 + $0x1154] ss:$40 sps:$4 sm:$0xff]   ;;  %v8855_v26 = vld [vmem:[%s9586_s26 + $0xc50] ss:$40 sps:$4 sm:$0xff]  }
 0x388   : > { %5689 = vmatprep.subr.bf16.mxu1 %v8794_v27  ;;  %v8858_v27 = vld [vmem:[%s9586_s26 + $0x1150] ss:$40 sps:$4 sm:$0xff]  }
 0x38a   : > { %5649 = vmatpush1.bf16.msra.mxu0 %v8789_v30  ;;  %v8863_v30 = vld [vmem:[%s9586_s26 + $0xc04] ss:$40 sps:$4 sm:$0xff]  }
 0x38b   : > { %5690 = vmatpush1.bf16.msra.mxu1 %v8792_v31  ;;  %5650 = vmatprep.subr.bf16.mxu0 %v8797_v33  ;;  %v8866_v33 = vld [vmem:[%s9586_s26 + $0x1104] ss:$40 sps:$4 sm:$0xff]  }
 0x38c   : > { %5691 = vmatprep.subr.bf16.mxu1 %v8800_v47 }
 0x38e   : > { %5651 = vmatpush1.bf16.msra.mxu0 %v8795_v34 }
 0x38f   : > { %5692 = vmatpush1.bf16.msra.mxu1 %v8798_v35  ;;  %5652 = vmatprep.subr.bf16.mxu0 %v8803_v38  ;;  %v8861_v35 = vld [vmem:[%s9586_s26 + $0xc00] ss:$40 sps:$4 sm:$0xff]  }
 0x390   : > { %5693 = vmatprep.subr.bf16.mxu1 %v8806_v39  ;;  %v8864_v39 = vld [vmem:[%s9586_s26 + $0x1100] ss:$40 sps:$4 sm:$0xff]  }
 0x392   : > { %5653 = vmatpush1.bf16.msra.mxu0 %v8801_v11  ;;  %v8869_v11 = vld [vmem:[%s9586_s26 + $0xbb4] ss:$40 sps:$4 sm:$0xff]  }
 0x393   : > { %5694 = vmatpush1.bf16.msra.mxu1 %v8804_v42  ;;  %5654 = vmatprep.subr.bf16.mxu0 %v8809_v9 }
 0x394   : > { %5695 = vmatprep.subr.bf16.mxu1 %v8812_v43 }
 0x396   : > { %5655 = vmatpush2.bf16.msra.mxu0 %v8807_v60  ;;  %v8867_v60 = vld [vmem:[%s9586_s26 + $0xbb0] ss:$40 sps:$4 sm:$0xff]  }
 0x397   : > { %5696 = vmatpush2.bf16.msra.mxu1 %v8810_v44  ;;  %5656 = vmatprep.subr.bf16.mxu0 %v8815_v46 }
 0x398   : > { %5697 = vmatprep.subr.bf16.mxu1 %v8818_v48  ;;  %v8878_v48 = vld [vmem:[%s9586_s26 + $0x1064] ss:$40 sps:$4 sm:$0xff]  }
 0x39a   : > { %5657 = vmatpush2.bf16.msra.mxu0 %v8813_v49  ;;  %v8873_v49 = vld [vmem:[%s9586_s26 + $0xb60] ss:$40 sps:$4 sm:$0xff]  }
 0x39b   : > { %5698 = vmatpush2.bf16.msra.mxu1 %v8816_v51  ;;  %5658 = vmatprep.subr.bf16.mxu0 %v8821_v53  ;;  %v8876_v51 = vld [vmem:[%s9586_s26 + $0x1060] ss:$40 sps:$4 sm:$0xff]   ;;  %v8881_v53 = vld [vmem:[%s9586_s26 + $0xb14] ss:$40 sps:$4 sm:$0xff]  }
 0x39c   : > { %5699 = vmatprep.subr.bf16.mxu1 %v8824_v54  ;;  %v8884_v54 = vld [vmem:[%s9586_s26 + $0x1014] ss:$40 sps:$4 sm:$0xff]  }
 0x39e   : > { %5659 = vmatpush2.bf16.msra.mxu0 %v8819_v55  ;;  %v8879_v55 = vld [vmem:[%s9586_s26 + $0xb10] ss:$40 sps:$4 sm:$0xff]  }
 0x39f   : > { %5700 = vmatpush2.bf16.msra.mxu1 %v8822_v56  ;;  %5660 = vmatprep.subr.bf16.mxu0 %v8827_v57  ;;  %v8882_v56 = vld [vmem:[%s9586_s26 + $0x1010] ss:$40 sps:$4 sm:$0xff]   ;;  %v8887_v57 = vld [vmem:[%s9586_s26 + $0xac4] ss:$40 sps:$4 sm:$0xff]  }
 0x3a0   : > { %5701 = vmatprep.subr.bf16.mxu1 %v8830_v52  ;;  %v8890_v52 = vld [vmem:[%s9586_s26 + $0xfc4] ss:$40 sps:$4 sm:$0xff]  }
 0x3a2   : > { %5661 = vmatpush2.bf16.msra.mxu0 %v8825_v59  ;;  %v8885_v59 = vld [vmem:[%s9586_s26 + $0xac0] ss:$40 sps:$4 sm:$0xff]  }
 0x3a3   : > { %5702 = vmatpush2.bf16.msra.mxu1 %v8828_v19  ;;  %5662 = vmatprep.subr.bf16.mxu0 %v8833_v63  ;;  %v8888_v19 = vld [vmem:[%s9586_s26 + $0xfc0] ss:$40 sps:$4 sm:$0xff]   ;;  %v8893_v63 = vld [vmem:[%s9586_s26 + $0xa74] ss:$40 sps:$4 sm:$0xff]  }
 0x3a4   : > { %5703 = vmatprep.subr.bf16.mxu1 %v8836_v0  ;;  %v8896_v0 = vld [vmem:[%s9586_s26 + $0xf74] ss:$40 sps:$4 sm:$0xff]  }
 0x3a6   : > { %5663 = vmatpush2.bf16.msra.mxu0 %v8831_v1  ;;  %v8891_v1 = vld [vmem:[%s9586_s26 + $0xa70] ss:$40 sps:$4 sm:$0xff]  }
 0x3a7   : > { %5704 = vmatpush2.bf16.msra.mxu1 %v8834_v2  ;;  %5664 = vmatprep.subr.bf16.mxu0 %v8839_v4  ;;  %v8894_v2 = vld [vmem:[%s9586_s26 + $0xf70] ss:$40 sps:$4 sm:$0xff]   ;;  %v8899_v4 = vld [vmem:[%s9586_s26 + $0xa24] ss:$40 sps:$4 sm:$0xff]  }
 0x3a8   : > { %5705 = vmatprep.subr.bf16.mxu1 %v8842_v5  ;;  %v8902_v5 = vld [vmem:[%s9586_s26 + $0xf24] ss:$40 sps:$4 sm:$0xff]  }
 0x3aa   : > { %5665 = vmatpush2.bf16.msra.mxu0 %v8837_v25  ;;  %v8897_v25 = vld [vmem:[%s9586_s26 + $0xa20] ss:$40 sps:$4 sm:$0xff]  }
 0x3ab   : > { %5706 = vmatpush2.bf16.msra.mxu1 %v8840_v6  ;;  %5666 = vmatprep.subr.bf16.mxu0 %v8845_v41  ;;  %v8900_v6 = vld [vmem:[%s9586_s26 + $0xf20] ss:$40 sps:$4 sm:$0xff]   ;;  %v8905_v41 = vld [vmem:[%s9586_s26 + $0xed4] ss:$40 sps:$4 sm:$0xff]  }
 0x3ac   : > { %5707 = vmatprep.subr.bf16.mxu1 %v8848_v16  ;;  %v8908_v16 = vld [vmem:[%s9586_s26 + $0x13d4] ss:$40 sps:$4 sm:$0xff]  }
 0x3ae   : > { %5667 = vmatpush2.bf16.msra.mxu0 %v8843_v17  ;;  %v8903_v17 = vld [vmem:[%s9586_s26 + $0xed0] ss:$40 sps:$4 sm:$0xff]  }
 0x3af   : > { %5708 = vmatpush2.bf16.msra.mxu1 %v8846_v15  ;;  %5668 = vmatprep.subr.bf16.mxu0 %v8851_v3  ;;  %v8906_v15 = vld [vmem:[%s9586_s26 + $0x13d0] ss:$40 sps:$4 sm:$0xff]   ;;  %v8911_v3 = vld [vmem:[%s9586_s26 + $0xe84] ss:$40 sps:$4 sm:$0xff]  }
 0x3b0   : > { %5709 = vmatprep.subr.bf16.mxu1 %v8854_v18  ;;  %v8914_v18 = vld [vmem:[%s9586_s26 + $0x1384] ss:$40 sps:$4 sm:$0xff]  }
 0x3b2   : > { %5669 = vmatpush2.bf16.msra.mxu0 %v8849_v20  ;;  %v8909_v20 = vld [vmem:[%s9586_s26 + $0xe80] ss:$40 sps:$4 sm:$0xff]  }
 0x3b3   : > { %5710 = vmatpush2.bf16.msra.mxu1 %v8852_v22  ;;  %5720 = vmatprep.subr.bf16.mxu0 %v8857_v14  ;;  %v8912_v22 = vld [vmem:[%s9586_s26 + $0x1380] ss:$40 sps:$4 sm:$0xff]   ;;  %v8917_v14 = vld [vmem:[%s9586_s26 + $0xe34] ss:$40 sps:$4 sm:$0xff]  }
 0x3b4   : > { %5761 = vmatprep.subr.bf16.mxu1 %v8860_v24  ;;  %v8920_v24 = vld [vmem:[%s9586_s26 + $0x1334] ss:$40 sps:$4 sm:$0xff]  }
 0x3b5   : > { %v5426_v31 = vpop.f32.mrf.mxu0  ;;  %5671 = vmatmul.mubr.bf16.vlgmr.msra.gmra.mxu0 %v9715_v40 }
 0x3b6   : > { %v5427_v47 = vadd.f32 %v5426_v31, %v10275_v58  ;;  %v5467_v34 = vpop.f32.mrf.mxu1  ;;  %5712 = vmatmul.mubr.bf16.vlgmr.msra.gmra.mxu1 %v9710_v36  ;;  %5721 = vmatpush1.bf16.msra.mxu0 %v8855_v26  ;;  %v8872_v36 = vld [vmem:[%s9586_s26 + $0x10b4] ss:$40 sps:$4 sm:$0xff]   ;;  %v8915_v26 = vld [vmem:[%s9586_s26 + $0xe30] ss:$40 sps:$4 sm:$0xff]   ;;  %v8926_v31 = vld [vmem:[%s9586_s26 + $0x12e4] ss:$40 sps:$4 sm:$0xff]  }
 0x3b7   : > { %5752 = vmatprep.mubr.bf16.mxu0 %v9764_v28  ;;  %5762 = vmatpush1.bf16.msra.mxu1 %v8858_v27  ;;  %v5428_v38 = vpop.f32.mrf.mxu0  ;;  %v8918_v27 = vld [vmem:[%s9586_s26 + $0x1330] ss:$40 sps:$4 sm:$0xff]  }
 0x3b8   : > { %v10348_v42 = vadd.f32 %v5467_v34, %v5427_v47  ;;  %5793 = vmatprep.mubr.bf16.mxu1 %v9768_v32  ;;  %v5429_v40 = vadd.f32 %v5428_v38, %v10279_v37  ;;  %v5469_v58 = vpop.f32.mrf.mxu1  ;;  %5722 = vmatprep.subr.bf16.mxu0 %v8863_v30  ;;  %v8870_v32 = vld [vmem:[%s9586_s26 + $0x10b0] ss:$40 sps:$4 sm:$0xff]   ;;  %v8875_v37 = vld [vmem:[%s9586_s26 + $0xb64] ss:$40 sps:$4 sm:$0xff]   ;;  %v8924_v47 = vld [vmem:[%s9586_s26 + $0x12e0] ss:$40 sps:$4 sm:$0xff]  }
 0x3b9   : > { %v5430_v9 = vpop.f32.mrf.mxu0  ;;  %5763 = vmatprep.subr.bf16.mxu1 %v8866_v33  ;;  %v8923_v30 = vld [vmem:[%s9586_s26 + $0xde4] ss:$40 sps:$4 sm:$0xff]   ;;  %v8921_v33 = vld [vmem:[%s9586_s26 + $0xde0] ss:$40 sps:$4 sm:$0xff]   ;;  %v8929_v34 = vld [vmem:[%s9586_s26 + $0xd94] ss:$40 sps:$4 sm:$0xff]  }
 0x3ba   : > { %v10353_v28 = vadd.f32 %v5469_v58, %v5429_v40  ;;  %v5471_v43 = vpop.f32.mrf.mxu1  ;;  %5723 = vmatpush1.bf16.msra.mxu0 %v8861_v35  ;;  %v8932_v35 = vld [vmem:[%s9586_s26 + $0x1294] ss:$40 sps:$4 sm:$0xff]   ;;  %v8927_v38 = vld [vmem:[%s9586_s26 + $0xd90] ss:$40 sps:$4 sm:$0xff]   ;;  %v8938_v40 = vld [vmem:[%s9586_s26 + $0x1244] ss:$40 sps:$4 sm:$0xff]  }
 0x3bb   : > { %5764 = vmatpush1.bf16.msra.mxu1 %v8864_v39  ;;  %v5431_v44 = vpop.f32.mrf.mxu0  ;;  %5724 = vmatprep.subr.bf16.mxu0 %v8869_v11  ;;  %v8930_v39 = vld [vmem:[%s9586_s26 + $0x1290] ss:$40 sps:$4 sm:$0xff]   ;;  %v8935_v11 = vld [vmem:[%s9586_s26 + $0xd44] ss:$40 sps:$4 sm:$0xff]   ;;  %v8933_v58 = vld [vmem:[%s9586_s26 + $0xd40] ss:$40 sps:$4 sm:$0xff]  }
 0x3bc   : > { %v5472_v46 = vpop.f32.mrf.mxu1  ;;  %5765 = vmatprep.subr.bf16.mxu1 %v8872_v36  ;;  %v8936_v36 = vld [vmem:[%s9586_s26 + $0x1240] ss:$40 sps:$4 sm:$0xff]   ;;  %v8941_v9 = vld [vmem:[%s9586_s26 + $0xcf4] ss:$40 sps:$4 sm:$0xff]   ;;  %v8942_v44 = vld [vmem:[%s9586_s26 + $0x11f0] ss:$40 sps:$4 sm:$0xff]  }
 0x3bd   : > { %v8944_v43 = vld [vmem:[%s9586_s26 + $0x11f4] ss:$40 sps:$4 sm:$0xff]   ;;  %v8945_v46 = vld [vmem:[%s9586_s26 + $0xca0] ss:$40 sps:$4 sm:$0xff]  }
 0x3be   : > { %5725 = vmatpush1.bf16.msra.mxu0 %v8867_v60  ;;  %v8939_v60 = vld [vmem:[%s9586_s26 + $0xcf0] ss:$40 sps:$4 sm:$0xff]  }
 0x3bf   : > { %5766 = vmatpush1.bf16.msra.mxu1 %v8870_v32  ;;  %5726 = vmatprep.subr.bf16.mxu0 %v8875_v37  ;;  %v8947_v32 = vld [vmem:[%s9586_s26 + $0xca4] ss:$40 sps:$4 sm:$0xff]  }
 0x3c0   : > { %5767 = vmatprep.subr.bf16.mxu1 %v8878_v48  ;;  %v8950_v37 = vld [vmem:[%s9586_s26 + $0x11a4] ss:$40 sps:$4 sm:$0xff]   ;;  %v8948_v48 = vld [vmem:[%s9586_s26 + $0x11a0] ss:$40 sps:$4 sm:$0xff]  }
 0x3c2   : > { %5727 = vmatpush1.bf16.msra.mxu0 %v8873_v49  ;;  %v8951_v49 = vld [vmem:[%s9594_s12 + $0x78] sm:$0xff]  }
 0x3c3   : > { %5768 = vmatpush1.bf16.msra.mxu1 %v8876_v51  ;;  %5728 = vmatprep.subr.bf16.mxu0 %v8881_v53  ;;  %v8952_v51 = vld [vmem:[%s9594_s12 + $0xf8] sm:$0xff]   ;;  %v5803_v53 = vmax.f32 %v10046_v8, 0.0 }
 0x3c4   : > { %5769 = vmatprep.subr.bf16.mxu1 %v8884_v54  ;;  %v5805_v54 = vmax.f32 %v10198_v29, 0.0  ;;  %v8957_v29 = vld [vmem:[%s9594_s12 + $0x30] sm:$0xff]  }
 0x3c6   : > { %5729 = vmatpush1.bf16.msra.mxu0 %v8879_v55  ;;  %v8953_v55 = vld [vmem:[%s9594_s12 + $0x38] sm:$0xff]   ;;  %v5816_v8 = vpack.c.bf16 %v5805_v54, %v5805_v54  ;;  %v8988_v54 = vld [vmem:[%s9594_s12 + $0x128] sm:$0xff]  }
 0x3c7   : > { %5770 = vmatpush1.bf16.msra.mxu1 %v8882_v56  ;;  %5730 = vmatprep.subr.bf16.mxu0 %v8887_v57  ;;  %v8954_v56 = vld [vmem:[%s9594_s12 + $0xb8] sm:$0xff]   ;;  %v8955_v57 = vld [vmem:[%s9594_s12 + $0x70] sm:$0xff]  }
 0x3c8   : > { %5771 = vmatprep.subr.bf16.mxu1 %v8890_v52  ;;  %v5814_v52 = vpack.c.bf16 %v5803_v53, %v5803_v53  ;;  %v8998_v53 = vld [vmem:[%s9594_s12 + $0x1e8] sm:$0xff]  }
 0x3ca   : > { %5731 = vmatpush1.bf16.msra.mxu0 %v8885_v59 }
 0x3cb   : > { %5772 = vmatpush1.bf16.msra.mxu1 %v8888_v19  ;;  %5732 = vmatprep.subr.bf16.mxu0 %v8893_v63  ;;  %v8956_v19 = vld [vmem:[%s9594_s12 + $0xf0] sm:$0xff]  }
 0x3cc   : > { %5773 = vmatprep.subr.bf16.mxu1 %v8896_v0 }
 0x3ce   : > { %5733 = vmatpush1.bf16.msra.mxu0 %v8891_v1  ;;  %v8958_v1 = vld [vmem:[%s9594_s12 + $0xb0] sm:$0xff]  }
 0x3cf   : > { %5774 = vmatpush1.bf16.msra.mxu1 %v8894_v2  ;;  %5734 = vmatprep.subr.bf16.mxu0 %v8899_v4  ;;  %v8959_v2 = vld [vmem:[%s9594_s12 + $0x68] sm:$0xff]  }
 0x3d0   : > { %5775 = vmatprep.subr.bf16.mxu1 %v8902_v5  ;;  %v8960_v4 = vld [vmem:[%s9594_s12 + $0xe8] sm:$0xff]  }
 0x3d2   : > { %5735 = vmatpush1.bf16.msra.mxu0 %v8897_v25  ;;  %v8961_v25 = vld [vmem:[%s9594_s12 + $0x28] sm:$0xff]  }
 0x3d3   : > { %5776 = vmatpush1.bf16.msra.mxu1 %v8900_v6  ;;  %5736 = vmatprep.subr.bf16.mxu0 %v8905_v41  ;;  %v8962_v41 = vld [vmem:[%s9594_s12 + $0xa8] sm:$0xff]  }
 0x3d4   : > { %5777 = vmatprep.subr.bf16.mxu1 %v8908_v16  ;;  %v8963_v16 = vld [vmem:[%s9594_s12 + $0x60] sm:$0xff]  }
 0x3d6   : > { %5737 = vmatpush2.bf16.msra.mxu0 %v8903_v17 }
 0x3d7   : > { %5778 = vmatpush2.bf16.msra.mxu1 %v8906_v15  ;;  %5738 = vmatprep.subr.bf16.mxu0 %v8911_v3  ;;  %v8964_v15 = vld [vmem:[%s9594_s12 + $0xe0] sm:$0xff]  }
 0x3d8   : > { %5779 = vmatprep.subr.bf16.mxu1 %v8914_v18  ;;  %v8965_v3 = vld [vmem:[%s9594_s12 + $0x20] sm:$0xff]  }
 0x3d9   : > { %v8966_v18 = vld [vmem:[%s9594_s12 + $0xa0] sm:$0xff]  }
 0x3da   : > { %5739 = vmatpush2.bf16.msra.mxu0 %v8909_v20  ;;  %v8967_v20 = vld [vmem:[%s9594_s12 + $0x58] sm:$0xff]  }
 0x3db   : > { %5780 = vmatpush2.bf16.msra.mxu1 %v8912_v22  ;;  %5740 = vmatprep.subr.bf16.mxu0 %v8917_v14  ;;  %v8968_v22 = vld [vmem:[%s9594_s12 + $0xd8] sm:$0xff]  }
 0x3dc   : > { %5781 = vmatprep.subr.bf16.mxu1 %v8920_v24  ;;  %v8969_v14 = vld [vmem:[%s9594_s12 + $0x18] sm:$0xff]  }
 0x3dd   : > { %v8970_v24 = vld [vmem:[%s9594_s12 + $0x98] sm:$0xff]  }
 0x3de   : > { %5741 = vmatpush2.bf16.msra.mxu0 %v8915_v26  ;;  %v8971_v26 = vld [vmem:[%s9594_s12 + $0x50] sm:$0xff]  }
 0x3df   : > { %5782 = vmatpush2.bf16.msra.mxu1 %v8918_v27  ;;  %5742 = vmatprep.subr.bf16.mxu0 %v8923_v30  ;;  %v8972_v27 = vld [vmem:[%s9594_s12 + $0xd0] sm:$0xff]  }
 0x3e0   : > { %5783 = vmatprep.subr.bf16.mxu1 %v8926_v31  ;;  %v8973_v30 = vld [vmem:[%s9594_s12 + $0x10] sm:$0xff]  }
 0x3e1   : > { %v8974_v31 = vld [vmem:[%s9594_s12 + $0x90] sm:$0xff]  }
 0x3e2   : > { %5743 = vmatpush2.bf16.msra.mxu0 %v8921_v33  ;;  %v8975_v33 = vld [vmem:[%s9594_s12 + $0x48] sm:$0xff]  }
 0x3e3   : > { %5784 = vmatpush2.bf16.msra.mxu1 %v8924_v47  ;;  %5744 = vmatprep.subr.bf16.mxu0 %v8929_v34  ;;  %v8976_v47 = vld [vmem:[%s9594_s12 + $0xc8] sm:$0xff]  }
 0x3e4   : > { %5785 = vmatprep.subr.bf16.mxu1 %v8932_v35  ;;  %v8977_v34 = vld [vmem:[%s9594_s12 + $0x8] sm:$0xff]  }
 0x3e5   : > { %v8978_v35 = vld [vmem:[%s9594_s12 + $0x88] sm:$0xff]  }
 0x3e6   : > { %5745 = vmatpush2.bf16.msra.mxu0 %v8927_v38  ;;  %v8979_v38 = vld [vmem:[%s9594_s12 + $0x40] sm:$0xff]  }
 0x3e7   : > { %5786 = vmatpush2.bf16.msra.mxu1 %v8930_v39  ;;  %5746 = vmatprep.subr.bf16.mxu0 %v8935_v11  ;;  %v8980_v39 = vld [vmem:[%s9594_s12 + $0xc0] sm:$0xff]  }
 0x3e8   : > { %5787 = vmatprep.subr.bf16.mxu1 %v8938_v40  ;;  %v8981_v11 = vld [vmem:[%s9594_s12] sm:$0xff]   ;;  %v5802_v40 = vmax.f32 %v10041_v62, 0.0  ;;  %v8985_v62 = vld [vmem:[%s9594_s12 + $0x170] sm:$0xff]  }
 0x3ea   : > { %5747 = vmatpush2.bf16.msra.mxu0 %v8933_v58  ;;  %v8982_v58 = vld [vmem:[%s9594_s12 + $0x80] sm:$0xff]  }
 0x3eb   : > { %5788 = vmatpush2.bf16.msra.mxu1 %v8936_v36  ;;  %5748 = vmatprep.subr.bf16.mxu0 %v8941_v9  ;;  %v8983_v36 = vld [vmem:[%s9594_s12 + $0x178] sm:$0xff]   ;;  %v5804_v9 = vmax.f32 %v10193_v23, 0.0  ;;  %v8994_v23 = vld [vmem:[%s9594_s12 + $0x1f0] sm:$0xff]  }
 0x3ec   : > { %5789 = vmatprep.subr.bf16.mxu1 %v8944_v43  ;;  %v8990_v43 = vld [vmem:[%s9594_s12 + $0x1f8] sm:$0xff]  }
 0x3ee   : > { %5749 = vmatpush2.bf16.msra.mxu0 %v8939_v60  ;;  %v5807_v60 = vmax.f32 %v10353_v28, 0.0  ;;  %v8986_v28 = vld [vmem:[%s9594_s12 + $0x130] sm:$0xff]  }
 0x3ef   : > { %5790 = vmatpush2.bf16.msra.mxu1 %v8942_v44  ;;  %5750 = vmatprep.subr.bf16.mxu0 %v8947_v32  ;;  %v8984_v44 = vld [vmem:[%s9594_s12 + $0x138] sm:$0xff]   ;;  %v5813_v32 = vpack.c.bf16 %v5802_v40, %v5802_v40 }
 0x3f0   : > { %5791 = vmatprep.subr.bf16.mxu1 %v8950_v37  ;;  %v5815_v37 = vpack.c.bf16 %v5804_v9, %v5804_v9  ;;  %v9021_v9 = vld [vmem:[%s9594_s12 + $0x260] sm:$0xff]  }
 0x3f2   : > { %5751 = vmatpush2.bf16.msra.mxu0 %v8945_v46  ;;  %v8992_v46 = vld [vmem:[%s9594_s12 + $0x1b8] sm:$0xff]  }
 0x3f3   : > { %5792 = vmatpush2.bf16.msra.mxu1 %v8948_v48  ;;  %7733 = vmatprep.subr.bf16.mxu0 %v8951_v49  ;;  %v5818_v48 = vpack.c.bf16 %v5807_v60, %v5807_v60  ;;  %v8987_v49 = vld [vmem:[%s9594_s12 + $0x168] sm:$0xff]  }
 0x3f4   : > { %7755 = vmatprep.subr.bf16.mxu1 %v8952_v51  ;;  %v8996_v51 = vld [vmem:[%s9594_s12 + $0x1b0] sm:$0xff]  }
 0x3f5   : > { %v10416_v59 = vpop.f32.mrf.mxu0  ;;  %5753 = vmatmul.mubr.bf16.vlgmr.msra.gmra.mxu0 %v9816_v21 }
 0x3f6   : > { %v10420_v63 = vpop.f32.mrf.mxu1  ;;  %5794 = vmatmul.mubr.bf16.vlgmr.msra.gmra.mxu1 %v9813_v13  ;;  %7734 = vmatpush3.bf16.msra.mxu0 %v8953_v55  ;;  %v8989_v55 = vld [vmem:[%s9594_s12 + $0x160] sm:$0xff]  }
 0x3f7   : > { %6495 = vmatprep.mubr.bf16.mxu0 %v5814_v52  ;;  %7756 = vmatpush3.bf16.msra.mxu1 %v8954_v56  ;;  %v10424_v0 = vpop.f32.mrf.mxu0  ;;  %v9000_v56 = vld [vmem:[%s9594_s12 + $0x1a8] sm:$0xff]   ;;  %v8991_v52 = vld [vmem:[%s9594_s12 + $0x120] sm:$0xff]  }
 0x3f8   : > { %6535 = vmatprep.mubr.bf16.mxu1 %v5816_v8  ;;  %v10428_v21 = vpop.f32.mrf.mxu1  ;;  %7735 = vmatprep.subr.bf16.mxu0 %v8955_v57  ;;  %v9002_v57 = vld [vmem:[%s9594_s12 + $0x1e0] sm:$0xff]  }
 0x3f9   : > { %v5512_v5 = vpop.f32.mrf.mxu0  ;;  %7757 = vmatprep.subr.bf16.mxu1 %v8956_v19  ;;  %v8993_v19 = vld [vmem:[%s9594_s12 + $0x158] sm:$0xff]   ;;  %v9004_v8 = vld [vmem:[%s9594_s12 + $0x1a0] sm:$0xff]  }
 0x3fa   : > { %v5553_v13 = vpop.f32.mrf.mxu1  ;;  %7736 = vmatpush3.bf16.msra.mxu0 %v8957_v29  ;;  %v9006_v29 = vld [vmem:[%s9594_s12 + $0x1d8] sm:$0xff]   ;;  %v9009_v5 = vld [vmem:[%s9594_s12 + $0x1d0] sm:$0xff]  }
 0x3fb   : > { %7758 = vmatpush3.bf16.msra.mxu1 %v8958_v1  ;;  %v5513_v6 = vpop.f32.mrf.mxu0  ;;  %7737 = vmatprep.subr.bf16.mxu0 %v8959_v2  ;;  %v8995_v1 = vld [vmem:[%s9594_s12 + $0x118] sm:$0xff]   ;;  %v8997_v2 = vld [vmem:[%s9594_s12 + $0x150] sm:$0xff]  }
 0x3fc   : > { %v5554_v17 = vpop.f32.mrf.mxu1  ;;  %7759 = vmatprep.subr.bf16.mxu1 %v8960_v4  ;;  %v9008_v4 = vld [vmem:[%s9594_s12 + $0x198] sm:$0xff]   ;;  %v8999_v13 = vld [vmem:[%s9594_s12 + $0x110] sm:$0xff]  }
 0x3fd   : > { %v9010_v6 = vld [vmem:[%s9594_s12 + $0x190] sm:$0xff]   ;;  %v9005_v17 = vld [vmem:[%s9594_s12 + $0x140] sm:$0xff]  }
 0x3fe   : > { %7738 = vmatpush3.bf16.msra.mxu0 %v8961_v25  ;;  %v9001_v25 = vld [vmem:[%s9594_s12 + $0x148] sm:$0xff]  }
 0x3ff   : > { %7760 = vmatpush3.bf16.msra.mxu1 %v8962_v41  ;;  %7739 = vmatprep.subr.bf16.mxu0 %v8963_v16  ;;  %v9011_v41 = vld [vmem:[%s9594_s12 + $0x1c8] sm:$0xff]  }
 0x400   : > { %7761 = vmatprep.subr.bf16.mxu1 %v8964_v15  ;;  %v9003_v16 = vld [vmem:[%s9594_s12 + $0x108] sm:$0xff]   ;;  %v1759_v15 = vrot.slane %v10257_v45, %v574_v50  ;;  %v9014_v50 = vld [vmem:[%s9594_s12 + $0x180] sm:$0xff]  }
 0x402   : > { %7740 = vmatpush3.bf16.msra.mxu0 %v8965_v3  ;;  %v9012_v3 = vld [vmem:[%s9594_s12 + $0x188] sm:$0xff]  }
 0x403   : > { %7762 = vmatpush3.bf16.msra.mxu1 %v8966_v18  ;;  %7741 = vmatprep.subr.bf16.mxu0 %v8967_v20  ;;  %v9013_v18 = vld [vmem:[%s9594_s12 + $0x1c0] sm:$0xff]   ;;  %v1763_v20 = vrot.slane %v10257_v45, %v578_v61  ;;  %v9017_v61 = vld [vmem:[%s9594_s12 + $0x270] sm:$0xff]  }
 0x404   : > { %7763 = vmatprep.subr.bf16.mxu1 %v8968_v22  ;;  %v9007_v22 = vld [vmem:[%s9594_s12 + $0x100] sm:$0xff]  }
 0x406   : > { %7742 = vmatpush3.bf16.msra.mxu0 %v8969_v14  ;;  %v5806_v14 = vmax.f32 %v10348_v42, 0.0 }
 0x407   : > { %7764 = vmatpush3.bf16.msra.mxu1 %v8970_v24  ;;  %7743 = vmatprep.subr.bf16.mxu0 %v8971_v26  ;;  %v9015_v24 = vld [vmem:[%s9594_s12 + $0x278] sm:$0xff]   ;;  %v5509_v26 = vadd.f32 %v10416_v59, %v1759_v15 }
 0x408   : > { %7765 = vmatprep.subr.bf16.mxu1 %v8972_v27  ;;  %v5511_v27 = vadd.f32 %v10424_v0, %v1763_v20 }
 0x409   : > { %v5550_v45 = vadd.f32 %v10420_v63, %v5509_v26 }
 0x40a   : > { %7744 = vmatpush3.bf16.msra.mxu0 %v8973_v30  ;;  %v5817_v30 = vpack.c.bf16 %v5806_v14, %v5806_v14  ;;  %v5552_v59 = vadd.f32 %v10428_v21, %v5511_v27 }
 0x40b   : > { %7766 = vmatpush3.bf16.msra.mxu1 %v8974_v31  ;;  %7745 = vmatprep.subr.bf16.mxu0 %v8975_v33 }
 0x40c   : > { %7767 = vmatprep.subr.bf16.mxu1 %v8976_v47  ;;  %v9018_v47 = vld [vmem:[%s9594_s12 + $0x230] sm:$0xff]  }
 0x40e   : > { %7746 = vmatpush3.bf16.msra.mxu0 %v8977_v34  ;;  %v9019_v34 = vld [vmem:[%s9594_s12 + $0x268] sm:$0xff]  }
 0x40f   : > { %7768 = vmatpush3.bf16.msra.mxu1 %v8978_v35  ;;  %7747 = vmatprep.subr.bf16.mxu0 %v8979_v38 }
 0x410   : > { %7769 = vmatprep.subr.bf16.mxu1 %v8980_v39 }
 0x412   : > { %7748 = vmatpush3.bf16.msra.mxu0 %v8981_v11 }
 0x413   : > { %7770 = vmatpush3.bf16.msra.mxu1 %v8982_v58  ;;  %7777 = vmatprep.subr.bf16.mxu0 %v8983_v36  ;;  %v9020_v58 = vld [vmem:[%s9594_s12 + $0x228] sm:$0xff]  }
 0x414   : > { %7799 = vmatprep.subr.bf16.mxu1 %v8990_v43 }
 0x415   : > { %6496 = vmatmul.mubr.bf16.vlgmr.msra.gmra.mxu0 %v5813_v32  ;;  %v9022_v32 = vld [vmem:[%s9594_s12 + $0x220] sm:$0xff]  }
 0x416   : > { %6536 = vmatmul.mubr.bf16.vlgmr.msra.gmra.mxu1 %v5815_v37  ;;  %7778 = vmatpush3.bf16.msra.mxu0 %v8984_v44  ;;  %v9023_v37 = vld [vmem:[%s9594_s12 + $0x258] sm:$0xff]  }
 0x417   : > { %6575 = vmatprep.mubr.bf16.mxu0 %v5818_v48  ;;  %7779 = vmatprep.subr.bf16.mxu0 %v8985_v62  ;;  %v9025_v48 = vld [vmem:[%s9594_s12 + $0x250] sm:$0xff]  }
 0x418   : > { %7800 = vmatpush3.bf16.msra.mxu1 %v8992_v46  ;;  %v9024_v46 = vld [vmem:[%s9594_s12 + $0x218] sm:$0xff]  }
 0x419   : > { %7801 = vmatprep.subr.bf16.mxu1 %v8994_v23  ;;  %v9026_v23 = vld [vmem:[%s9594_s12 + $0x210] sm:$0xff]  }
 0x41a   : > { %7780 = vmatpush3.bf16.msra.mxu0 %v8986_v28  ;;  %v9027_v28 = vld [vmem:[%s9594_s12 + $0x248] sm:$0xff]  }
 0x41b   : > { %7781 = vmatprep.subr.bf16.mxu0 %v8987_v49  ;;  %v9028_v49 = vld [vmem:[%s9594_s12 + $0x208] sm:$0xff]  }
 0x41c   : > { %7802 = vmatpush3.bf16.msra.mxu1 %v8996_v51  ;;  %v9029_v51 = vld [vmem:[%s9594_s12 + $0x240] sm:$0xff]  }
 0x41d   : > { %7803 = vmatprep.subr.bf16.mxu1 %v8998_v53  ;;  %v9030_v53 = vld [vmem:[%s9594_s12 + $0x200] sm:$0xff]  }
 0x41e   : > { %7782 = vmatpush3.bf16.msra.mxu0 %v8988_v54 }
 0x41f   : > { %7783 = vmatprep.subr.bf16.mxu0 %v8989_v55 }
 0x420   : > { %7804 = vmatpush3.bf16.msra.mxu1 %v9000_v56 }
 0x421   : > { %7805 = vmatprep.subr.bf16.mxu1 %v9002_v57 }
 0x422   : > { %7784 = vmatpush3.bf16.msra.mxu0 %v8991_v52 }
 0x423   : > { %7785 = vmatprep.subr.bf16.mxu0 %v8993_v19 }
 0x424   : > { %7806 = vmatpush3.bf16.msra.mxu1 %v9004_v8 }
 0x425   : > { %7807 = vmatprep.subr.bf16.mxu1 %v9006_v29 }
 0x426   : > { %7786 = vmatpush3.bf16.msra.mxu0 %v8995_v1  ;;  %v1729_v1 = vld [vmem:[%s9592_s30 + $0x8] sm:$0x3] }
 0x427   : > { %7787 = vmatprep.subr.bf16.mxu0 %v8997_v2  ;;  %v1767_v2 = vrot.slane %v1729_v1, %v9690_v10 }
 0x428   : > { %7808 = vmatpush3.bf16.msra.mxu1 %v9008_v4  ;;  %v1771_v4 = vrot.slane %v1729_v1, %v9694_v12 }
 0x429   : > { %7809 = vmatprep.subr.bf16.mxu1 %v9009_v5 }
 0x42a   : > { %7788 = vmatpush3.bf16.msra.mxu0 %v8999_v13 }
 0x42b   : > { %7789 = vmatprep.subr.bf16.mxu0 %v9001_v25 }
 0x42c   : > { %7810 = vmatpush3.bf16.msra.mxu1 %v9010_v6 }
 0x42d   : > { %7811 = vmatprep.subr.bf16.mxu1 %v9011_v41 }
 0x42e   : > { %7790 = vmatpush3.bf16.msra.mxu0 %v9003_v16 }
 0x42f   : > { %7791 = vmatprep.subr.bf16.mxu0 %v9005_v17 }
 0x430   : > { %7812 = vmatpush3.bf16.msra.mxu1 %v9012_v3 }
 0x431   : > { %7813 = vmatprep.subr.bf16.mxu1 %v9013_v18 }
 0x432   : > { %7792 = vmatpush3.bf16.msra.mxu0 %v9007_v22 }
 0x433   : > { %7821 = vmatprep.subr.bf16.mxu0 %v9015_v24 }
 0x434   : > { %7814 = vmatpush3.bf16.msra.mxu1 %v9014_v50 }
 0x435   : > { %v5590_v42 = vpop.f32.mrf.mxu0  ;;  %6576 = vmatmul.mubr.bf16.vlgmr.msra.gmra.mxu0 %v5817_v30 }
 0x436   : > { %v5591_v31 = vadd.f32 %v5590_v42, %v5550_v45  ;;  %v5631_v33 = vpop.f32.mrf.mxu1  ;;  %7822 = vmatpush3.bf16.msra.mxu0 %v9016_v7 }
 0x437   : > { %v5592_v0 = vpop.f32.mrf.mxu0  ;;  %7823 = vmatprep.subr.bf16.mxu0 %v9017_v61 }
 0x438   : > { %v5632_v35 = vadd.f32 %v5631_v33, %v5591_v31  ;;  %v5593_v38 = vadd.f32 %v5592_v0, %v5552_v59  ;;  %v5633_v39 = vpop.f32.mrf.mxu1 }
 0x439   : > { %v5594_v11 = vpop.f32.mrf.mxu0 }
 0x43a   : > { %v5634_v63 = vadd.f32 %v5633_v39, %v5593_v38  ;;  %v5635_v40 = vpop.f32.mrf.mxu1  ;;  %7824 = vmatpush3.bf16.msra.mxu0 %v9018_v47  ;;  %v5808_v21 = vmax.f32 %v5632_v35, 0.0 }
 0x43b   : > { %v5595_v36 = vpop.f32.mrf.mxu0  ;;  %7825 = vmatprep.subr.bf16.mxu0 %v9019_v34 }
 0x43c   : > { %v5809_v43 = vmax.f32 %v5634_v63, 0.0  ;;  %v5636_v60 = vpop.f32.mrf.mxu1  ;;  %v5819_v62 = vpack.c.bf16 %v5808_v21, %v5808_v21 }
 0x43e   : > { %v5820_v44 = vpack.c.bf16 %v5809_v43, %v5809_v43  ;;  %7826 = vmatpush3.bf16.msra.mxu0 %v9020_v58 }
 0x43f   : > { %7827 = vmatprep.subr.bf16.mxu0 %v9021_v9 }
 0x440   : > { %6615 = vmatprep.mubr.bf16.mxu1 %v5820_v44 }
 0x441   : > { %6616 = vmatmul.mubr.bf16.vlgmr.msra.gmra.mxu1 %v5819_v62 }
 0x442   : > { %7828 = vmatpush3.bf16.msra.mxu0 %v9022_v32 }
 0x443   : > { %7829 = vmatprep.subr.bf16.mxu0 %v9023_v37 }
 0x446   : > { %7830 = vmatpush3.bf16.msra.mxu0 %v9024_v46  ;;  %v5812_v46 = vld [vmem:[#allocation2] sm:$0xff] }
 0x447   : > { %7831 = vmatprep.subr.bf16.mxu0 %v9025_v48 }
 0x44a   : > { %7832 = vmatpush3.bf16.msra.mxu0 %v9026_v23 }
 0x44b   : > { %7833 = vmatprep.subr.bf16.mxu0 %v9027_v28 }
 0x44e   : > { %7834 = vmatpush3.bf16.msra.mxu0 %v9028_v49 }
 0x44f   : > { %7835 = vmatprep.subr.bf16.mxu0 %v9029_v51 }
 0x452   : > { %7836 = vmatpush3.bf16.msra.mxu0 %v9030_v53 }
 0x475   : > { %v5672_v54 = vpop.f32.mrf.mxu0 }
 0x476   : > { %v5713_v55 = vpop.f32.mrf.mxu1  ;;  %v5673_v5 = vadd.f32 %v5672_v54, %v1767_v2 }
 0x477   : > { %v5674_v56 = vpop.f32.mrf.mxu0 }
 0x478   : > { %v5715_v57 = vpop.f32.mrf.mxu1  ;;  %v5675_v13 = vadd.f32 %v5674_v56, %v1771_v4  ;;  %v5714_v25 = vadd.f32 %v5713_v55, %v5673_v5 }
 0x479   : > { %v5676_v52 = vpop.f32.mrf.mxu0 }
 0x47a   : > { %v5717_v19 = vpop.f32.mrf.mxu1  ;;  %v5716_v41 = vadd.f32 %v5715_v57, %v5675_v13 }
 0x47b   : > { %v5677_v8 = vpop.f32.mrf.mxu0 }
 0x47c   : > { %v5718_v29 = vpop.f32.mrf.mxu1 }
 0x4b5   : > { %v5754_v6 = vpop.f32.mrf.mxu0 }
 0x4b6   : > { %v5755_v16 = vadd.f32 %v5754_v6, %v5714_v25  ;;  %v5795_v17 = vpop.f32.mrf.mxu1 }
 0x4b7   : > { %v5756_v15 = vpop.f32.mrf.mxu0 }
 0x4b8   : > { %v5796_v3 = vadd.f32 %v5795_v17, %v5755_v16  ;;  %v5757_v18 = vadd.f32 %v5756_v15, %v5716_v41  ;;  %v5797_v20 = vpop.f32.mrf.mxu1 }
 0x4b9   : > { %v5758_v22 = vpop.f32.mrf.mxu0 }
 0x4ba   : > { %v5798_v14 = vadd.f32 %v5797_v20, %v5757_v18  ;;  %v5799_v24 = vpop.f32.mrf.mxu1  ;;  %v5810_v26 = vmax.f32 %v5796_v3, 0.0 }
 0x4bb   : > { %v5759_v50 = vpop.f32.mrf.mxu0 }
 0x4bc   : > { %v5811_v27 = vmax.f32 %v5798_v14, 0.0  ;;  %v5800_v10 = vpop.f32.mrf.mxu1  ;;  %v5821_v12 = vpack.c.bf16 %v5810_v26, %v5810_v26 }
 0x4be   : > { %v5822_v7 = vpack.c.bf16 %v5811_v27, %v5811_v27 }
 0x4c0   : > { %6655 = vmatprep.mubr.bf16.mxu0 %v5822_v7 }
 0x4c1   : > { %6656 = vmatmul.mubr.bf16.vlgmr.msra.gmra.mxu0 %v5821_v12 }
 0x4d5   : > { %v7749_v30 = vpop.f32.mrf.mxu0 }
 0x4d6   : > { %v7771_v61 = vpop.f32.mrf.mxu1 }
 0x4d7   : > { %v7750_v45 = vpop.f32.mrf.mxu0 }
 0x4d8   : > { %v7751_v42 = vadd.f32 %v7750_v45, %v7749_v30  ;;  %v7772_v59 = vpop.f32.mrf.mxu1 }
 0x4d9   : > { %v7773_v31 = vadd.f32 %v7772_v59, %v7771_v61  ;;  %v7752_v33 = vpop.f32.mrf.mxu0 }
 0x4da   : > { %v7774_v47 = vpop.f32.mrf.mxu1 }
 0x4db   : > { %v6538_v0 = vadd.f32 %v7773_v31, %v7751_v42  ;;  %v7753_v34 = vpop.f32.mrf.mxu0 }
 0x4dc   : > { %v7775_v35 = vpop.f32.mrf.mxu1 }
 0x4f5   : > { %v7793_v38 = vpop.f32.mrf.mxu0 }
 0x4f7   : > { %v7794_v39 = vpop.f32.mrf.mxu0 }
 0x4f8   : > { %v7795_v11 = vadd.f32 %v7794_v39, %v7793_v38 }
 0x4f9   : > { %v7796_v63 = vpop.f32.mrf.mxu0 }
 0x4fa   : > { %v6578_v40 = vadd.f32 %v7795_v11, %v6538_v0 }
 0x4fb   : > { %v7797_v58 = vpop.f32.mrf.mxu0 }
 0x501   : > { %v7815_v21 = vpop.f32.mrf.mxu1 }
 0x503   : > { %v7816_v36 = vpop.f32.mrf.mxu1 }
 0x504   : > { %v7817_v9 = vadd.f32 %v7816_v36, %v7815_v21 }
 0x505   : > { %v7818_v43 = vpop.f32.mrf.mxu1 }
 0x506   : > { %v6618_v60 = vadd.f32 %v7817_v9, %v6578_v40 }
 0x507   : > { %v7819_v44 = vpop.f32.mrf.mxu1 }
 0x581   : > { %v7837_v32 = vpop.f32.mrf.mxu0 }
 0x583   : > { %v7838_v62 = vpop.f32.mrf.mxu0 }
 0x584   : > { %v7839_v37 = vadd.f32 %v7838_v62, %v7837_v32 }
 0x585   : > { %v7840_v48 = vpop.f32.mrf.mxu0 }
 0x586   : > { %v6658_v23 = vadd.f32 %v7839_v37, %v6618_v60  ;;  %6668 = sbr.rel (%p7720_p13) target bundleno = 1651 (0x673), region = 96 }
 0x587   : > { %v7841_v28 = vpop.f32.mrf.mxu0 }
 0x588   : > { %v6663_v49 = vadd.f32 %v6658_v23, %v5812_v46 }
 0x58a   : > { %6664 = vst [vmem:[#allocation2] sm:$0xff] %v6663_v49 }
 0x58b   : > { %v9032_v51 = vld [vmem:[#allocation11 + $0x38] sm:$0xff]   ;;  %v9322_v53 = vmov 0.0   ;;  %v9033_v54 = vld [vmem:[#allocation11 + $0x30] sm:$0xff]   ;;  %vm9323_vm0 = vmmov 0   ;;  %v9034_v55 = vld [vmem:[#allocation11 + $0x28] sm:$0xff]  }
 0x58c   : > { %7852 = vmatprep.subr.bf16.mxu0 %v9322_v53  ;;  %7868 = vmatprep.mubr.msk.bf16.mxu0 %vm9323_vm0, %v9322_v53  ;;  %v9035_v56 = vld [vmem:[#allocation11 + $0x20] sm:$0xff]   ;;  %v9036_v57 = vld [vmem:[#allocation11 + $0x18] sm:$0xff]   ;;  %v9037_v52 = vld [vmem:[#allocation11 + $0x10] sm:$0xff]  }
 0x58d   : > { %7853 = vmatpush3.bf16.msra.mxu0 %v9032_v51  ;;  %v7721_v8 = vld [vmem:[#allocation10] ss:$0 sm:$0xff]  ;;  %v9038_v1 = vld [vmem:[#allocation11 + $0x8] sm:$0xff]   ;;  %v9039_v4 = vld [vmem:[#allocation11] sm:$0xff]  }
 0x58e   : > { %7854 = vmatprep.subr.bf16.mxu0 %v9322_v53  ;;  %v7722_v13 = vld [vmem:[#allocation13] ss:$0 sm:$0xff] }
 0x591   : > { %7855 = vmatpush3.bf16.msra.mxu0 %v9033_v54  ;;  %v6669_v19 = vld [vmem:[#allocation2] sm:$0xff] }
 0x592   : > { %7856 = vmatprep.subr.bf16.mxu0 %v9322_v53  ;;  %v6677_v29 = vadd.f32 %v7721_v8, %v6669_v19 }
 0x594   : > { %v6678_v2 = vmax.f32 %v6677_v29, 0.0 }
 0x595   : > { %7857 = vmatpush3.bf16.msra.mxu0 %v9034_v55 }
 0x596   : > { %7858 = vmatprep.subr.bf16.mxu0 %v9322_v53  ;;  %v6679_v5 = vpack.c.bf16 %v6678_v2, %v6678_v2 }
 0x599   : > { %7859 = vmatpush3.bf16.msra.mxu0 %v9035_v56 }
 0x59a   : > { %7860 = vmatprep.subr.bf16.mxu0 %v9322_v53 }
 0x59d   : > { %7861 = vmatpush3.bf16.msra.mxu0 %v9036_v57 }
 0x59e   : > { %7862 = vmatprep.subr.bf16.mxu0 %v9322_v53 }
 0x5a1   : > { %7863 = vmatpush3.bf16.msra.mxu0 %v9037_v52 }
 0x5a2   : > { %7864 = vmatprep.subr.bf16.mxu0 %v9322_v53 }
 0x5a5   : > { %7865 = vmatpush3.bf16.msra.mxu0 %v9038_v1 }
 0x5a6   : > { %7866 = vmatprep.subr.bf16.mxu0 %v9322_v53 }
 0x5a9   : > { %7867 = vmatpush3.bf16.msra.mxu0 %v9039_v4 }
 0x5ac   : > { %7869 = vmatmul.mubr.bf16.vlgmr.msra.gmra.mxu0 %v6679_v5 }
 0x66c   : > { %v6785_v25 = vpop.f32.mrf.mxu0 }
 0x66d   : > { %v6786_v6 = vadd.f32 %v7722_v13, %v6785_v25 }
 0x66e   : > { %v7870_v41 = vpop.f32.mrf.mxu0 }
 0x66f   : > { %6791 = vst [vmem:[%s10598_s0] sm:$0xff] %v6786_v6 }
 0x670   : > { %v6788_v16 = vpop.f32.mrf.mxu0 }
 0x672   : > { %v7871_v17 = vpop.f32.mrf.mxu0 }
 0x673 PF: > { %s10599_s12 = sld [smem:[#allocation20_spill]]  ;;  %s10602_s30 = smov %s9296_s10 }
 0x674   : > { %s10600_s18 = sld [smem:[#allocation19_spill]] }
 0x675   : > { %s10601_s11 = sld [smem:[#allocation21_spill]] }
 0x679   : > { %p19_p9 = scmp.ge.s32.totalorder %s10599_s12, 6  }
 0x67a   : > { %s10603_s10 = smov %s10600_s18 }
 0x67b   :  { %21 = sbr.rel (!%p19_p9) target bundleno = 10 (0xa), region = 141 }
 0x680   :  { %6803 = vsyncpa [#allocation4], 1 }
 0x681   :  { %6805 = vsyncpa [#allocation4 + $0x1], 1 }
 0x682   :  { %6806 = vsyncpa [#allocation6], 1 }
 0x683   :  { %6807 = vsyncpa [#allocation12], 1 }

</bundles_post_ra>
